<compile_context>
chip_gen: v7x
topology: tpu7x:2x2x1
jax: 0.10.0
libtpu: 0.0.40
codegen_flags: <defaults>
</compile_context>

<pallas_src>
import functools
import math

import jax
import jax.numpy as jnp
from jax.experimental import pallas as pl
from jax.experimental.pallas import tpu as pltpu


# ---------------------------------------------------------------------------
# Kernel: vector math in f32; MXU operands bf16 with f32 accumulation.
# ---------------------------------------------------------------------------
def _resblock_kernel(
    x_ref,                       # (B_TILE, L, D)  activations
    ln1_g_ref, ln1_b_ref,        # (1, D)  f32
    wqkv_ref, bqkv_ref,          # (D, 3D) bf16, (1, 3D) f32   (y = x @ W convention)
    wo_ref, bo_ref,              # (D, D)  bf16, (1, D)  f32
    ln2_g_ref, ln2_b_ref,        # (1, D)  f32
    wfc_ref, bfc_ref,            # (D, 4D) bf16, (1, 4D) f32
    wpr_ref, bpr_ref,            # (4D, D) bf16, (1, D)  f32
    o_ref,                       # (B_TILE, L, D)
    attn_scratch,                # (B_TILE*L, D) bf16 VMEM (per-head-group outputs)
    *, n_head: int, head_dim: int, b_tile: int, seq_len: int,
    head_group: int, ff_chunk: int,
):
    B, L = b_tile, seq_len
    D = n_head * head_dim
    BL = B * L

    x2d = x_ref[...].astype(jnp.float32).reshape(BL, D)             # residual stream (f32)

    def layernorm(v, g_ref, b_ref):
        mu = jnp.mean(v, axis=-1, keepdims=True)
        var = jnp.mean(jnp.square(v - mu), axis=-1, keepdims=True)
        return (v - mu) * jax.lax.rsqrt(var + 1e-5) * g_ref[0] + b_ref[0]

    # ---- attention branch ---------------------------------------------------
    h = layernorm(x2d, ln1_g_ref, ln1_b_ref).astype(jnp.bfloat16)    # (BL, D) bf16

    # Fused QKV projection: one (D, 3D) matmul.  Split / scale / cast to bf16
    # immediately so no (BL, 3D) f32 value stays live across the head loop.
    qkv = jnp.dot(h, wqkv_ref[...], preferred_element_type=jnp.float32) + bqkv_ref[0]
    scale = 1.0 / math.sqrt(head_dim)
    q_b = (qkv[:, :D] * scale).astype(jnp.bfloat16).reshape(B, L, D)
    k_b = qkv[:, D:2 * D].astype(jnp.bfloat16).reshape(B, L, D)
    v_b = qkv[:, 2 * D:].astype(jnp.bfloat16).reshape(B, L, D)

    # Heads in groups of `head_group` (>=128-lane scratch stores; only one
    # group's score/prob tensors live at a time).
    hg = head_group
    for g in range(n_head // hg):
        outs = []
        for j in range(hg):
            lo = (g * hg + j) * head_dim
            q_h = q_b[:, :, lo:lo + head_dim]
            k_h = k_b[:, :, lo:lo + head_dim]
            v_h = v_b[:, :, lo:lo + head_dim]
            s = jnp.einsum("bld,bmd->blm", q_h, k_h,
                           preferred_element_type=jnp.float32)       # (B, L, L) f32
            s = s - jnp.max(s, axis=-1, keepdims=True)
            p = jnp.exp(s)
            p = p * pl.reciprocal(jnp.sum(p, axis=-1, keepdims=True), approx=True)
            outs.append(jnp.einsum("blm,bmd->bld", p.astype(jnp.bfloat16), v_h,
                                   preferred_element_type=jnp.float32))
        o_g = outs[0] if hg == 1 else jnp.concatenate(outs, axis=-1)  # (B, L, hg*dh) f32
        glo = g * hg * head_dim
        attn_scratch[:, glo:glo + hg * head_dim] = (
            o_g.reshape(BL, hg * head_dim).astype(jnp.bfloat16))

    # Single (D, D) out-projection over the full-width scratch slab.
    x2d = x2d + bo_ref[0] + jnp.dot(attn_scratch[...], wo_ref[...],
                                    preferred_element_type=jnp.float32)

    # ---- MLP branch (chunked over the 4D hidden dim) ------------------------
    h2 = layernorm(x2d, ln2_g_ref, ln2_b_ref).astype(jnp.bfloat16)   # (BL, D) bf16
    x2d = x2d + bpr_ref[0]                                           # c_proj bias once
    d_ff = 4 * D
    for c in range(d_ff // ff_chunk):
        lo = c * ff_chunk
        m = (jnp.dot(h2, wfc_ref[:, lo:lo + ff_chunk],
                     preferred_element_type=jnp.float32)
             + bfc_ref[0, lo:lo + ff_chunk])
        m = m * jax.nn.sigmoid(1.702 * m)                            # QuickGELU (f32)
        x2d = x2d + jnp.dot(m.astype(jnp.bfloat16), wpr_ref[lo:lo + ff_chunk, :],
                            preferred_element_type=jnp.float32)

    o_ref[...] = x2d.reshape(B, L, D).astype(o_ref.dtype)


# ---------------------------------------------------------------------------
# Sizing helpers (per-generation VMEM budget, head grouping, MLP chunking).
# ---------------------------------------------------------------------------
def _largest_divisor_leq(n, cap):
    cap = max(1, min(cap, n))
    for d in range(cap, 0, -1):
        if n % d == 0:
            return d
    return 1


def _pick_head_group(n_head, head_dim):
    # enough heads per group to make scratch stores >=128 lanes wide.
    target = max(1, 128 // max(head_dim, 1))
    return _largest_divisor_leq(n_head, target)


def _pick_ff_chunk(d_ff):
    if d_ff <= 512:
        return d_ff
    c = 512
    while c >= 128 and d_ff % c:
        c //= 2
    return c if (c >= 128 and d_ff % c == 0) else d_ff


def _vmem_budget_bytes():
    try:
        cap = int(pltpu.get_tpu_info().vmem_capacity_bytes)
    except Exception:
        cap = 64 * 1024 * 1024          # conservative fallback (v7x per-core VMEM)
    # leave headroom for compiler-internal scratch: v5e/v6e -> ~116 MiB, v7x -> ~52 MiB
    return max(cap - 12 * 1024 * 1024, 32 * 1024 * 1024)


def _pick_b_tile(N, L, D, head_group, ff_chunk, vmem_limit, weight_bytes, io_bytes):
    if N <= 1:
        return 1
    act_budget = max(vmem_limit - weight_bytes - (4 << 20), 2 << 20)
    # rough per-batch-row peak: double-buffered in/out blocks, f32 residual/LN
    # temporaries, bf16 q/k/v + scratch, one head-group's scores/probs, one MLP chunk.
    per_b = (L * D * (4 * io_bytes + 24)
             + head_group * L * L * 10
             + L * ff_chunk * 6)
    cap = max(1, act_budget // per_b)
    cap = min(cap, 16, N // 2)          # >=2 grid steps: megacore sharding + pipelining
    return _largest_divisor_leq(N, cap)


# ---------------------------------------------------------------------------
# Wrapper
# ---------------------------------------------------------------------------
def residual_attention_block(x_lnd, params, n_head: int, b_tile=None, io_in_bf16=False):
    """x_lnd: (L, N, D) like the PyTorch module. Returns (L, N, D)."""
    L, N, D = x_lnd.shape
    assert D % n_head == 0
    head_dim = D // n_head
    d_ff = 4 * D

    out_dtype = x_lnd.dtype
    x_nld = jnp.transpose(x_lnd, (1, 0, 2))                          # (N, L, D)
    if io_in_bf16:
        x_nld = x_nld.astype(jnp.bfloat16)

    # Host-side packing: fuse QKV, cast matmul weights to bf16 (f32 accumulate in kernel).
    wqkv = jnp.concatenate([params["wq"], params["wk"], params["wv"]], axis=1).astype(jnp.bfloat16)
    bqkv = jnp.concatenate([params["bq"], params["bk"], params["bv"]], axis=1).astype(jnp.float32)
    weights = [
        params["ln1_g"].astype(jnp.float32), params["ln1_b"].astype(jnp.float32),
        wqkv, bqkv,
        params["wo"].astype(jnp.bfloat16), params["bo"].astype(jnp.float32),
        params["ln2_g"].astype(jnp.float32), params["ln2_b"].astype(jnp.float32),
        params["wfc"].astype(jnp.bfloat16), params["bfc"].astype(jnp.float32),
        params["wpr"].astype(jnp.bfloat16), params["bpr"].astype(jnp.float32),
    ]
    weight_bytes = sum(int(w.size) * w.dtype.itemsize for w in weights)

    head_group = _pick_head_group(n_head, head_dim)
    ff_chunk = _pick_ff_chunk(d_ff)
    vmem_limit = _vmem_budget_bytes()
    io_bytes = x_nld.dtype.itemsize
    if b_tile is None:
        b_tile = _pick_b_tile(N, L, D, head_group, ff_chunk,
                              vmem_limit, weight_bytes, io_bytes)
    assert N % b_tile == 0, "batch must be divisible by b_tile"

    kernel = functools.partial(
        _resblock_kernel, n_head=n_head, head_dim=head_dim, b_tile=b_tile,
        seq_len=L, head_group=head_group, ff_chunk=ff_chunk)

    def _call(single_buffer_weights):
        wmap = lambda n: (0, 0)
        if single_buffer_weights:
            # Constant index_map -> weights resident in VMEM; single-buffer them
            # so the second pipeline buffer (~12*D^2 bytes) is not wasted.
            weight_specs = [pl.BlockSpec(w.shape, wmap, pipeline_mode=pl.Buffered(1))
                            for w in weights]
        else:
            weight_specs = [pl.BlockSpec(w.shape, wmap) for w in weights]
        return pl.pallas_call(
            kernel,
            out_shape=jax.ShapeDtypeStruct((N, L, D), x_nld.dtype),
            grid_spec=pltpu.PrefetchScalarGridSpec(
                num_scalar_prefetch=0,
                grid=(N // b_tile,),
                in_specs=[pl.BlockSpec((b_tile, L, D), lambda n: (n, 0, 0))] + weight_specs,
                out_specs=pl.BlockSpec((b_tile, L, D), lambda n: (n, 0, 0)),
                scratch_shapes=[pltpu.VMEM((b_tile * L, D), jnp.bfloat16)],
            ),
            compiler_params=pltpu.CompilerParams(
                dimension_semantics=("parallel",),       # megacore-shardable batch axis
                vmem_limit_bytes=int(vmem_limit),
            ),
        )(x_nld, *weights)

    try:
        out = _call(True)          # single-buffered resident weights
    except Exception:
        out = _call(False)         # fallback: default double-buffering

    return jnp.transpose(out, (1, 0, 2)).astype(out_dtype)            # back to (L, N, D)


# ---------------------------------------------------------------------------
# Pure-JAX f32 reference (same math) for a correctness check.
# ---------------------------------------------------------------------------
def reference(x_lnd, params, n_head):
    L, N, D = x_lnd.shape
    dh = D // n_head
    x = jnp.transpose(x_lnd, (1, 0, 2)).astype(jnp.float32)          # (N, L, D)

    def ln(v, g, b):
        mu = jnp.mean(v, -1, keepdims=True)
        var = jnp.mean((v - mu) ** 2, -1, keepdims=True)
        return (v - mu) * jax.lax.rsqrt(var + 1e-5) * g[0] + b[0]

    h = ln(x, params["ln1_g"], params["ln1_b"])
    q = h @ params["wq"] + params["bq"][0]
    k = h @ params["wk"] + params["bk"][0]
    v = h @ params["wv"] + params["bv"][0]
    q = q.reshape(N, L, n_head, dh).transpose(0, 2, 1, 3) / math.sqrt(dh)
    k = k.reshape(N, L, n_head, dh).transpose(0, 2, 1, 3)
    v = v.reshape(N, L, n_head, dh).transpose(0, 2, 1, 3)
    s = jnp.einsum("nhld,nhmd->nhlm", q, k)
    p = jax.nn.softmax(s, axis=-1)
    a = jnp.einsum("nhlm,nhmd->nhld", p, v).transpose(0, 2, 1, 3).reshape(N, L, D)
    a = a @ params["wo"] + params["bo"][0]
    x = x + a
    h2 = ln(x, params["ln2_g"], params["ln2_b"])
    m = h2 @ params["wfc"] + params["bfc"][0]
    m = m * jax.nn.sigmoid(1.702 * m)
    m = m @ params["wpr"] + params["bpr"][0]
    x = x + m
    return x.transpose(1, 0, 2)


def make_params(key, d_model):
    d_ff = 4 * d_model
    keys = jax.random.split(key, 12)
    s = 0.02
    return {
        "ln1_g": jnp.ones((1, d_model), jnp.float32),
        "ln1_b": jnp.zeros((1, d_model), jnp.float32),
        "wq": s * jax.random.normal(keys[0], (d_model, d_model), jnp.float32),
        "bq": s * jax.random.normal(keys[1], (1, d_model), jnp.float32),
        "wk": s * jax.random.normal(keys[2], (d_model, d_model), jnp.float32),
        "bk": s * jax.random.normal(keys[3], (1, d_model), jnp.float32),
        "wv": s * jax.random.normal(keys[4], (d_model, d_model), jnp.float32),
        "bv": s * jax.random.normal(keys[5], (1, d_model), jnp.float32),
        "wo": s * jax.random.normal(keys[6], (d_model, d_model), jnp.float32),
        "bo": s * jax.random.normal(keys[7], (1, d_model), jnp.float32),
        "ln2_g": jnp.ones((1, d_model), jnp.float32),
        "ln2_b": jnp.zeros((1, d_model), jnp.float32),
        "wfc": s * jax.random.normal(keys[8], (d_model, d_ff), jnp.float32),
        "bfc": s * jax.random.normal(keys[9], (1, d_ff), jnp.float32),
        "wpr": s * jax.random.normal(keys[10], (d_ff, d_model), jnp.float32),
        "bpr": s * jax.random.normal(keys[11], (1, d_model), jnp.float32),
    }


if __name__ == "__main__":
    L, N, D, H = 8, 4, 32, 4          # seq, batch, d_model, n_head
    key = jax.random.PRNGKey(0)
    kx, kp = jax.random.split(key)
    x = jax.random.normal(kx, (L, N, D), jnp.float32)   # (L, N, D) like PyTorch MHA
    params = make_params(kp, D)

    out = residual_attention_block(x, params, n_head=H)   # auto b_tile (-> 2, grid of 2)
    out = jax.block_until_ready(out)

    ref = reference(x, params, H)
    assert out.shape == (L, N, D)
    err = float(jnp.max(jnp.abs(out - ref)))
    # bf16 MXU operands (f32 accumulation) + approx reciprocal -> loosened tolerance.
    assert err < 2e-2, f"mismatch vs reference: max abs err = {err}"
    print("KERNEL_OK")
</pallas_src>

<mosaic_0001>
module attributes {stable_mosaic.version = 11 : i64} {
  func.func @_resblock_kernel(%arg0: i32, %arg1: memref<2x8x32xf32, #tpu.memory_space<vmem>>, %arg2: memref<1x32xf32, #tpu.memory_space<vmem>>, %arg3: memref<1x32xf32, #tpu.memory_space<vmem>>, %arg4: memref<32x96xbf16, #tpu.memory_space<vmem>>, %arg5: memref<1x96xf32, #tpu.memory_space<vmem>>, %arg6: memref<32x32xbf16, #tpu.memory_space<vmem>>, %arg7: memref<1x32xf32, #tpu.memory_space<vmem>>, %arg8: memref<1x32xf32, #tpu.memory_space<vmem>>, %arg9: memref<1x32xf32, #tpu.memory_space<vmem>>, %arg10: memref<32x128xbf16, #tpu.memory_space<vmem>>, %arg11: memref<1x128xf32, #tpu.memory_space<vmem>>, %arg12: memref<128x32xbf16, #tpu.memory_space<vmem>>, %arg13: memref<1x32xf32, #tpu.memory_space<vmem>>, %arg14: memref<2x8x32xf32, #tpu.memory_space<vmem>>, %arg15: memref<16x32xbf16, #tpu.memory_space<vmem>>) attributes {dimension_semantics = [#tpu.dimension_semantics<parallel>], iteration_bounds = array<i64: 2>, scalar_prefetch = 0 : i64, scratch_operands = 1 : i64, tpu.core_type = #tpu.core_type<tc>, window_params = [{transform_indices = @transform_0, window_bounds = array<i64: 2, 8, 32>}, {pipeline_mode = #tpu.pipeline_mode<synchronous>, transform_indices = @transform_1, window_bounds = array<i64: 1, 32>}, {pipeline_mode = #tpu.pipeline_mode<synchronous>, transform_indices = @transform_2, window_bounds = array<i64: 1, 32>}, {pipeline_mode = #tpu.pipeline_mode<synchronous>, transform_indices = @transform_3, window_bounds = array<i64: 32, 96>}, {pipeline_mode = #tpu.pipeline_mode<synchronous>, transform_indices = @transform_4, window_bounds = array<i64: 1, 96>}, {pipeline_mode = #tpu.pipeline_mode<synchronous>, transform_indices = @transform_5, window_bounds = array<i64: 32, 32>}, {pipeline_mode = #tpu.pipeline_mode<synchronous>, transform_indices = @transform_6, window_bounds = array<i64: 1, 32>}, {pipeline_mode = #tpu.pipeline_mode<synchronous>, transform_indices = @transform_7, window_bounds = array<i64: 1, 32>}, {pipeline_mode = #tpu.pipeline_mode<synchronous>, transform_indices = @transform_8, window_bounds = array<i64: 1, 32>}, {pipeline_mode = #tpu.pipeline_mode<synchronous>, transform_indices = @transform_9, window_bounds = array<i64: 32, 128>}, {pipeline_mode = #tpu.pipeline_mode<synchronous>, transform_indices = @transform_10, window_bounds = array<i64: 1, 128>}, {pipeline_mode = #tpu.pipeline_mode<synchronous>, transform_indices = @transform_11, window_bounds = array<i64: 128, 32>}, {pipeline_mode = #tpu.pipeline_mode<synchronous>, transform_indices = @transform_12, window_bounds = array<i64: 1, 32>}, {transform_indices = @transform_13, window_bounds = array<i64: 2, 8, 32>}]} {
    %c0 = arith.constant 0 : index
    %c0_0 = arith.constant 0 : index
    %c0_1 = arith.constant 0 : index
    %0 = vector.load %arg1[%c0, %c0_0, %c0_1] : memref<2x8x32xf32, #tpu.memory_space<vmem>>, vector<2x8x32xf32>
    %1 = vector.shape_cast %0 : vector<2x8x32xf32> to vector<16x32xf32>
    %cst = arith.constant dense<0.000000e+00> : vector<16xf32>
    %2 = vector.multi_reduction <add>, %1, %cst [1] : vector<16x32xf32> to vector<16xf32>
    %3 = vector.shape_cast %2 : vector<16xf32> to vector<16x1xf32>
    %cst_2 = arith.constant 3.200000e+01 : f32
    %4 = vector.broadcast %cst_2 : f32 to vector<16x1xf32>
    %5 = arith.divf %3, %4 : vector<16x1xf32>
    %6 = vector.broadcast %5 : vector<16x1xf32> to vector<16x32xf32>
    %7 = arith.subf %1, %6 : vector<16x32xf32>
    %8 = arith.mulf %7, %7 : vector<16x32xf32>
    %cst_3 = arith.constant dense<0.000000e+00> : vector<16xf32>
    %9 = vector.multi_reduction <add>, %8, %cst_3 [1] : vector<16x32xf32> to vector<16xf32>
    %10 = vector.shape_cast %9 : vector<16xf32> to vector<16x1xf32>
    %cst_4 = arith.constant 3.200000e+01 : f32
    %11 = vector.broadcast %cst_4 : f32 to vector<16x1xf32>
    %12 = arith.divf %10, %11 : vector<16x1xf32>
    %13 = vector.broadcast %5 : vector<16x1xf32> to vector<16x32xf32>
    %14 = arith.subf %1, %13 : vector<16x32xf32>
    %cst_5 = arith.constant 9.99999974E-6 : f32
    %15 = vector.broadcast %cst_5 : f32 to vector<16x1xf32>
    %16 = arith.addf %12, %15 : vector<16x1xf32>
    %17 = math.rsqrt %16 : vector<16x1xf32>
    %18 = vector.broadcast %17 : vector<16x1xf32> to vector<16x32xf32>
    %19 = arith.mulf %14, %18 : vector<16x32xf32>
    %c0_6 = arith.constant 0 : index
    %c0_7 = arith.constant 0 : index
    %20 = vector.load %arg2[%c0_6, %c0_7] : memref<1x32xf32, #tpu.memory_space<vmem>>, vector<1x32xf32>
    %21 = vector.shape_cast %20 : vector<1x32xf32> to vector<32xf32>
    %22 = vector.shape_cast %21 : vector<32xf32> to vector<1x32xf32>
    %23 = vector.broadcast %22 : vector<1x32xf32> to vector<16x32xf32>
    %24 = arith.mulf %19, %23 : vector<16x32xf32>
    %c0_8 = arith.constant 0 : index
    %c0_9 = arith.constant 0 : index
    %25 = vector.load %arg3[%c0_8, %c0_9] : memref<1x32xf32, #tpu.memory_space<vmem>>, vector<1x32xf32>
    %26 = vector.shape_cast %25 : vector<1x32xf32> to vector<32xf32>
    %27 = vector.shape_cast %26 : vector<32xf32> to vector<1x32xf32>
    %28 = vector.broadcast %27 : vector<1x32xf32> to vector<16x32xf32>
    %29 = arith.addf %24, %28 : vector<16x32xf32>
    %30 = arith.truncf %29 : vector<16x32xf32> to vector<16x32xbf16>
    %c0_10 = arith.constant 0 : index
    %c0_11 = arith.constant 0 : index
    %31 = vector.load %arg4[%c0_10, %c0_11] : memref<32x96xbf16, #tpu.memory_space<vmem>>, vector<32x96xbf16>
    %cst_12 = arith.constant dense<0.000000e+00> : vector<16x96xf32>
    %32 = tpu.matmul %30, %31, %cst_12 {dimension_numbers = #tpu.dot_dimension_numbers<[1], [0], [0], [1], [0, 0, 1, 1], [], []>} : vector<16x32xbf16>, vector<32x96xbf16>, vector<16x96xf32> -> vector<16x96xf32>
    %c0_13 = arith.constant 0 : index
    %c0_14 = arith.constant 0 : index
    %33 = vector.load %arg5[%c0_13, %c0_14] : memref<1x96xf32, #tpu.memory_space<vmem>>, vector<1x96xf32>
    %34 = vector.shape_cast %33 : vector<1x96xf32> to vector<96xf32>
    %35 = vector.shape_cast %34 : vector<96xf32> to vector<1x96xf32>
    %36 = vector.broadcast %35 : vector<1x96xf32> to vector<16x96xf32>
    %37 = arith.addf %32, %36 : vector<16x96xf32>
    %38 = vector.extract_strided_slice %37 {offsets = [0, 0], sizes = [16, 32], strides = [1, 1]} : vector<16x96xf32> to vector<16x32xf32>
    %cst_15 = arith.constant 0.353553385 : f32
    %39 = vector.broadcast %cst_15 : f32 to vector<16x32xf32>
    %40 = arith.mulf %38, %39 : vector<16x32xf32>
    %41 = arith.truncf %40 : vector<16x32xf32> to vector<16x32xbf16>
    %42 = vector.shape_cast %41 : vector<16x32xbf16> to vector<2x8x32xbf16>
    %43 = vector.extract_strided_slice %37 {offsets = [0, 32], sizes = [16, 32], strides = [1, 1]} : vector<16x96xf32> to vector<16x32xf32>
    %44 = arith.truncf %43 : vector<16x32xf32> to vector<16x32xbf16>
    %45 = vector.shape_cast %44 : vector<16x32xbf16> to vector<2x8x32xbf16>
    %46 = vector.extract_strided_slice %37 {offsets = [0, 64], sizes = [16, 32], strides = [1, 1]} : vector<16x96xf32> to vector<16x32xf32>
    %47 = arith.truncf %46 : vector<16x32xf32> to vector<16x32xbf16>
    %48 = vector.shape_cast %47 : vector<16x32xbf16> to vector<2x8x32xbf16>
    %49 = vector.extract_strided_slice %42 {offsets = [0, 0, 0], sizes = [2, 8, 8], strides = [1, 1, 1]} : vector<2x8x32xbf16> to vector<2x8x8xbf16>
    %50 = vector.extract_strided_slice %45 {offsets = [0, 0, 0], sizes = [2, 8, 8], strides = [1, 1, 1]} : vector<2x8x32xbf16> to vector<2x8x8xbf16>
    %51 = vector.extract_strided_slice %48 {offsets = [0, 0, 0], sizes = [2, 8, 8], strides = [1, 1, 1]} : vector<2x8x32xbf16> to vector<2x8x8xbf16>
    "tpu.trace_start"() <{level = 10 : i32, message = "bld,bmd->blm"}> : () -> ()
    %cst_16 = arith.constant dense<0.000000e+00> : vector<2x8x8xf32>
    %52 = tpu.matmul %49, %50, %cst_16 {dimension_numbers = #tpu.dot_dimension_numbers<[2], [2], [1], [1], [0, 0, 0, 1, 1, 1], [0], [0]>} : vector<2x8x8xbf16>, vector<2x8x8xbf16>, vector<2x8x8xf32> -> vector<2x8x8xf32>
    "tpu.trace_stop"() : () -> ()
    %cst_17 = arith.constant dense<0xFF800000> : vector<2x8xf32>
    %53 = vector.multi_reduction <maximumf>, %52, %cst_17 [2] : vector<2x8x8xf32> to vector<2x8xf32>
    %54 = vector.shape_cast %53 : vector<2x8xf32> to vector<2x8x1xf32>
    %55 = vector.broadcast %54 : vector<2x8x1xf32> to vector<2x8x8xf32>
    %56 = arith.subf %52, %55 : vector<2x8x8xf32>
    %57 = math.exp %56 : vector<2x8x8xf32>
    %cst_18 = arith.constant dense<0.000000e+00> : vector<2x8xf32>
    %58 = vector.multi_reduction <add>, %57, %cst_18 [2] : vector<2x8x8xf32> to vector<2x8xf32>
    %59 = vector.shape_cast %58 : vector<2x8xf32> to vector<2x8x1xf32>
    %60 = tpu.reciprocal %59 {approx = true} : vector<2x8x1xf32> -> vector<2x8x1xf32>
    %61 = vector.broadcast %60 : vector<2x8x1xf32> to vector<2x8x8xf32>
    %62 = arith.mulf %57, %61 : vector<2x8x8xf32>
    %63 = arith.truncf %62 : vector<2x8x8xf32> to vector<2x8x8xbf16>
    "tpu.trace_start"() <{level = 10 : i32, message = "blm,bmd->bld"}> : () -> ()
    %cst_19 = arith.constant dense<0.000000e+00> : vector<2x8x8xf32>
    %64 = tpu.matmul %63, %51, %cst_19 {dimension_numbers = #tpu.dot_dimension_numbers<[2], [1], [1], [2], [0, 0, 0, 1, 1, 2], [0], [0]>} : vector<2x8x8xbf16>, vector<2x8x8xbf16>, vector<2x8x8xf32> -> vector<2x8x8xf32>
    "tpu.trace_stop"() : () -> ()
    %65 = vector.extract_strided_slice %42 {offsets = [0, 0, 8], sizes = [2, 8, 8], strides = [1, 1, 1]} : vector<2x8x32xbf16> to vector<2x8x8xbf16>
    %66 = vector.extract_strided_slice %45 {offsets = [0, 0, 8], sizes = [2, 8, 8], strides = [1, 1, 1]} : vector<2x8x32xbf16> to vector<2x8x8xbf16>
    %67 = vector.extract_strided_slice %48 {offsets = [0, 0, 8], sizes = [2, 8, 8], strides = [1, 1, 1]} : vector<2x8x32xbf16> to vector<2x8x8xbf16>
    "tpu.trace_start"() <{level = 10 : i32, message = "bld,bmd->blm"}> : () -> ()
    %cst_20 = arith.constant dense<0.000000e+00> : vector<2x8x8xf32>
    %68 = tpu.matmul %65, %66, %cst_20 {dimension_numbers = #tpu.dot_dimension_numbers<[2], [2], [1], [1], [0, 0, 0, 1, 1, 1], [0], [0]>} : vector<2x8x8xbf16>, vector<2x8x8xbf16>, vector<2x8x8xf32> -> vector<2x8x8xf32>
    "tpu.trace_stop"() : () -> ()
    %cst_21 = arith.constant dense<0xFF800000> : vector<2x8xf32>
    %69 = vector.multi_reduction <maximumf>, %68, %cst_21 [2] : vector<2x8x8xf32> to vector<2x8xf32>
    %70 = vector.shape_cast %69 : vector<2x8xf32> to vector<2x8x1xf32>
    %71 = vector.broadcast %70 : vector<2x8x1xf32> to vector<2x8x8xf32>
    %72 = arith.subf %68, %71 : vector<2x8x8xf32>
    %73 = math.exp %72 : vector<2x8x8xf32>
    %cst_22 = arith.constant dense<0.000000e+00> : vector<2x8xf32>
    %74 = vector.multi_reduction <add>, %73, %cst_22 [2] : vector<2x8x8xf32> to vector<2x8xf32>
    %75 = vector.shape_cast %74 : vector<2x8xf32> to vector<2x8x1xf32>
    %76 = tpu.reciprocal %75 {approx = true} : vector<2x8x1xf32> -> vector<2x8x1xf32>
    %77 = vector.broadcast %76 : vector<2x8x1xf32> to vector<2x8x8xf32>
    %78 = arith.mulf %73, %77 : vector<2x8x8xf32>
    %79 = arith.truncf %78 : vector<2x8x8xf32> to vector<2x8x8xbf16>
    "tpu.trace_start"() <{level = 10 : i32, message = "blm,bmd->bld"}> : () -> ()
    %cst_23 = arith.constant dense<0.000000e+00> : vector<2x8x8xf32>
    %80 = tpu.matmul %79, %67, %cst_23 {dimension_numbers = #tpu.dot_dimension_numbers<[2], [1], [1], [2], [0, 0, 0, 1, 1, 2], [0], [0]>} : vector<2x8x8xbf16>, vector<2x8x8xbf16>, vector<2x8x8xf32> -> vector<2x8x8xf32>
    "tpu.trace_stop"() : () -> ()
    %81 = vector.extract_strided_slice %42 {offsets = [0, 0, 16], sizes = [2, 8, 8], strides = [1, 1, 1]} : vector<2x8x32xbf16> to vector<2x8x8xbf16>
    %82 = vector.extract_strided_slice %45 {offsets = [0, 0, 16], sizes = [2, 8, 8], strides = [1, 1, 1]} : vector<2x8x32xbf16> to vector<2x8x8xbf16>
    %83 = vector.extract_strided_slice %48 {offsets = [0, 0, 16], sizes = [2, 8, 8], strides = [1, 1, 1]} : vector<2x8x32xbf16> to vector<2x8x8xbf16>
    "tpu.trace_start"() <{level = 10 : i32, message = "bld,bmd->blm"}> : () -> ()
    %cst_24 = arith.constant dense<0.000000e+00> : vector<2x8x8xf32>
    %84 = tpu.matmul %81, %82, %cst_24 {dimension_numbers = #tpu.dot_dimension_numbers<[2], [2], [1], [1], [0, 0, 0, 1, 1, 1], [0], [0]>} : vector<2x8x8xbf16>, vector<2x8x8xbf16>, vector<2x8x8xf32> -> vector<2x8x8xf32>
    "tpu.trace_stop"() : () -> ()
    %cst_25 = arith.constant dense<0xFF800000> : vector<2x8xf32>
    %85 = vector.multi_reduction <maximumf>, %84, %cst_25 [2] : vector<2x8x8xf32> to vector<2x8xf32>
    %86 = vector.shape_cast %85 : vector<2x8xf32> to vector<2x8x1xf32>
    %87 = vector.broadcast %86 : vector<2x8x1xf32> to vector<2x8x8xf32>
    %88 = arith.subf %84, %87 : vector<2x8x8xf32>
    %89 = math.exp %88 : vector<2x8x8xf32>
    %cst_26 = arith.constant dense<0.000000e+00> : vector<2x8xf32>
    %90 = vector.multi_reduction <add>, %89, %cst_26 [2] : vector<2x8x8xf32> to vector<2x8xf32>
    %91 = vector.shape_cast %90 : vector<2x8xf32> to vector<2x8x1xf32>
    %92 = tpu.reciprocal %91 {approx = true} : vector<2x8x1xf32> -> vector<2x8x1xf32>
    %93 = vector.broadcast %92 : vector<2x8x1xf32> to vector<2x8x8xf32>
    %94 = arith.mulf %89, %93 : vector<2x8x8xf32>
    %95 = arith.truncf %94 : vector<2x8x8xf32> to vector<2x8x8xbf16>
    "tpu.trace_start"() <{level = 10 : i32, message = "blm,bmd->bld"}> : () -> ()
    %cst_27 = arith.constant dense<0.000000e+00> : vector<2x8x8xf32>
    %96 = tpu.matmul %95, %83, %cst_27 {dimension_numbers = #tpu.dot_dimension_numbers<[2], [1], [1], [2], [0, 0, 0, 1, 1, 2], [0], [0]>} : vector<2x8x8xbf16>, vector<2x8x8xbf16>, vector<2x8x8xf32> -> vector<2x8x8xf32>
    "tpu.trace_stop"() : () -> ()
    %97 = vector.extract_strided_slice %42 {offsets = [0, 0, 24], sizes = [2, 8, 8], strides = [1, 1, 1]} : vector<2x8x32xbf16> to vector<2x8x8xbf16>
    %98 = vector.extract_strided_slice %45 {offsets = [0, 0, 24], sizes = [2, 8, 8], strides = [1, 1, 1]} : vector<2x8x32xbf16> to vector<2x8x8xbf16>
    %99 = vector.extract_strided_slice %48 {offsets = [0, 0, 24], sizes = [2, 8, 8], strides = [1, 1, 1]} : vector<2x8x32xbf16> to vector<2x8x8xbf16>
    "tpu.trace_start"() <{level = 10 : i32, message = "bld,bmd->blm"}> : () -> ()
    %cst_28 = arith.constant dense<0.000000e+00> : vector<2x8x8xf32>
    %100 = tpu.matmul %97, %98, %cst_28 {dimension_numbers = #tpu.dot_dimension_numbers<[2], [2], [1], [1], [0, 0, 0, 1, 1, 1], [0], [0]>} : vector<2x8x8xbf16>, vector<2x8x8xbf16>, vector<2x8x8xf32> -> vector<2x8x8xf32>
    "tpu.trace_stop"() : () -> ()
    %cst_29 = arith.constant dense<0xFF800000> : vector<2x8xf32>
    %101 = vector.multi_reduction <maximumf>, %100, %cst_29 [2] : vector<2x8x8xf32> to vector<2x8xf32>
    %102 = vector.shape_cast %101 : vector<2x8xf32> to vector<2x8x1xf32>
    %103 = vector.broadcast %102 : vector<2x8x1xf32> to vector<2x8x8xf32>
    %104 = arith.subf %100, %103 : vector<2x8x8xf32>
    %105 = math.exp %104 : vector<2x8x8xf32>
    %cst_30 = arith.constant dense<0.000000e+00> : vector<2x8xf32>
    %106 = vector.multi_reduction <add>, %105, %cst_30 [2] : vector<2x8x8xf32> to vector<2x8xf32>
    %107 = vector.shape_cast %106 : vector<2x8xf32> to vector<2x8x1xf32>
    %108 = tpu.reciprocal %107 {approx = true} : vector<2x8x1xf32> -> vector<2x8x1xf32>
    %109 = vector.broadcast %108 : vector<2x8x1xf32> to vector<2x8x8xf32>
    %110 = arith.mulf %105, %109 : vector<2x8x8xf32>
    %111 = arith.truncf %110 : vector<2x8x8xf32> to vector<2x8x8xbf16>
    "tpu.trace_start"() <{level = 10 : i32, message = "blm,bmd->bld"}> : () -> ()
    %cst_31 = arith.constant dense<0.000000e+00> : vector<2x8x8xf32>
    %112 = tpu.matmul %111, %99, %cst_31 {dimension_numbers = #tpu.dot_dimension_numbers<[2], [1], [1], [2], [0, 0, 0, 1, 1, 2], [0], [0]>} : vector<2x8x8xbf16>, vector<2x8x8xbf16>, vector<2x8x8xf32> -> vector<2x8x8xf32>
    "tpu.trace_stop"() : () -> ()
    %113 = tpu.concatenate %64, %80, %96, %112 in 2 : vector<2x8x8xf32>, vector<2x8x8xf32>, vector<2x8x8xf32>, vector<2x8x8xf32> -> vector<2x8x32xf32>
    %114 = vector.shape_cast %113 : vector<2x8x32xf32> to vector<16x32xf32>
    %115 = arith.truncf %114 : vector<16x32xf32> to vector<16x32xbf16>
    %c0_32 = arith.constant 0 : index
    %c0_33 = arith.constant 0 : index
    %116 = vector.load %arg15[%c0_32, %c0_33] : memref<16x32xbf16, #tpu.memory_space<vmem>>, vector<16x32xbf16>
    tpu.vector_store %arg15[%c0_32, %c0_33], %115 {strides = array<i32>} : memref<16x32xbf16, #tpu.memory_space<vmem>>, vector<16x32xbf16>,
    %c0_34 = arith.constant 0 : index
    %c0_35 = arith.constant 0 : index
    %117 = vector.load %arg7[%c0_34, %c0_35] : memref<1x32xf32, #tpu.memory_space<vmem>>, vector<1x32xf32>
    %118 = vector.shape_cast %117 : vector<1x32xf32> to vector<32xf32>
    %119 = vector.shape_cast %118 : vector<32xf32> to vector<1x32xf32>
    %120 = vector.broadcast %119 : vector<1x32xf32> to vector<16x32xf32>
    %121 = arith.addf %1, %120 : vector<16x32xf32>
    %c0_36 = arith.constant 0 : index
    %c0_37 = arith.constant 0 : index
    %122 = vector.load %arg15[%c0_36, %c0_37] : memref<16x32xbf16, #tpu.memory_space<vmem>>, vector<16x32xbf16>
    %c0_38 = arith.constant 0 : index
    %c0_39 = arith.constant 0 : index
    %123 = vector.load %arg6[%c0_38, %c0_39] : memref<32x32xbf16, #tpu.memory_space<vmem>>, vector<32x32xbf16>
    %cst_40 = arith.constant dense<0.000000e+00> : vector<16x32xf32>
    %124 = tpu.matmul %122, %123, %cst_40 {dimension_numbers = #tpu.dot_dimension_numbers<[1], [0], [0], [1], [0, 0, 1, 1], [], []>} : vector<16x32xbf16>, vector<32x32xbf16>, vector<16x32xf32> -> vector<16x32xf32>
    %125 = arith.addf %121, %124 : vector<16x32xf32>
    %cst_41 = arith.constant dense<0.000000e+00> : vector<16xf32>
    %126 = vector.multi_reduction <add>, %125, %cst_41 [1] : vector<16x32xf32> to vector<16xf32>
    %127 = vector.shape_cast %126 : vector<16xf32> to vector<16x1xf32>
    %cst_42 = arith.constant 3.200000e+01 : f32
    %128 = vector.broadcast %cst_42 : f32 to vector<16x1xf32>
    %129 = arith.divf %127, %128 : vector<16x1xf32>
    %130 = vector.broadcast %129 : vector<16x1xf32> to vector<16x32xf32>
    %131 = arith.subf %125, %130 : vector<16x32xf32>
    %132 = arith.mulf %131, %131 : vector<16x32xf32>
    %cst_43 = arith.constant dense<0.000000e+00> : vector<16xf32>
    %133 = vector.multi_reduction <add>, %132, %cst_43 [1] : vector<16x32xf32> to vector<16xf32>
    %134 = vector.shape_cast %133 : vector<16xf32> to vector<16x1xf32>
    %cst_44 = arith.constant 3.200000e+01 : f32
    %135 = vector.broadcast %cst_44 : f32 to vector<16x1xf32>
    %136 = arith.divf %134, %135 : vector<16x1xf32>
    %137 = vector.broadcast %129 : vector<16x1xf32> to vector<16x32xf32>
    %138 = arith.subf %125, %137 : vector<16x32xf32>
    %cst_45 = arith.constant 9.99999974E-6 : f32
    %139 = vector.broadcast %cst_45 : f32 to vector<16x1xf32>
    %140 = arith.addf %136, %139 : vector<16x1xf32>
    %141 = math.rsqrt %140 : vector<16x1xf32>
    %142 = vector.broadcast %141 : vector<16x1xf32> to vector<16x32xf32>
    %143 = arith.mulf %138, %142 : vector<16x32xf32>
    %c0_46 = arith.constant 0 : index
    %c0_47 = arith.constant 0 : index
    %144 = vector.load %arg8[%c0_46, %c0_47] : memref<1x32xf32, #tpu.memory_space<vmem>>, vector<1x32xf32>
    %145 = vector.shape_cast %144 : vector<1x32xf32> to vector<32xf32>
    %146 = vector.shape_cast %145 : vector<32xf32> to vector<1x32xf32>
    %147 = vector.broadcast %146 : vector<1x32xf32> to vector<16x32xf32>
    %148 = arith.mulf %143, %147 : vector<16x32xf32>
    %c0_48 = arith.constant 0 : index
    %c0_49 = arith.constant 0 : index
    %149 = vector.load %arg9[%c0_48, %c0_49] : memref<1x32xf32, #tpu.memory_space<vmem>>, vector<1x32xf32>
    %150 = vector.shape_cast %149 : vector<1x32xf32> to vector<32xf32>
    %151 = vector.shape_cast %150 : vector<32xf32> to vector<1x32xf32>
    %152 = vector.broadcast %151 : vector<1x32xf32> to vector<16x32xf32>
    %153 = arith.addf %148, %152 : vector<16x32xf32>
    %154 = arith.truncf %153 : vector<16x32xf32> to vector<16x32xbf16>
    %c0_50 = arith.constant 0 : index
    %c0_51 = arith.constant 0 : index
    %155 = vector.load %arg13[%c0_50, %c0_51] : memref<1x32xf32, #tpu.memory_space<vmem>>, vector<1x32xf32>
    %156 = vector.shape_cast %155 : vector<1x32xf32> to vector<32xf32>
    %157 = vector.shape_cast %156 : vector<32xf32> to vector<1x32xf32>
    %158 = vector.broadcast %157 : vector<1x32xf32> to vector<16x32xf32>
    %159 = arith.addf %125, %158 : vector<16x32xf32>
    %c0_52 = arith.constant 0 : index
    %c0_53 = arith.constant 0 : index
    %160 = vector.load %arg10[%c0_52, %c0_53] : memref<32x128xbf16, #tpu.memory_space<vmem>>, vector<32x128xbf16>
    %cst_54 = arith.constant dense<0.000000e+00> : vector<16x128xf32>
    %161 = tpu.matmul %154, %160, %cst_54 {dimension_numbers = #tpu.dot_dimension_numbers<[1], [0], [0], [1], [0, 0, 1, 1], [], []>} : vector<16x32xbf16>, vector<32x128xbf16>, vector<16x128xf32> -> vector<16x128xf32>
    %c0_55 = arith.constant 0 : index
    %c0_56 = arith.constant 0 : index
    %162 = vector.load %arg11[%c0_55, %c0_56] : memref<1x128xf32, #tpu.memory_space<vmem>>, vector<1x128xf32>
    %163 = vector.shape_cast %162 : vector<1x128xf32> to vector<128xf32>
    %164 = vector.shape_cast %163 : vector<128xf32> to vector<1x128xf32>
    %165 = vector.broadcast %164 : vector<1x128xf32> to vector<16x128xf32>
    %166 = arith.addf %161, %165 : vector<16x128xf32>
    %cst_57 = arith.constant 1.702000e+00 : f32
    %167 = vector.broadcast %cst_57 : f32 to vector<16x128xf32>
    %168 = arith.mulf %167, %166 : vector<16x128xf32>
    %169 = arith.negf %168 : vector<16x128xf32>
    %170 = math.exp %169 : vector<16x128xf32>
    %cst_58 = arith.constant 1.000000e+00 : f32
    %171 = vector.broadcast %cst_58 : f32 to vector<16x128xf32>
    %172 = arith.addf %171, %170 : vector<16x128xf32>
    %173 = arith.divf %171, %172 : vector<16x128xf32>
    %174 = arith.mulf %166, %173 : vector<16x128xf32>
    %175 = arith.truncf %174 : vector<16x128xf32> to vector<16x128xbf16>
    %c0_59 = arith.constant 0 : index
    %c0_60 = arith.constant 0 : index
    %176 = vector.load %arg12[%c0_59, %c0_60] : memref<128x32xbf16, #tpu.memory_space<vmem>>, vector<128x32xbf16>
    %cst_61 = arith.constant dense<0.000000e+00> : vector<16x32xf32>
    %177 = tpu.matmul %175, %176, %cst_61 {dimension_numbers = #tpu.dot_dimension_numbers<[1], [0], [0], [1], [0, 0, 1, 1], [], []>} : vector<16x128xbf16>, vector<128x32xbf16>, vector<16x32xf32> -> vector<16x32xf32>
    %178 = arith.addf %159, %177 : vector<16x32xf32>
    %179 = vector.shape_cast %178 : vector<16x32xf32> to vector<2x8x32xf32>
    %c0_62 = arith.constant 0 : index
    %c0_63 = arith.constant 0 : index
    %c0_64 = arith.constant 0 : index
    %180 = vector.load %arg14[%c0_62, %c0_63, %c0_64] : memref<2x8x32xf32, #tpu.memory_space<vmem>>, vector<2x8x32xf32>
    tpu.vector_store %arg14[%c0_62, %c0_63, %c0_64], %179 {strides = array<i32>} : memref<2x8x32xf32, #tpu.memory_space<vmem>>, vector<2x8x32xf32>,
    return
  }
  func.func @transform_0(%arg0: i32) -> (i32, i32, i32) {
    %c0_i32 = arith.constant 0 : i32
    %c0_i32_0 = arith.constant 0 : i32
    %c0_i32_1 = arith.constant 0 : i32
    return %arg0, %c0_i32, %c0_i32_0 : i32, i32, i32
  }
  func.func @transform_1(%arg0: i32) -> (i32, i32) {
    %c0_i32 = arith.constant 0 : i32
    %c0_i32_0 = arith.constant 0 : i32
    %c0_i32_1 = arith.constant 0 : i32
    return %c0_i32, %c0_i32_0 : i32, i32
  }
  func.func @transform_2(%arg0: i32) -> (i32, i32) {
    %c0_i32 = arith.constant 0 : i32
    %c0_i32_0 = arith.constant 0 : i32
    %c0_i32_1 = arith.constant 0 : i32
    return %c0_i32, %c0_i32_0 : i32, i32
  }
  func.func @transform_3(%arg0: i32) -> (i32, i32) {
    %c0_i32 = arith.constant 0 : i32
    %c0_i32_0 = arith.constant 0 : i32
    %c0_i32_1 = arith.constant 0 : i32
    return %c0_i32, %c0_i32_0 : i32, i32
  }
  func.func @transform_4(%arg0: i32) -> (i32, i32) {
    %c0_i32 = arith.constant 0 : i32
    %c0_i32_0 = arith.constant 0 : i32
    %c0_i32_1 = arith.constant 0 : i32
    return %c0_i32, %c0_i32_0 : i32, i32
  }
  func.func @transform_5(%arg0: i32) -> (i32, i32) {
    %c0_i32 = arith.constant 0 : i32
    %c0_i32_0 = arith.constant 0 : i32
    %c0_i32_1 = arith.constant 0 : i32
    return %c0_i32, %c0_i32_0 : i32, i32
  }
  func.func @transform_6(%arg0: i32) -> (i32, i32) {
    %c0_i32 = arith.constant 0 : i32
    %c0_i32_0 = arith.constant 0 : i32
    %c0_i32_1 = arith.constant 0 : i32
    return %c0_i32, %c0_i32_0 : i32, i32
  }
  func.func @transform_7(%arg0: i32) -> (i32, i32) {
    %c0_i32 = arith.constant 0 : i32
    %c0_i32_0 = arith.constant 0 : i32
    %c0_i32_1 = arith.constant 0 : i32
    return %c0_i32, %c0_i32_0 : i32, i32
  }
  func.func @transform_8(%arg0: i32) -> (i32, i32) {
    %c0_i32 = arith.constant 0 : i32
    %c0_i32_0 = arith.constant 0 : i32
    %c0_i32_1 = arith.constant 0 : i32
    return %c0_i32, %c0_i32_0 : i32, i32
  }
  func.func @transform_9(%arg0: i32) -> (i32, i32) {
    %c0_i32 = arith.constant 0 : i32
    %c0_i32_0 = arith.constant 0 : i32
    %c0_i32_1 = arith.constant 0 : i32
    return %c0_i32, %c0_i32_0 : i32, i32
  }
  func.func @transform_10(%arg0: i32) -> (i32, i32) {
    %c0_i32 = arith.constant 0 : i32
    %c0_i32_0 = arith.constant 0 : i32
    %c0_i32_1 = arith.constant 0 : i32
    return %c0_i32, %c0_i32_0 : i32, i32
  }
  func.func @transform_11(%arg0: i32) -> (i32, i32) {
    %c0_i32 = arith.constant 0 : i32
    %c0_i32_0 = arith.constant 0 : i32
    %c0_i32_1 = arith.constant 0 : i32
    return %c0_i32, %c0_i32_0 : i32, i32
  }
  func.func @transform_12(%arg0: i32) -> (i32, i32) {
    %c0_i32 = arith.constant 0 : i32
    %c0_i32_0 = arith.constant 0 : i32
    %c0_i32_1 = arith.constant 0 : i32
    return %c0_i32, %c0_i32_0 : i32, i32
  }
  func.func @transform_13(%arg0: i32) -> (i32, i32, i32) {
    %c0_i32 = arith.constant 0 : i32
    %c0_i32_0 = arith.constant 0 : i32
    %c0_i32_1 = arith.constant 0 : i32
    return %arg0, %c0_i32, %c0_i32_0 : i32, i32, i32
  }
}

module attributes {stable_mosaic.version = 11 : i64} {
  func.func @_resblock_kernel(%arg0: i32, %arg1: memref<2x8x32xf32, #tpu.memory_space<vmem>>, %arg2: memref<1x32xf32, #tpu.memory_space<vmem>>, %arg3: memref<1x32xf32, #tpu.memory_space<vmem>>, %arg4: memref<32x96xbf16, #tpu.memory_space<vmem>>, %arg5: memref<1x96xf32, #tpu.memory_space<vmem>>, %arg6: memref<32x32xbf16, #tpu.memory_space<vmem>>, %arg7: memref<1x32xf32, #tpu.memory_space<vmem>>, %arg8: memref<1x32xf32, #tpu.memory_space<vmem>>, %arg9: memref<1x32xf32, #tpu.memory_space<vmem>>, %arg10: memref<32x128xbf16, #tpu.memory_space<vmem>>, %arg11: memref<1x128xf32, #tpu.memory_space<vmem>>, %arg12: memref<128x32xbf16, #tpu.memory_space<vmem>>, %arg13: memref<1x32xf32, #tpu.memory_space<vmem>>, %arg14: memref<2x8x32xf32, #tpu.memory_space<vmem>>, %arg15: memref<16x32xbf16, #tpu.memory_space<vmem>>) attributes {dimension_semantics = [#tpu.dimension_semantics<parallel>], iteration_bounds = array<i64: 2>, scalar_prefetch = 0 : i64, scratch_operands = 1 : i64, tpu.core_type = #tpu.core_type<tc>, window_params = [{transform_indices = @transform_0, window_bounds = array<i64: 2, 8, 32>}, {pipeline_mode = #tpu.pipeline_mode<synchronous>, transform_indices = @transform_1, window_bounds = array<i64: 1, 32>}, {pipeline_mode = #tpu.pipeline_mode<synchronous>, transform_indices = @transform_2, window_bounds = array<i64: 1, 32>}, {pipeline_mode = #tpu.pipeline_mode<synchronous>, transform_indices = @transform_3, window_bounds = array<i64: 32, 96>}, {pipeline_mode = #tpu.pipeline_mode<synchronous>, transform_indices = @transform_4, window_bounds = array<i64: 1, 96>}, {pipeline_mode = #tpu.pipeline_mode<synchronous>, transform_indices = @transform_5, window_bounds = array<i64: 32, 32>}, {pipeline_mode = #tpu.pipeline_mode<synchronous>, transform_indices = @transform_6, window_bounds = array<i64: 1, 32>}, {pipeline_mode = #tpu.pipeline_mode<synchronous>, transform_indices = @transform_7, window_bounds = array<i64: 1, 32>}, {pipeline_mode = #tpu.pipeline_mode<synchronous>, transform_indices = @transform_8, window_bounds = array<i64: 1, 32>}, {pipeline_mode = #tpu.pipeline_mode<synchronous>, transform_indices = @transform_9, window_bounds = array<i64: 32, 128>}, {pipeline_mode = #tpu.pipeline_mode<synchronous>, transform_indices = @transform_10, window_bounds = array<i64: 1, 128>}, {pipeline_mode = #tpu.pipeline_mode<synchronous>, transform_indices = @transform_11, window_bounds = array<i64: 128, 32>}, {pipeline_mode = #tpu.pipeline_mode<synchronous>, transform_indices = @transform_12, window_bounds = array<i64: 1, 32>}, {transform_indices = @transform_13, window_bounds = array<i64: 2, 8, 32>}]} {
    %c0 = arith.constant 0 : index
    %c0_0 = arith.constant 0 : index
    %c0_1 = arith.constant 0 : index
    %0 = vector.load %arg1[%c0, %c0_0, %c0_1] : memref<2x8x32xf32, #tpu.memory_space<vmem>>, vector<2x8x32xf32>
    %1 = vector.shape_cast %0 : vector<2x8x32xf32> to vector<16x32xf32>
    %cst = arith.constant dense<0.000000e+00> : vector<16xf32>
    %2 = vector.multi_reduction <add>, %1, %cst [1] : vector<16x32xf32> to vector<16xf32>
    %3 = vector.shape_cast %2 : vector<16xf32> to vector<16x1xf32>
    %cst_2 = arith.constant 3.200000e+01 : f32
    %4 = vector.broadcast %cst_2 : f32 to vector<16x1xf32>
    %5 = arith.divf %3, %4 : vector<16x1xf32>
    %6 = vector.broadcast %5 : vector<16x1xf32> to vector<16x32xf32>
    %7 = arith.subf %1, %6 : vector<16x32xf32>
    %8 = arith.mulf %7, %7 : vector<16x32xf32>
    %cst_3 = arith.constant dense<0.000000e+00> : vector<16xf32>
    %9 = vector.multi_reduction <add>, %8, %cst_3 [1] : vector<16x32xf32> to vector<16xf32>
    %10 = vector.shape_cast %9 : vector<16xf32> to vector<16x1xf32>
    %cst_4 = arith.constant 3.200000e+01 : f32
    %11 = vector.broadcast %cst_4 : f32 to vector<16x1xf32>
    %12 = arith.divf %10, %11 : vector<16x1xf32>
    %13 = vector.broadcast %5 : vector<16x1xf32> to vector<16x32xf32>
    %14 = arith.subf %1, %13 : vector<16x32xf32>
    %cst_5 = arith.constant 9.99999974E-6 : f32
    %15 = vector.broadcast %cst_5 : f32 to vector<16x1xf32>
    %16 = arith.addf %12, %15 : vector<16x1xf32>
    %17 = math.rsqrt %16 : vector<16x1xf32>
    %18 = vector.broadcast %17 : vector<16x1xf32> to vector<16x32xf32>
    %19 = arith.mulf %14, %18 : vector<16x32xf32>
    %c0_6 = arith.constant 0 : index
    %c0_7 = arith.constant 0 : index
    %20 = vector.load %arg2[%c0_6, %c0_7] : memref<1x32xf32, #tpu.memory_space<vmem>>, vector<1x32xf32>
    %21 = vector.shape_cast %20 : vector<1x32xf32> to vector<32xf32>
    %22 = vector.shape_cast %21 : vector<32xf32> to vector<1x32xf32>
    %23 = vector.broadcast %22 : vector<1x32xf32> to vector<16x32xf32>
    %24 = arith.mulf %19, %23 : vector<16x32xf32>
    %c0_8 = arith.constant 0 : index
    %c0_9 = arith.constant 0 : index
    %25 = vector.load %arg3[%c0_8, %c0_9] : memref<1x32xf32, #tpu.memory_space<vmem>>, vector<1x32xf32>
    %26 = vector.shape_cast %25 : vector<1x32xf32> to vector<32xf32>
    %27 = vector.shape_cast %26 : vector<32xf32> to vector<1x32xf32>
    %28 = vector.broadcast %27 : vector<1x32xf32> to vector<16x32xf32>
    %29 = arith.addf %24, %28 : vector<16x32xf32>
    %30 = arith.truncf %29 : vector<16x32xf32> to vector<16x32xbf16>
    %c0_10 = arith.constant 0 : index
    %c0_11 = arith.constant 0 : index
    %31 = vector.load %arg4[%c0_10, %c0_11] : memref<32x96xbf16, #tpu.memory_space<vmem>>, vector<32x96xbf16>
    %cst_12 = arith.constant dense<0.000000e+00> : vector<16x96xf32>
    %32 = tpu.matmul %30, %31, %cst_12 {dimension_numbers = #tpu.dot_dimension_numbers<[1], [0], [0], [1], [0, 0, 1, 1], [], []>} : vector<16x32xbf16>, vector<32x96xbf16>, vector<16x96xf32> -> vector<16x96xf32>
    %c0_13 = arith.constant 0 : index
    %c0_14 = arith.constant 0 : index
    %33 = vector.load %arg5[%c0_13, %c0_14] : memref<1x96xf32, #tpu.memory_space<vmem>>, vector<1x96xf32>
    %34 = vector.shape_cast %33 : vector<1x96xf32> to vector<96xf32>
    %35 = vector.shape_cast %34 : vector<96xf32> to vector<1x96xf32>
    %36 = vector.broadcast %35 : vector<1x96xf32> to vector<16x96xf32>
    %37 = arith.addf %32, %36 : vector<16x96xf32>
    %38 = vector.extract_strided_slice %37 {offsets = [0, 0], sizes = [16, 32], strides = [1, 1]} : vector<16x96xf32> to vector<16x32xf32>
    %cst_15 = arith.constant 0.353553385 : f32
    %39 = vector.broadcast %cst_15 : f32 to vector<16x32xf32>
    %40 = arith.mulf %38, %39 : vector<16x32xf32>
    %41 = arith.truncf %40 : vector<16x32xf32> to vector<16x32xbf16>
    %42 = vector.shape_cast %41 : vector<16x32xbf16> to vector<2x8x32xbf16>
    %43 = vector.extract_strided_slice %37 {offsets = [0, 32], sizes = [16, 32], strides = [1, 1]} : vector<16x96xf32> to vector<16x32xf32>
    %44 = arith.truncf %43 : vector<16x32xf32> to vector<16x32xbf16>
    %45 = vector.shape_cast %44 : vector<16x32xbf16> to vector<2x8x32xbf16>
    %46 = vector.extract_strided_slice %37 {offsets = [0, 64], sizes = [16, 32], strides = [1, 1]} : vector<16x96xf32> to vector<16x32xf32>
    %47 = arith.truncf %46 : vector<16x32xf32> to vector<16x32xbf16>
    %48 = vector.shape_cast %47 : vector<16x32xbf16> to vector<2x8x32xbf16>
    %49 = vector.extract_strided_slice %42 {offsets = [0, 0, 0], sizes = [2, 8, 8], strides = [1, 1, 1]} : vector<2x8x32xbf16> to vector<2x8x8xbf16>
    %50 = vector.extract_strided_slice %45 {offsets = [0, 0, 0], sizes = [2, 8, 8], strides = [1, 1, 1]} : vector<2x8x32xbf16> to vector<2x8x8xbf16>
    %51 = vector.extract_strided_slice %48 {offsets = [0, 0, 0], sizes = [2, 8, 8], strides = [1, 1, 1]} : vector<2x8x32xbf16> to vector<2x8x8xbf16>
    "tpu.trace_start"() <{level = 10 : i32, message = "bld,bmd->blm"}> : () -> ()
    %cst_16 = arith.constant dense<0.000000e+00> : vector<2x8x8xf32>
    %52 = tpu.matmul %49, %50, %cst_16 {dimension_numbers = #tpu.dot_dimension_numbers<[2], [2], [1], [1], [0, 0, 0, 1, 1, 1], [0], [0]>} : vector<2x8x8xbf16>, vector<2x8x8xbf16>, vector<2x8x8xf32> -> vector<2x8x8xf32>
    "tpu.trace_stop"() : () -> ()
    %cst_17 = arith.constant dense<0xFF800000> : vector<2x8xf32>
    %53 = vector.multi_reduction <maximumf>, %52, %cst_17 [2] : vector<2x8x8xf32> to vector<2x8xf32>
    %54 = vector.shape_cast %53 : vector<2x8xf32> to vector<2x8x1xf32>
    %55 = vector.broadcast %54 : vector<2x8x1xf32> to vector<2x8x8xf32>
    %56 = arith.subf %52, %55 : vector<2x8x8xf32>
    %57 = math.exp %56 : vector<2x8x8xf32>
    %cst_18 = arith.constant dense<0.000000e+00> : vector<2x8xf32>
    %58 = vector.multi_reduction <add>, %57, %cst_18 [2] : vector<2x8x8xf32> to vector<2x8xf32>
    %59 = vector.shape_cast %58 : vector<2x8xf32> to vector<2x8x1xf32>
    %60 = tpu.reciprocal %59 {approx = true} : vector<2x8x1xf32> -> vector<2x8x1xf32>
    %61 = vector.broadcast %60 : vector<2x8x1xf32> to vector<2x8x8xf32>
    %62 = arith.mulf %57, %61 : vector<2x8x8xf32>
    %63 = arith.truncf %62 : vector<2x8x8xf32> to vector<2x8x8xbf16>
    "tpu.trace_start"() <{level = 10 : i32, message = "blm,bmd->bld"}> : () -> ()
    %cst_19 = arith.constant dense<0.000000e+00> : vector<2x8x8xf32>
    %64 = tpu.matmul %63, %51, %cst_19 {dimension_numbers = #tpu.dot_dimension_numbers<[2], [1], [1], [2], [0, 0, 0, 1, 1, 2], [0], [0]>} : vector<2x8x8xbf16>, vector<2x8x8xbf16>, vector<2x8x8xf32> -> vector<2x8x8xf32>
    "tpu.trace_stop"() : () -> ()
    %65 = vector.extract_strided_slice %42 {offsets = [0, 0, 8], sizes = [2, 8, 8], strides = [1, 1, 1]} : vector<2x8x32xbf16> to vector<2x8x8xbf16>
    %66 = vector.extract_strided_slice %45 {offsets = [0, 0, 8], sizes = [2, 8, 8], strides = [1, 1, 1]} : vector<2x8x32xbf16> to vector<2x8x8xbf16>
    %67 = vector.extract_strided_slice %48 {offsets = [0, 0, 8], sizes = [2, 8, 8], strides = [1, 1, 1]} : vector<2x8x32xbf16> to vector<2x8x8xbf16>
    "tpu.trace_start"() <{level = 10 : i32, message = "bld,bmd->blm"}> : () -> ()
    %cst_20 = arith.constant dense<0.000000e+00> : vector<2x8x8xf32>
    %68 = tpu.matmul %65, %66, %cst_20 {dimension_numbers = #tpu.dot_dimension_numbers<[2], [2], [1], [1], [0, 0, 0, 1, 1, 1], [0], [0]>} : vector<2x8x8xbf16>, vector<2x8x8xbf16>, vector<2x8x8xf32> -> vector<2x8x8xf32>
    "tpu.trace_stop"() : () -> ()
    %cst_21 = arith.constant dense<0xFF800000> : vector<2x8xf32>
    %69 = vector.multi_reduction <maximumf>, %68, %cst_21 [2] : vector<2x8x8xf32> to vector<2x8xf32>
    %70 = vector.shape_cast %69 : vector<2x8xf32> to vector<2x8x1xf32>
    %71 = vector.broadcast %70 : vector<2x8x1xf32> to vector<2x8x8xf32>
    %72 = arith.subf %68, %71 : vector<2x8x8xf32>
    %73 = math.exp %72 : vector<2x8x8xf32>
    %cst_22 = arith.constant dense<0.000000e+00> : vector<2x8xf32>
    %74 = vector.multi_reduction <add>, %73, %cst_22 [2] : vector<2x8x8xf32> to vector<2x8xf32>
    %75 = vector.shape_cast %74 : vector<2x8xf32> to vector<2x8x1xf32>
    %76 = tpu.reciprocal %75 {approx = true} : vector<2x8x1xf32> -> vector<2x8x1xf32>
    %77 = vector.broadcast %76 : vector<2x8x1xf32> to vector<2x8x8xf32>
    %78 = arith.mulf %73, %77 : vector<2x8x8xf32>
    %79 = arith.truncf %78 : vector<2x8x8xf32> to vector<2x8x8xbf16>
    "tpu.trace_start"() <{level = 10 : i32, message = "blm,bmd->bld"}> : () -> ()
    %cst_23 = arith.constant dense<0.000000e+00> : vector<2x8x8xf32>
    %80 = tpu.matmul %79, %67, %cst_23 {dimension_numbers = #tpu.dot_dimension_numbers<[2], [1], [1], [2], [0, 0, 0, 1, 1, 2], [0], [0]>} : vector<2x8x8xbf16>, vector<2x8x8xbf16>, vector<2x8x8xf32> -> vector<2x8x8xf32>
    "tpu.trace_stop"() : () -> ()
    %81 = vector.extract_strided_slice %42 {offsets = [0, 0, 16], sizes = [2, 8, 8], strides = [1, 1, 1]} : vector<2x8x32xbf16> to vector<2x8x8xbf16>
    %82 = vector.extract_strided_slice %45 {offsets = [0, 0, 16], sizes = [2, 8, 8], strides = [1, 1, 1]} : vector<2x8x32xbf16> to vector<2x8x8xbf16>
    %83 = vector.extract_strided_slice %48 {offsets = [0, 0, 16], sizes = [2, 8, 8], strides = [1, 1, 1]} : vector<2x8x32xbf16> to vector<2x8x8xbf16>
    "tpu.trace_start"() <{level = 10 : i32, message = "bld,bmd->blm"}> : () -> ()
    %cst_24 = arith.constant dense<0.000000e+00> : vector<2x8x8xf32>
    %84 = tpu.matmul %81, %82, %cst_24 {dimension_numbers = #tpu.dot_dimension_numbers<[2], [2], [1], [1], [0, 0, 0, 1, 1, 1], [0], [0]>} : vector<2x8x8xbf16>, vector<2x8x8xbf16>, vector<2x8x8xf32> -> vector<2x8x8xf32>
    "tpu.trace_stop"() : () -> ()
    %cst_25 = arith.constant dense<0xFF800000> : vector<2x8xf32>
    %85 = vector.multi_reduction <maximumf>, %84, %cst_25 [2] : vector<2x8x8xf32> to vector<2x8xf32>
    %86 = vector.shape_cast %85 : vector<2x8xf32> to vector<2x8x1xf32>
    %87 = vector.broadcast %86 : vector<2x8x1xf32> to vector<2x8x8xf32>
    %88 = arith.subf %84, %87 : vector<2x8x8xf32>
    %89 = math.exp %88 : vector<2x8x8xf32>
    %cst_26 = arith.constant dense<0.000000e+00> : vector<2x8xf32>
    %90 = vector.multi_reduction <add>, %89, %cst_26 [2] : vector<2x8x8xf32> to vector<2x8xf32>
    %91 = vector.shape_cast %90 : vector<2x8xf32> to vector<2x8x1xf32>
    %92 = tpu.reciprocal %91 {approx = true} : vector<2x8x1xf32> -> vector<2x8x1xf32>
    %93 = vector.broadcast %92 : vector<2x8x1xf32> to vector<2x8x8xf32>
    %94 = arith.mulf %89, %93 : vector<2x8x8xf32>
    %95 = arith.truncf %94 : vector<2x8x8xf32> to vector<2x8x8xbf16>
    "tpu.trace_start"() <{level = 10 : i32, message = "blm,bmd->bld"}> : () -> ()
    %cst_27 = arith.constant dense<0.000000e+00> : vector<2x8x8xf32>
    %96 = tpu.matmul %95, %83, %cst_27 {dimension_numbers = #tpu.dot_dimension_numbers<[2], [1], [1], [2], [0, 0, 0, 1, 1, 2], [0], [0]>} : vector<2x8x8xbf16>, vector<2x8x8xbf16>, vector<2x8x8xf32> -> vector<2x8x8xf32>
    "tpu.trace_stop"() : () -> ()
    %97 = vector.extract_strided_slice %42 {offsets = [0, 0, 24], sizes = [2, 8, 8], strides = [1, 1, 1]} : vector<2x8x32xbf16> to vector<2x8x8xbf16>
    %98 = vector.extract_strided_slice %45 {offsets = [0, 0, 24], sizes = [2, 8, 8], strides = [1, 1, 1]} : vector<2x8x32xbf16> to vector<2x8x8xbf16>
    %99 = vector.extract_strided_slice %48 {offsets = [0, 0, 24], sizes = [2, 8, 8], strides = [1, 1, 1]} : vector<2x8x32xbf16> to vector<2x8x8xbf16>
    "tpu.trace_start"() <{level = 10 : i32, message = "bld,bmd->blm"}> : () -> ()
    %cst_28 = arith.constant dense<0.000000e+00> : vector<2x8x8xf32>
    %100 = tpu.matmul %97, %98, %cst_28 {dimension_numbers = #tpu.dot_dimension_numbers<[2], [2], [1], [1], [0, 0, 0, 1, 1, 1], [0], [0]>} : vector<2x8x8xbf16>, vector<2x8x8xbf16>, vector<2x8x8xf32> -> vector<2x8x8xf32>
    "tpu.trace_stop"() : () -> ()
    %cst_29 = arith.constant dense<0xFF800000> : vector<2x8xf32>
    %101 = vector.multi_reduction <maximumf>, %100, %cst_29 [2] : vector<2x8x8xf32> to vector<2x8xf32>
    %102 = vector.shape_cast %101 : vector<2x8xf32> to vector<2x8x1xf32>
    %103 = vector.broadcast %102 : vector<2x8x1xf32> to vector<2x8x8xf32>
    %104 = arith.subf %100, %103 : vector<2x8x8xf32>
    %105 = math.exp %104 : vector<2x8x8xf32>
    %cst_30 = arith.constant dense<0.000000e+00> : vector<2x8xf32>
    %106 = vector.multi_reduction <add>, %105, %cst_30 [2] : vector<2x8x8xf32> to vector<2x8xf32>
    %107 = vector.shape_cast %106 : vector<2x8xf32> to vector<2x8x1xf32>
    %108 = tpu.reciprocal %107 {approx = true} : vector<2x8x1xf32> -> vector<2x8x1xf32>
    %109 = vector.broadcast %108 : vector<2x8x1xf32> to vector<2x8x8xf32>
    %110 = arith.mulf %105, %109 : vector<2x8x8xf32>
    %111 = arith.truncf %110 : vector<2x8x8xf32> to vector<2x8x8xbf16>
    "tpu.trace_start"() <{level = 10 : i32, message = "blm,bmd->bld"}> : () -> ()
    %cst_31 = arith.constant dense<0.000000e+00> : vector<2x8x8xf32>
    %112 = tpu.matmul %111, %99, %cst_31 {dimension_numbers = #tpu.dot_dimension_numbers<[2], [1], [1], [2], [0, 0, 0, 1, 1, 2], [0], [0]>} : vector<2x8x8xbf16>, vector<2x8x8xbf16>, vector<2x8x8xf32> -> vector<2x8x8xf32>
    "tpu.trace_stop"() : () -> ()
    %113 = tpu.concatenate %64, %80, %96, %112 in 2 : vector<2x8x8xf32>, vector<2x8x8xf32>, vector<2x8x8xf32>, vector<2x8x8xf32> -> vector<2x8x32xf32>
    %114 = vector.shape_cast %113 : vector<2x8x32xf32> to vector<16x32xf32>
    %115 = arith.truncf %114 : vector<16x32xf32> to vector<16x32xbf16>
    %c0_32 = arith.constant 0 : index
    %c0_33 = arith.constant 0 : index
    %116 = vector.load %arg15[%c0_32, %c0_33] : memref<16x32xbf16, #tpu.memory_space<vmem>>, vector<16x32xbf16>
    tpu.vector_store %arg15[%c0_32, %c0_33], %115 {strides = array<i32>} : memref<16x32xbf16, #tpu.memory_space<vmem>>, vector<16x32xbf16>,
    %c0_34 = arith.constant 0 : index
    %c0_35 = arith.constant 0 : index
    %117 = vector.load %arg7[%c0_34, %c0_35] : memref<1x32xf32, #tpu.memory_space<vmem>>, vector<1x32xf32>
    %118 = vector.shape_cast %117 : vector<1x32xf32> to vector<32xf32>
    %119 = vector.shape_cast %118 : vector<32xf32> to vector<1x32xf32>
    %120 = vector.broadcast %119 : vector<1x32xf32> to vector<16x32xf32>
    %121 = arith.addf %1, %120 : vector<16x32xf32>
    %c0_36 = arith.constant 0 : index
    %c0_37 = arith.constant 0 : index
    %122 = vector.load %arg15[%c0_36, %c0_37] : memref<16x32xbf16, #tpu.memory_space<vmem>>, vector<16x32xbf16>
    %c0_38 = arith.constant 0 : index
    %c0_39 = arith.constant 0 : index
    %123 = vector.load %arg6[%c0_38, %c0_39] : memref<32x32xbf16, #tpu.memory_space<vmem>>, vector<32x32xbf16>
    %cst_40 = arith.constant dense<0.000000e+00> : vector<16x32xf32>
    %124 = tpu.matmul %122, %123, %cst_40 {dimension_numbers = #tpu.dot_dimension_numbers<[1], [0], [0], [1], [0, 0, 1, 1], [], []>} : vector<16x32xbf16>, vector<32x32xbf16>, vector<16x32xf32> -> vector<16x32xf32>
    %125 = arith.addf %121, %124 : vector<16x32xf32>
    %cst_41 = arith.constant dense<0.000000e+00> : vector<16xf32>
    %126 = vector.multi_reduction <add>, %125, %cst_41 [1] : vector<16x32xf32> to vector<16xf32>
    %127 = vector.shape_cast %126 : vector<16xf32> to vector<16x1xf32>
    %cst_42 = arith.constant 3.200000e+01 : f32
    %128 = vector.broadcast %cst_42 : f32 to vector<16x1xf32>
    %129 = arith.divf %127, %128 : vector<16x1xf32>
    %130 = vector.broadcast %129 : vector<16x1xf32> to vector<16x32xf32>
    %131 = arith.subf %125, %130 : vector<16x32xf32>
    %132 = arith.mulf %131, %131 : vector<16x32xf32>
    %cst_43 = arith.constant dense<0.000000e+00> : vector<16xf32>
    %133 = vector.multi_reduction <add>, %132, %cst_43 [1] : vector<16x32xf32> to vector<16xf32>
    %134 = vector.shape_cast %133 : vector<16xf32> to vector<16x1xf32>
    %cst_44 = arith.constant 3.200000e+01 : f32
    %135 = vector.broadcast %cst_44 : f32 to vector<16x1xf32>
    %136 = arith.divf %134, %135 : vector<16x1xf32>
    %137 = vector.broadcast %129 : vector<16x1xf32> to vector<16x32xf32>
    %138 = arith.subf %125, %137 : vector<16x32xf32>
    %cst_45 = arith.constant 9.99999974E-6 : f32
    %139 = vector.broadcast %cst_45 : f32 to vector<16x1xf32>
    %140 = arith.addf %136, %139 : vector<16x1xf32>
    %141 = math.rsqrt %140 : vector<16x1xf32>
    %142 = vector.broadcast %141 : vector<16x1xf32> to vector<16x32xf32>
    %143 = arith.mulf %138, %142 : vector<16x32xf32>
    %c0_46 = arith.constant 0 : index
    %c0_47 = arith.constant 0 : index
    %144 = vector.load %arg8[%c0_46, %c0_47] : memref<1x32xf32, #tpu.memory_space<vmem>>, vector<1x32xf32>
    %145 = vector.shape_cast %144 : vector<1x32xf32> to vector<32xf32>
    %146 = vector.shape_cast %145 : vector<32xf32> to vector<1x32xf32>
    %147 = vector.broadcast %146 : vector<1x32xf32> to vector<16x32xf32>
    %148 = arith.mulf %143, %147 : vector<16x32xf32>
    %c0_48 = arith.constant 0 : index
    %c0_49 = arith.constant 0 : index
    %149 = vector.load %arg9[%c0_48, %c0_49] : memref<1x32xf32, #tpu.memory_space<vmem>>, vector<1x32xf32>
    %150 = vector.shape_cast %149 : vector<1x32xf32> to vector<32xf32>
    %151 = vector.shape_cast %150 : vector<32xf32> to vector<1x32xf32>
    %152 = vector.broadcast %151 : vector<1x32xf32> to vector<16x32xf32>
    %153 = arith.addf %148, %152 : vector<16x32xf32>
    %154 = arith.truncf %153 : vector<16x32xf32> to vector<16x32xbf16>
    %c0_50 = arith.constant 0 : index
    %c0_51 = arith.constant 0 : index
    %155 = vector.load %arg13[%c0_50, %c0_51] : memref<1x32xf32, #tpu.memory_space<vmem>>, vector<1x32xf32>
    %156 = vector.shape_cast %155 : vector<1x32xf32> to vector<32xf32>
    %157 = vector.shape_cast %156 : vector<32xf32> to vector<1x32xf32>
    %158 = vector.broadcast %157 : vector<1x32xf32> to vector<16x32xf32>
    %159 = arith.addf %125, %158 : vector<16x32xf32>
    %c0_52 = arith.constant 0 : index
    %c0_53 = arith.constant 0 : index
    %160 = vector.load %arg10[%c0_52, %c0_53] : memref<32x128xbf16, #tpu.memory_space<vmem>>, vector<32x128xbf16>
    %cst_54 = arith.constant dense<0.000000e+00> : vector<16x128xf32>
    %161 = tpu.matmul %154, %160, %cst_54 {dimension_numbers = #tpu.dot_dimension_numbers<[1], [0], [0], [1], [0, 0, 1, 1], [], []>} : vector<16x32xbf16>, vector<32x128xbf16>, vector<16x128xf32> -> vector<16x128xf32>
    %c0_55 = arith.constant 0 : index
    %c0_56 = arith.constant 0 : index
    %162 = vector.load %arg11[%c0_55, %c0_56] : memref<1x128xf32, #tpu.memory_space<vmem>>, vector<1x128xf32>
    %163 = vector.shape_cast %162 : vector<1x128xf32> to vector<128xf32>
    %164 = vector.shape_cast %163 : vector<128xf32> to vector<1x128xf32>
    %165 = vector.broadcast %164 : vector<1x128xf32> to vector<16x128xf32>
    %166 = arith.addf %161, %165 : vector<16x128xf32>
    %cst_57 = arith.constant 1.702000e+00 : f32
    %167 = vector.broadcast %cst_57 : f32 to vector<16x128xf32>
    %168 = arith.mulf %167, %166 : vector<16x128xf32>
    %169 = arith.negf %168 : vector<16x128xf32>
    %170 = math.exp %169 : vector<16x128xf32>
    %cst_58 = arith.constant 1.000000e+00 : f32
    %171 = vector.broadcast %cst_58 : f32 to vector<16x128xf32>
    %172 = arith.addf %171, %170 : vector<16x128xf32>
    %173 = arith.divf %171, %172 : vector<16x128xf32>
    %174 = arith.mulf %166, %173 : vector<16x128xf32>
    %175 = arith.truncf %174 : vector<16x128xf32> to vector<16x128xbf16>
    %c0_59 = arith.constant 0 : index
    %c0_60 = arith.constant 0 : index
    %176 = vector.load %arg12[%c0_59, %c0_60] : memref<128x32xbf16, #tpu.memory_space<vmem>>, vector<128x32xbf16>
    %cst_61 = arith.constant dense<0.000000e+00> : vector<16x32xf32>
    %177 = tpu.matmul %175, %176, %cst_61 {dimension_numbers = #tpu.dot_dimension_numbers<[1], [0], [0], [1], [0, 0, 1, 1], [], []>} : vector<16x128xbf16>, vector<128x32xbf16>, vector<16x32xf32> -> vector<16x32xf32>
    %178 = arith.addf %159, %177 : vector<16x32xf32>
    %179 = vector.shape_cast %178 : vector<16x32xf32> to vector<2x8x32xf32>
    %c0_62 = arith.constant 0 : index
    %c0_63 = arith.constant 0 : index
    %c0_64 = arith.constant 0 : index
    %180 = vector.load %arg14[%c0_62, %c0_63, %c0_64] : memref<2x8x32xf32, #tpu.memory_space<vmem>>, vector<2x8x32xf32>
    tpu.vector_store %arg14[%c0_62, %c0_63, %c0_64], %179 {strides = array<i32>} : memref<2x8x32xf32, #tpu.memory_space<vmem>>, vector<2x8x32xf32>,
    return
  }
  func.func @transform_0(%arg0: i32) -> (i32, i32, i32) {
    %c0_i32 = arith.constant 0 : i32
    %c0_i32_0 = arith.constant 0 : i32
    %c0_i32_1 = arith.constant 0 : i32
    return %arg0, %c0_i32, %c0_i32_0 : i32, i32, i32
  }
  func.func @transform_1(%arg0: i32) -> (i32, i32) {
    %c0_i32 = arith.constant 0 : i32
    %c0_i32_0 = arith.constant 0 : i32
    %c0_i32_1 = arith.constant 0 : i32
    return %c0_i32, %c0_i32_0 : i32, i32
  }
  func.func @transform_2(%arg0: i32) -> (i32, i32) {
    %c0_i32 = arith.constant 0 : i32
    %c0_i32_0 = arith.constant 0 : i32
    %c0_i32_1 = arith.constant 0 : i32
    return %c0_i32, %c0_i32_0 : i32, i32
  }
  func.func @transform_3(%arg0: i32) -> (i32, i32) {
    %c0_i32 = arith.constant 0 : i32
    %c0_i32_0 = arith.constant 0 : i32
    %c0_i32_1 = arith.constant 0 : i32
    return %c0_i32, %c0_i32_0 : i32, i32
  }
  func.func @transform_4(%arg0: i32) -> (i32, i32) {
    %c0_i32 = arith.constant 0 : i32
    %c0_i32_0 = arith.constant 0 : i32
    %c0_i32_1 = arith.constant 0 : i32
    return %c0_i32, %c0_i32_0 : i32, i32
  }
  func.func @transform_5(%arg0: i32) -> (i32, i32) {
    %c0_i32 = arith.constant 0 : i32
    %c0_i32_0 = arith.constant 0 : i32
    %c0_i32_1 = arith.constant 0 : i32
    return %c0_i32, %c0_i32_0 : i32, i32
  }
  func.func @transform_6(%arg0: i32) -> (i32, i32) {
    %c0_i32 = arith.constant 0 : i32
    %c0_i32_0 = arith.constant 0 : i32
    %c0_i32_1 = arith.constant 0 : i32
    return %c0_i32, %c0_i32_0 : i32, i32
  }
  func.func @transform_7(%arg0: i32) -> (i32, i32) {
    %c0_i32 = arith.constant 0 : i32
    %c0_i32_0 = arith.constant 0 : i32
    %c0_i32_1 = arith.constant 0 : i32
    return %c0_i32, %c0_i32_0 : i32, i32
  }
  func.func @transform_8(%arg0: i32) -> (i32, i32) {
    %c0_i32 = arith.constant 0 : i32
    %c0_i32_0 = arith.constant 0 : i32
    %c0_i32_1 = arith.constant 0 : i32
    return %c0_i32, %c0_i32_0 : i32, i32
  }
  func.func @transform_9(%arg0: i32) -> (i32, i32) {
    %c0_i32 = arith.constant 0 : i32
    %c0_i32_0 = arith.constant 0 : i32
    %c0_i32_1 = arith.constant 0 : i32
    return %c0_i32, %c0_i32_0 : i32, i32
  }
  func.func @transform_10(%arg0: i32) -> (i32, i32) {
    %c0_i32 = arith.constant 0 : i32
    %c0_i32_0 = arith.constant 0 : i32
    %c0_i32_1 = arith.constant 0 : i32
    return %c0_i32, %c0_i32_0 : i32, i32
  }
  func.func @transform_11(%arg0: i32) -> (i32, i32) {
    %c0_i32 = arith.constant 0 : i32
    %c0_i32_0 = arith.constant 0 : i32
    %c0_i32_1 = arith.constant 0 : i32
    return %c0_i32, %c0_i32_0 : i32, i32
  }
  func.func @transform_12(%arg0: i32) -> (i32, i32) {
    %c0_i32 = arith.constant 0 : i32
    %c0_i32_0 = arith.constant 0 : i32
    %c0_i32_1 = arith.constant 0 : i32
    return %c0_i32, %c0_i32_0 : i32, i32
  }
  func.func @transform_13(%arg0: i32) -> (i32, i32, i32) {
    %c0_i32 = arith.constant 0 : i32
    %c0_i32_0 = arith.constant 0 : i32
    %c0_i32_1 = arith.constant 0 : i32
    return %arg0, %c0_i32, %c0_i32_0 : i32, i32, i32
  }
}

</mosaic_0001>

<bundles_post_ra>
// kernel: tpu_custom_call.1
= control target key start
LH: loop header
LB: loop body
LE: loop exit
PB: predicated region body
PF: predicated region fallthrough
CT: control target
= control target key end

     0   :  { %s2790_s0 = inlined_call_operand.vmem [shape: f32[4,8,32], index: 0, kind: input, shape index: {}]   ;;  %s2791_s1 = inlined_call_operand.vmem [shape: f32[1,32], index: 1, kind: input, shape index: {}]   ;;  %s2792_s2 = inlined_call_operand.vmem [shape: f32[1,32], index: 2, kind: input, shape index: {}]   ;;  %s2793_s3 = inlined_call_operand.vmem [shape: bf16[32,96], index: 3, kind: input, shape index: {}]   ;;  %s2794_s4 = inlined_call_operand.vmem [shape: f32[1,96], index: 4, kind: input, shape index: {}]   ;;  %s2795_s5 = inlined_call_operand.vmem [shape: bf16[32,32], index: 5, kind: input, shape index: {}]   ;;  %s2796_s6 = inlined_call_operand.vmem [shape: f32[1,32], index: 6, kind: input, shape index: {}]   ;;  %s2797_s7 = inlined_call_operand.vmem [shape: f32[1,32], index: 7, kind: input, shape index: {}]   ;;  %s2798_s8 = inlined_call_operand.vmem [shape: f32[1,32], index: 8, kind: input, shape index: {}]   ;;  %s2799_s9 = inlined_call_operand.vmem [shape: bf16[32,128], index: 9, kind: input, shape index: {}]   ;;  %s2800_s10 = inlined_call_operand.vmem [shape: f32[1,128], index: 10, kind: input, shape index: {}]   ;;  %s2801_s11 = inlined_call_operand.vmem [shape: bf16[128,32], index: 11, kind: input, shape index: {}]   ;;  %s2802_s12 = inlined_call_operand.vmem [shape: f32[1,32], index: 12, kind: input, shape index: {}]   ;;  %s2803_s13 = inlined_call_operand.hbm [shape: f32[4,8,32], index: 13, kind: output, shape index: {}]  }
   0x1   :  { %2805 = sst [smem:[#allocation6_spill]] %s2790_s0 }
   0x2   :  { %2806 = sst [smem:[#allocation7_spill]] %s2791_s1 }
   0x3   :  { %2807 = sst [smem:[#allocation8_spill]] %s2792_s2 }
   0x4   :  { %18 = vsyncpa [#allocation4], 0 }
   0x5   :  { %20 = vsyncpa [#allocation4 + $0x1], 0  ;;  %s2419_s25 = smov 0   ;;  %s2421_s26 = smov 0  }
   0x6   :  { %s2423_s27 = smov 0   ;;  %s2425_s28 = smov 0  }
   0x7 LB: > { %s2440_s29 = sadd.s32 4294967295, %s2329_s28   ;;  %s1880_s30 = sadd.s32 4294967294, %s2329_s28   ;;  %s2329_s28 = sphi %s2425_s28, %s2817_s28   ;;  %s2325_s27 = sphi %s2423_s27, %s2816_s27   ;;  %s2321_s26 = sphi %s2421_s26, %s2815_s26   ;;  %s2317_s25 = sphi %s2419_s25, %s2814_s25  }
   0x8   : > { %s2444_s14 = sadd.s32 1, %s2329_s28   ;;  %s311_s15 = sadd.s32 1, %s2325_s27 }
   0x9   : > { %s308_s16 = ssub.s32 %s2329_s28, %s2444_s14  ;;  %p321_p0 = scmp.ne.s32.totalorder %s2325_s27, %s2321_s26 }
   0xa   : > { %p309_p1 = scmp.eq.s32.totalorder %s308_s16, 0  ;;  %p322_p2 = scmp.eq.s32.totalorder %s2440_s29, 1 }
   0xb   : > { %p327_p3 = scmp.ne.s32.totalorder %s2321_s26, %s2317_s25  ;;  %p328_p4 = scmp.eq.s32.totalorder %s1880_s30, 1 }
   0xc   : > { %s2455_s17 = scalar_select %p309_p1, %s2325_s27, %s311_s15  }
   0xd   : > { %p2457_p5 = por %p322_p2, %p321_p0  ;;  %p2461_p6 = por %p328_p4, %p327_p3 }
   0xe   : > { %p1883_p7 = scmp.ge.s32.totalorder %s2329_s28, 1  ;;  %p391_p8 = scmp.lt.s32.totalorder %s2329_s28, 3 }
  0x10   : > { %p392_p9 = pnand %p1883_p7, %p391_p8 }
  0x11   : > { %s1885_s20 = sshll.u32 (!%p392_p9), %s2440_s29, 1  ;;  %vm445_vm0 = vcmask (!%p392_p9), 261120   ;;  %s2810_s0 = sld [smem:[#allocation6_spill]] (!%p392_p9)  ;;  %v2205_v14 = vld [vmem:[%s2793_s3] sm:$0xff] (!%p392_p9)   ;;  %v2331_v15 = vmov (!%p392_p9), 0.0   ;;  %v2206_v16 = vld [vmem:[%s2793_s3 + $0x8] sm:$0xff] (!%p392_p9)  }
  0x12   : > { %395 = sbr.rel (%p392_p9) target bundleno = 4189 (0x105d), region = 72  ;;  %p436_p10 = scmp.lt.s32.totalorder (!%p392_p9), %s1885_s20, 3  ;;  %1994 = vmatprep.subr.bf16.mxu0 (!%p392_p9), %v2331_v15  ;;  %2014 = vmatprep.subr.bf16.mxu1 (!%p392_p9), %v2331_v15  ;;  %vm2332_vm1 = vmmov (!%p392_p9), 0   ;;  %v1889_v34 = vld [vmem:[%s2794_s4] ss:$0 sm:$0xff] (!%p392_p9)  ;;  %vm574_vm2 = vcmask (!%p392_p9), 64512  }
  0x13   : > { %1995 = vmatpush3.bf16.msra.mxu0 (!%p392_p9), %v2205_v14  ;;  %1998 = vmatprep.mubr.msk.bf16.mxu0 (!%p392_p9), %vm2332_vm1, %v2331_v15  ;;  %s2811_s1 = sld [smem:[#allocation7_spill]] (!%p392_p9)  ;;  %s2812_s2 = sld [smem:[#allocation8_spill]] (!%p392_p9)  ;;  %vm699_vm3 = vcmask (!%p392_p9), 1043456   ;;  %vm1477_vm4 = vcmask (!%p392_p9), 130048   ;;  %vm1480_vm5 = vcmask (!%p392_p9), 195584  }
  0x14   : > { %1996 = vmatprep.subr.bf16.mxu0 (!%p392_p9), %v2331_v15  ;;  %2016 = vmatprep.mubr.msk.bf16.mxu1 (!%p392_p9), %vm2332_vm1, %v2331_v15  ;;  %s2333_s16 = smov (!%p392_p9), 96   ;;  %s2336_s22 = smov (!%p392_p9), 120  }
  0x15   : > { %s2337_s23 = smov (!%p392_p9), 56   ;;  %s2339_s30 = smov (!%p392_p9), 112  }
  0x16   : > { %s2340_s15 = smov (!%p392_p9), 48  }
  0x17   : > { %1997 = vmatpush3.bf16.msra.mxu0 (!%p392_p9), %v2206_v16 }
  0x18   : > { %2002 = vmatprep.subr.bf16.mxu0 (!%p392_p9), %v2331_v15 }
  0x19   : > { %s2819_s20 = smov (!%p436_p10, %s1885_s20), 3  ;;  %v1887_v25 = vld [vmem:[%s2811_s1] ss:$0 sm:$0xff] }
  0x1a   : > { %s1886_s21 = sshll.u32 %s2819_s20, 3  ;;  %v1888_v29 = vld [vmem:[%s2812_s2] ss:$0 sm:$0xff]  ;;  %s2334_s20 = smov 64  }
  0x1b   : > { %s439_s24 = scalar_lea.vmem %s2810_s0, %s1886_s21  ;;  %s2335_s21 = smov 88  }
  0x1c   : > { %v2471_v0 = vld [vmem:[%s439_s24] sm:$0xff]  ;;  %v2473_v1 = vld [vmem:[%s439_s24 + $0x8] sm:$0xff]  ;;  %s2338_s24 = smov 80   ;;  %s2347_s0 = smov [#allocation3]  }
  0x1d   : > { %v446_v2 = vsel %vm445_vm0, %v2471_v0, 0.0  ;;  %v449_v3 = vsel %vm445_vm0, %v2473_v1, 0.0  ;;  %s2271_s1 = sshll.u32 %s2347_s0, 4  ;;  %s2272_s1 = int_to_ptr.vmem [resolvable:$false] %s2271_s1 }
  0x1e   : > { %447 = vadd.xlane.f32.xlu0 %v446_v2  ;;  %s2273_s2 = scalar_lea.vmem %s2272_s1, 512 }
  0x22   : > { %450 = vadd.xlane.f32.xlu0 %v449_v3 }
  0xab   : > { %v448_v4 = vpop.xlane.xlu0 %447 }
  0xac   : > { %v453_v5 = vmul.f32 0.03125, %v448_v4 }
  0xae   : > { %v455_v6 = vsub.f32 %v2471_v0, %v453_v5 }
  0xaf   : > { %v451_v7 = vpop.xlane.xlu0 %450 }
  0xb0   : > { %v454_v8 = vmul.f32 0.03125, %v451_v7  ;;  %v457_v9 = vmul.f32 %v455_v6, %v455_v6 }
  0xb2   : > { %v456_v10 = vsub.f32 %v2473_v1, %v454_v8  ;;  %v459_v11 = vsel %vm445_vm0, %v457_v9, 0.0 }
  0xb3   : > { %460 = vadd.xlane.f32.xlu1 %v459_v11 }
  0xb4   : > { %v458_v12 = vmul.f32 %v456_v10, %v456_v10 }
  0xb6   : > { %v462_v13 = vsel %vm445_vm0, %v458_v12, 0.0 }
  0xb7   : > { %463 = vadd.xlane.f32.xlu1 %v462_v13 }
 0x140   : > { %v461_v17 = vpop.xlane.xlu1 %460 }
 0x141   : > { %v465_v18 = vmul.f32 0.03125, %v461_v17 }
 0x143   : > { %v467_v19 = vadd.f32 1e-05, %v465_v18 }
 0x144   : > { %v464_v20 = vpop.xlane.xlu1 %463 }
 0x145   : > { %2219 = vrsqrt.f32 %v467_v19  ;;  %v466_v21 = vmul.f32 0.03125, %v464_v20 }
 0x147   : > { %v468_v22 = vadd.f32 1e-05, %v466_v21 }
 0x149   : > { %2221 = vrsqrt.f32 %v468_v22 }
 0x14f   : > { %v2220_v23 = vpop.eup %2219 }
 0x150   : > { %v471_v24 = vmul.f32 %v2220_v23, %v455_v6 }
 0x152   : > { %v480_v28 = vmul.f32 %v1887_v25, %v471_v24 }
 0x153   : > { %v2222_v26 = vpop.eup %2221 }
 0x154   : > { %v472_v27 = vmul.f32 %v2222_v26, %v456_v10  ;;  %v489_v31 = vadd.f32 %v1888_v29, %v480_v28 }
 0x156   : > { %v481_v30 = vmul.f32 %v1887_v25, %v472_v27 }
 0x158   : > { %v490_v32 = vadd.f32 %v1888_v29, %v481_v30 }
 0x15a   : > { %v491_v33 = vpack.c.bf16 %v490_v32, %v489_v31 }
 0x15c   : > { %1999 = vmatmul.mubr.msk.bf16.vlgmr.msra.gmra.mrb[0].mxu0 %vm445_vm0, %v491_v33 }
 0x15d   : > { %2004 = vmatprep.mubr.msk.bf16.mxu0 %vm2332_vm1, %v2331_v15 }
 0x22f   : > { %v552_v35 = vpop.f32.mrb[0].mxu0 }
 0x230   : > { %v553_v36 = vadd.f32 %v1889_v34, %v552_v35  ;;  %v2000_v37 = vpop.f32.mrb[1].mxu0 }
 0x231   : > { %v555_v38 = vpop.f32.mrb[2].mxu0 }
 0x232   : > { %v2509_v39 = vpack.c.bf16 %v553_v36, %v553_v36  ;;  %v556_v40 = vadd.f32 %v1889_v34, %v555_v38  ;;  %v2001_v41 = vpop.f32.mrb[3].mxu0  ;;  %v559_v45 = vmul.f32 0.35355338, %v553_v36 }
 0x234   : > { %v2511_v42 = vpack.c.bf16 %v556_v40, %v556_v40  ;;  %572 = vrot.lane.b32.xlu0 %v2509_v39, %s2333_s16  ;;  %v2517_v47 = vpack.c.bf16 %v559_v45, %v559_v45  ;;  %v560_v49 = vmul.f32 0.35355338, %v556_v40 }
 0x236   : > { %622 = vrot.lane.b32.xlu1 %v2511_v42, %s2333_s16  ;;  %v2525_v50 = vpack.c.bf16 %v560_v49, %v560_v49  ;;  %s2341_s16 = smov 72  }
 0x2a6   : > { %v573_v43 = vpop.permute.xlu0 %572 }
 0x2a7   : > { %v579_v44 = vsel %vm574_vm2, %v573_v43, 0 }
 0x2a8   : > { %2003 = vmatpush3.bf16.xpose.msra.mxu0 %v579_v44  ;;  %v623_v46 = vpop.permute.xlu1 %622 }
 0x2a9   : > { %2008 = vmatprep.subr.bf16.mxu0 %v2331_v15  ;;  %v628_v48 = vsel %vm574_vm2, %v623_v46, 0 }
 0x2af   : > { %2005 = vmatmul.mubr.msk.bf16.vlgmr.msra.gmra.mrb[4].mxu0 %vm574_vm2, %v2517_v47 }
 0x2b0   : > { %2009 = vmatpush3.bf16.xpose.msra.mxu0 %v628_v48  ;;  %2010 = vmatprep.mubr.msk.bf16.mxu0 %vm2332_vm1, %v2331_v15 }
 0x2b1   : > { %2020 = vmatprep.subr.bf16.mxu0 %v2331_v15 }
 0x2b7   : > { %2011 = vmatmul.mubr.msk.bf16.vlgmr.msra.gmra.mrb[8].mxu0 %vm574_vm2, %v2525_v50 }
 0x2b8   : > { %2022 = vmatprep.mubr.msk.bf16.mxu0 %vm2332_vm1, %v2331_v15 }
 0x382   : > { %v615_v51 = vpop.f32.mrb[4].mxu0 }
 0x383   : > { %v2006_v52 = vpop.f32.mrb[5].mxu0  ;;  %v670_v53 = vsel %vm574_vm2, %v615_v51, -inf }
 0x384   : > { %671 = vmax.xlane.f32.xlu1 %v670_v53  ;;  %v618_v54 = vpop.f32.mrb[6].mxu0 }
 0x385   : > { %v2007_v55 = vpop.f32.mrb[7].mxu0 }
 0x38a   : > { %v664_v56 = vpop.f32.mrb[8].mxu0 }
 0x38b   : > { %v2012_v57 = vpop.f32.mrb[9].mxu0  ;;  %v673_v58 = vsel %vm574_vm2, %v664_v56, -inf }
 0x38c   : > { %674 = vmax.xlane.f32.xlu0 %v673_v58  ;;  %v667_v59 = vpop.f32.mrb[10].mxu0 }
 0x38d   : > { %v2013_v60 = vpop.f32.mrb[11].mxu0 }
 0x395   : > { %743 = vrot.lane.b32.xlu1 %v2511_v42, %s2334_s20 }
 0x399   : > { %793 = vrot.lane.b32.xlu1 %v2509_v39, %s2335_s21 }
 0x411   : > { %v672_v61 = vpop.xlane.xlu1 %671 }
 0x412   : > { %v676_v62 = vsub.f32 %v615_v51, %v672_v61 }
 0x414   : > { %v678_v63 = vmul.f32 1.442695, %v676_v62 }
 0x415   : > { %v744_v2 = vpop.permute.xlu1 %743 }
 0x416   : > { %2223 = vpow2.f32 %v678_v63  ;;  %v749_v3 = vsel %vm699_vm3, %v744_v2, 0 }
 0x417   : > { %2021 = vmatpush3.bf16.msra.mxu0 %v749_v3 }
 0x418   : > { %2032 = vmatprep.subr.bf16.mxu0 %v2331_v15 }
 0x419   : > { %v675_v4 = vpop.xlane.xlu0 %674  ;;  %v794_v12 = vpop.permute.xlu1 %793 }
 0x41a   : > { %v677_v5 = vsub.f32 %v664_v56, %v675_v4  ;;  %v799_v20 = vsel %vm574_vm2, %v794_v12, 0 }
 0x41c   : > { %v680_v6 = vmul.f32 1.442695, %v677_v5 }
 0x41e   : > { %2225 = vpow2.f32 %v680_v6 }
 0x420   : > { %v2224_v7 = vpop.eup %2223 }
 0x421   : > { %v682_v8 = vsel %vm574_vm2, %v2224_v7, 0.0 }
 0x422   : > { %683 = vadd.xlane.f32.xlu0 %v682_v8 }
 0x428   : > { %v2226_v9 = vpop.eup %2225 }
 0x429   : > { %v685_v10 = vsel %vm574_vm2, %v2226_v9, 0.0 }
 0x42a   : > { %686 = vadd.xlane.f32.xlu1 %v685_v10 }
 0x438   : > { %694 = vrot.lane.b32.xlu0 %v2509_v39, %s2334_s20  ;;  %s2342_s20 = smov 104  }
 0x43b   : > { %843 = vrot.lane.b32.xlu1 %v2511_v42, %s2335_s21  ;;  %s2343_s21 = smov 40  }
 0x43c   : > { %791 = vrot.lane.b32.xlu0 %v2517_v47, %s2336_s22 }
 0x43f   : > { %841 = vrot.lane.b32.xlu1 %v2525_v50, %s2336_s22  ;;  %s2804_s22 = smov 8  }
 0x4af   : > { %v684_v11 = vpop.xlane.xlu0 %683 }
 0x4b0   : > { %2227 = vrcp.f32 %v684_v11 }
 0x4b3   : > { %v695_v13 = vpop.permute.xlu0 %694 }
 0x4b4   : > { %v701_v14 = vsel %vm699_vm3, %v695_v13, 0 }
 0x4b5   : > { %2015 = vmatpush3.bf16.msra.mxu1 %v701_v14 }
 0x4b6   : > { %2026 = vmatprep.subr.bf16.mxu1 %v2331_v15 }
 0x4b7   : > { %v687_v16 = vpop.xlane.xlu1 %686  ;;  %v792_v25 = vpop.permute.xlu0 %791 }
 0x4b8   : > { %2229 = vrcp.f32 %v687_v16 }
 0x4ba   : > { %v2228_v17 = vpop.eup %2227 }
 0x4bb   : > { %v690_v18 = vmul.f32 %v2228_v17, %v2224_v7  ;;  %v844_v23 = vpop.permute.xlu1 %843 }
 0x4bc   : > { %v849_v26 = vsel %vm574_vm2, %v844_v23, 0 }
 0x4bd   : > { %v692_v19 = vpack.c.bf16 %v690_v18, %v690_v18 }
 0x4bf   : > { %2017 = vmatmul.mubr.msk.bf16.vlgmr.msra.gmra.mrb[0].mxu1 %vm574_vm2, %v692_v19  ;;  %v842_v27 = vpop.permute.xlu1 %841 }
 0x4c0   : > { %2027 = vmatpush3.bf16.xpose.msra.mxu1 %v799_v20  ;;  %2028 = vmatprep.mubr.msk.bf16.mxu1 %vm2332_vm1, %v2331_v15 }
 0x4c1   : > { %2038 = vmatprep.subr.bf16.mxu1 %v2331_v15 }
 0x4c2   : > { %v2230_v21 = vpop.eup %2229 }
 0x4c3   : > { %v691_v22 = vmul.f32 %v2230_v21, %v2226_v9 }
 0x4c5   : > { %v693_v24 = vpack.c.bf16 %v691_v22, %v691_v22 }
 0x4c7   : > { %2023 = vmatmul.mubr.msk.bf16.vlgmr.msra.gmra.mrb[12].mxu0 %vm574_vm2, %v693_v24  ;;  %2029 = vmatmul.mubr.msk.bf16.vlgmr.msra.gmra.mrb[4].mxu1 %vm574_vm2, %v792_v25 }
 0x4c8   : > { %2033 = vmatpush3.bf16.xpose.msra.mxu0 %v849_v26  ;;  %2034 = vmatprep.mubr.msk.bf16.mxu0 %vm2332_vm1, %v2331_v15 }
 0x4c9   : > { %2044 = vmatprep.subr.bf16.mxu0 %v2331_v15  ;;  %2040 = vmatprep.mubr.msk.bf16.mxu1 %vm2332_vm1, %v2331_v15 }
 0x4cf   : > { %2035 = vmatmul.mubr.msk.bf16.vlgmr.msra.gmra.mrb[16].mxu0 %vm574_vm2, %v842_v27 }
 0x4d0   : > { %2046 = vmatprep.mubr.msk.bf16.mxu0 %vm2332_vm1, %v2331_v15 }
 0x592   : > { %v2561_v28 = vpop.f32.mrb[0].mxu1 }
 0x593   : > { %v2018_v29 = vpop.f32.mrb[1].mxu1 }
 0x594   : > { %v740_v30 = vpop.f32.mrb[2].mxu1 }
 0x595   : > { %v2019_v31 = vpop.f32.mrb[3].mxu1 }
 0x59a   : > { %v2563_v32 = vpop.f32.mrb[12].mxu0  ;;  %v835_v33 = vpop.f32.mrb[4].mxu1 }
 0x59b   : > { %v2024_v34 = vpop.f32.mrb[13].mxu0  ;;  %v2030_v35 = vpop.f32.mrb[5].mxu1  ;;  %v891_v36 = vsel %vm574_vm2, %v835_v33, -inf }
 0x59c   : > { %892 = vmax.xlane.f32.xlu0 %v891_v36  ;;  %v788_v37 = vpop.f32.mrb[14].mxu0  ;;  %v838_v38 = vpop.f32.mrb[6].mxu1 }
 0x59d   : > { %v2025_v40 = vpop.f32.mrb[15].mxu0  ;;  %v2031_v41 = vpop.f32.mrb[7].mxu1 }
 0x5a2   : > { %v885_v43 = vpop.f32.mrb[16].mxu0 }
 0x5a3   : > { %v2036_v44 = vpop.f32.mrb[17].mxu0  ;;  %v894_v45 = vsel %vm574_vm2, %v885_v43, -inf }
 0x5a4   : > { %895 = vmax.xlane.f32.xlu1 %v894_v45  ;;  %v888_v46 = vpop.f32.mrb[18].mxu0 }
 0x5a5   : > { %v2037_v48 = vpop.f32.mrb[19].mxu0 }
 0x5b5   : > { %963 = vrot.lane.b32.xlu1 %v2511_v42, %s2337_s23 }
 0x5b9   : > { %1013 = vrot.lane.b32.xlu1 %v2509_v39, %s2338_s24 }
 0x5bd   : > { %1063 = vrot.lane.b32.xlu1 %v2511_v42, %s2338_s24 }
 0x5c1   : > { %1061 = vrot.lane.b32.xlu1 %v2525_v50, %s2339_s30 }
 0x629   : > { %v893_v49 = vpop.xlane.xlu0 %892 }
 0x62a   : > { %v897_v51 = vsub.f32 %v835_v33, %v893_v49 }
 0x62c   : > { %v899_v52 = vmul.f32 1.442695, %v897_v51 }
 0x62e   : > { %2231 = vpow2.f32 %v899_v52 }
 0x631   : > { %v896_v53 = vpop.xlane.xlu1 %895 }
 0x632   : > { %v898_v54 = vsub.f32 %v885_v43, %v896_v53 }
 0x634   : > { %v901_v55 = vmul.f32 1.442695, %v898_v54 }
 0x635   : > { %v964_v56 = vpop.permute.xlu1 %963 }
 0x636   : > { %2233 = vpow2.f32 %v901_v55  ;;  %v969_v57 = vsel %vm699_vm3, %v964_v56, 0 }
 0x637   : > { %2045 = vmatpush3.bf16.msra.mxu0 %v969_v57 }
 0x638   : > { %v2232_v58 = vpop.eup %2231  ;;  %2056 = vmatprep.subr.bf16.mxu0 %v2331_v15 }
 0x639   : > { %v903_v59 = vsel %vm574_vm2, %v2232_v58, 0.0  ;;  %v1014_v7 = vpop.permute.xlu1 %1013 }
 0x63a   : > { %904 = vadd.xlane.f32.xlu0 %v903_v59  ;;  %v1019_v11 = vsel %vm574_vm2, %v1014_v7, 0 }
 0x63d   : > { %v1064_v10 = vpop.permute.xlu1 %1063 }
 0x63e   : > { %v1069_v13 = vsel %vm574_vm2, %v1064_v10, 0 }
 0x640   : > { %v2234_v60 = vpop.eup %2233 }
 0x641   : > { %v906_v61 = vsel %vm574_vm2, %v2234_v60, 0.0  ;;  %v1062_v16 = vpop.permute.xlu1 %1061 }
 0x642   : > { %907 = vadd.xlane.f32.xlu0 %v906_v61 }
 0x658   : > { %915 = vrot.lane.b32.xlu0 %v2509_v39, %s2337_s23  ;;  %s2345_s23 = smov 16  }
 0x65c   : > { %1011 = vrot.lane.b32.xlu0 %v2517_v47, %s2339_s30 }
 0x6c7   : > { %v905_v62 = vpop.xlane.xlu0 %904 }
 0x6c8   : > { %2235 = vrcp.f32 %v905_v62 }
 0x6cf   : > { %v908_v63 = vpop.xlane.xlu0 %907 }
 0x6d0   : > { %2237 = vrcp.f32 %v908_v63 }
 0x6d2   : > { %v2236_v2 = vpop.eup %2235 }
 0x6d3   : > { %v911_v3 = vmul.f32 %v2236_v2, %v2232_v58  ;;  %v916_v4 = vpop.permute.xlu0 %915 }
 0x6d4   : > { %v921_v5 = vsel %vm699_vm3, %v916_v4, 0 }
 0x6d5   : > { %2039 = vmatpush3.bf16.msra.mxu1 %v921_v5  ;;  %v913_v6 = vpack.c.bf16 %v911_v3, %v911_v3 }
 0x6d6   : > { %2050 = vmatprep.subr.bf16.mxu1 %v2331_v15 }
 0x6d7   : > { %v1012_v14 = vpop.permute.xlu0 %1011 }
 0x6d8   : > { %2041 = vmatmul.mubr.msk.bf16.vlgmr.msra.gmra.mrb[8].mxu1 %vm574_vm2, %v913_v6 }
 0x6d9   : > { %2052 = vmatprep.mubr.msk.bf16.mxu1 %vm2332_vm1, %v2331_v15 }
 0x6da   : > { %v2238_v8 = vpop.eup %2237 }
 0x6db   : > { %v912_v9 = vmul.f32 %v2238_v8, %v2234_v60 }
 0x6dd   : > { %v914_v12 = vpack.c.bf16 %v912_v9, %v912_v9 }
 0x6de   : > { %2051 = vmatpush3.bf16.xpose.msra.mxu1 %v1019_v11 }
 0x6df   : > { %2047 = vmatmul.mubr.msk.bf16.vlgmr.msra.gmra.mrb[20].mxu0 %vm574_vm2, %v914_v12  ;;  %2062 = vmatprep.subr.bf16.mxu1 %v2331_v15 }
 0x6e0   : > { %2057 = vmatpush3.bf16.xpose.msra.mxu0 %v1069_v13  ;;  %2058 = vmatprep.mubr.msk.bf16.mxu0 %vm2332_vm1, %v2331_v15 }
 0x6e1   : > { %2068 = vmatprep.subr.bf16.mxu0 %v2331_v15 }
 0x6e5   : > { %2053 = vmatmul.mubr.msk.bf16.vlgmr.msra.gmra.mrb[12].mxu1 %vm574_vm2, %v1012_v14 }
 0x6e6   : > { %2064 = vmatprep.mubr.msk.bf16.mxu1 %vm2332_vm1, %v2331_v15 }
 0x6e7   : > { %2059 = vmatmul.mubr.msk.bf16.vlgmr.msra.gmra.mrb[24].mxu0 %vm574_vm2, %v1062_v16 }
 0x6e8   : > { %2070 = vmatprep.mubr.msk.bf16.mxu0 %vm2332_vm1, %v2331_v15 }
 0x7ab   : > { %v2595_v17 = vpop.f32.mrb[8].mxu1 }
 0x7ac   : > { %v2042_v18 = vpop.f32.mrb[9].mxu1 }
 0x7ad   : > { %v960_v19 = vpop.f32.mrb[10].mxu1 }
 0x7ae   : > { %v2043_v20 = vpop.f32.mrb[11].mxu1 }
 0x7b2   : > { %v2597_v21 = vpop.f32.mrb[20].mxu0 }
 0x7b3   : > { %v2190_v22 = vpack.i.bf16 %v2597_v21, %v2595_v17  ;;  %v2048_v23 = vpop.f32.mrb[21].mxu0 }
 0x7b4   : > { %v1008_v24 = vpop.f32.mrb[22].mxu0 }
 0x7b5   : > { %v2049_v25 = vpop.f32.mrb[23].mxu0 }
 0x7b8   : > { %v1055_v26 = vpop.f32.mrb[12].mxu1 }
 0x7b9   : > { %v2054_v27 = vpop.f32.mrb[13].mxu1  ;;  %v1111_v29 = vsel %vm574_vm2, %v1055_v26, -inf }
 0x7ba   : > { %1112 = vmax.xlane.f32.xlu0 %v1111_v29  ;;  %v1058_v30 = vpop.f32.mrb[14].mxu1  ;;  %v1105_v31 = vpop.f32.mrb[24].mxu0 }
 0x7bb   : > { %v2055_v33 = vpop.f32.mrb[15].mxu1  ;;  %v2060_v34 = vpop.f32.mrb[25].mxu0  ;;  %v1114_v35 = vsel %vm574_vm2, %v1105_v31, -inf }
 0x7bc   : > { %1115 = vmax.xlane.f32.xlu1 %v1114_v35  ;;  %v1108_v36 = vpop.f32.mrb[26].mxu0 }
 0x7bd   : > { %v2061_v37 = vpop.f32.mrb[27].mxu0 }
 0x7cd   : > { %1183 = vrot.lane.b32.xlu1 %v2511_v42, %s2340_s15 }
 0x7d1   : > { %1233 = vrot.lane.b32.xlu1 %v2509_v39, %s2341_s16 }
 0x7d5   : > { %1283 = vrot.lane.b32.xlu1 %v2511_v42, %s2341_s16 }
 0x7d9   : > { %1281 = vrot.lane.b32.xlu1 %v2525_v50, %s2342_s20 }
 0x847   : > { %v1113_v38 = vpop.xlane.xlu0 %1112 }
 0x848   : > { %v1117_v40 = vsub.f32 %v1055_v26, %v1113_v38 }
 0x849   : > { %v1116_v41 = vpop.xlane.xlu1 %1115 }
 0x84a   : > { %v1119_v43 = vmul.f32 1.442695, %v1117_v40  ;;  %v1118_v44 = vsub.f32 %v1105_v31, %v1116_v41 }
 0x84c   : > { %2239 = vpow2.f32 %v1119_v43  ;;  %v1121_v45 = vmul.f32 1.442695, %v1118_v44 }
 0x84d   : > { %v1184_v46 = vpop.permute.xlu1 %1183 }
 0x84e   : > { %2241 = vpow2.f32 %v1121_v45  ;;  %v1189_v48 = vsel %vm699_vm3, %v1184_v46, 0 }
 0x84f   : > { %2069 = vmatpush3.bf16.msra.mxu0 %v1189_v48 }
 0x850   : > { %2080 = vmatprep.subr.bf16.mxu0 %v2331_v15 }
 0x851   : > { %v1234_v58 = vpop.permute.xlu1 %1233 }
 0x855   : > { %v1284_v63 = vpop.permute.xlu1 %1283 }
 0x856   : > { %v2240_v49 = vpop.eup %2239  ;;  %v1289_v3 = vsel %vm574_vm2, %v1284_v63, 0 }
 0x857   : > { %v1123_v51 = vsel %vm574_vm2, %v2240_v49, 0.0 }
 0x858   : > { %v2242_v52 = vpop.eup %2241  ;;  %1124 = vadd.xlane.f32.xlu0 %v1123_v51 }
 0x859   : > { %v1126_v50 = vsel %vm574_vm2, %v2242_v52, 0.0  ;;  %v1282_v5 = vpop.permute.xlu1 %1281 }
 0x85c   : > { %1127 = vadd.xlane.f32.xlu0 %v1126_v50 }
 0x872   : > { %1135 = vrot.lane.b32.xlu0 %v2509_v39, %s2340_s15  ;;  %s1943_s15 = sshll.u32 %s2440_s29, 8 }
 0x876   : > { %1231 = vrot.lane.b32.xlu0 %v2517_v47, %s2342_s20  ;;  %v1239_v47 = vsel %vm574_vm2, %v1234_v58, 0  ;;  %s2346_s20 = smov 24  }
 0x8e5   : > { %v1125_v53 = vpop.xlane.xlu0 %1124 }
 0x8e6   : > { %2243 = vrcp.f32 %v1125_v53 }
 0x8e9   : > { %v1128_v54 = vpop.xlane.xlu0 %1127 }
 0x8ea   : > { %2245 = vrcp.f32 %v1128_v54  ;;  %v2208_v54 = vld [vmem:[%s2795_s5 + $0x8] sm:$0xff]  }
 0x8ed   : > { %v1136_v55 = vpop.permute.xlu0 %1135 }
 0x8ee   : > { %v1141_v56 = vsel %vm699_vm3, %v1136_v55, 0 }
 0x8ef   : > { %2063 = vmatpush3.bf16.msra.mxu1 %v1141_v56 }
 0x8f0   : > { %v2244_v57 = vpop.eup %2243  ;;  %2074 = vmatprep.subr.bf16.mxu1 %v2331_v15 }
 0x8f1   : > { %v1131_v59 = vmul.f32 %v2244_v57, %v2240_v49  ;;  %v1232_v4 = vpop.permute.xlu0 %1231 }
 0x8f3   : > { %v1133_v60 = vpack.c.bf16 %v1131_v59, %v1131_v59 }
 0x8f4   : > { %v2246_v61 = vpop.eup %2245 }
 0x8f5   : > { %v1132_v62 = vmul.f32 %v2246_v61, %v2242_v52  ;;  %2065 = vmatmul.mubr.msk.bf16.vlgmr.msra.gmra.mrb[16].mxu1 %vm574_vm2, %v1133_v60  ;;  %v2207_v52 = vld [vmem:[%s2795_s5] sm:$0xff]  }
 0x8f6   : > { %2076 = vmatprep.mubr.msk.bf16.mxu1 %vm2332_vm1, %v2331_v15 }
 0x8f7   : > { %v1134_v2 = vpack.c.bf16 %v1132_v62, %v1132_v62 }
 0x8f8   : > { %2075 = vmatpush3.bf16.xpose.msra.mxu1 %v1239_v47 }
 0x8f9   : > { %2071 = vmatmul.mubr.msk.bf16.vlgmr.msra.gmra.mrb[28].mxu0 %vm574_vm2, %v1134_v2  ;;  %2086 = vmatprep.subr.bf16.mxu1 %v2331_v15 }
 0x8fa   : > { %2081 = vmatpush3.bf16.xpose.msra.mxu0 %v1289_v3  ;;  %2082 = vmatprep.mubr.msk.bf16.mxu0 %vm2332_vm1, %v2331_v15 }
 0x8fb   : > { %2092 = vmatprep.subr.bf16.mxu0 %v2331_v15 }
 0x8ff   : > { %2077 = vmatmul.mubr.msk.bf16.vlgmr.msra.gmra.mrb[20].mxu1 %vm574_vm2, %v1232_v4 }
 0x900   : > { %2088 = vmatprep.mubr.msk.bf16.mxu1 %vm2332_vm1, %v2331_v15 }
 0x901   : > { %2083 = vmatmul.mubr.msk.bf16.vlgmr.msra.gmra.mrb[32].mxu0 %vm574_vm2, %v1282_v5 }
 0x902   : > { %2094 = vmatprep.mubr.msk.bf16.mxu0 %vm2332_vm1, %v2331_v15 }
 0x9c8   : > { %v1177_v6 = vpop.f32.mrb[16].mxu1 }
 0x9c9   : > { %v2066_v7 = vpop.f32.mrb[17].mxu1 }
 0x9ca   : > { %v1180_v8 = vpop.f32.mrb[18].mxu1 }
 0x9cb   : > { %v2067_v9 = vpop.f32.mrb[19].mxu1 }
 0x9cc   : > { %v1225_v10 = vpop.f32.mrb[28].mxu0 }
 0x9cd   : > { %v2195_v11 = vpack.i.bf16 %v1225_v10, %v1177_v6  ;;  %v2072_v12 = vpop.f32.mrb[29].mxu0 }
 0x9ce   : > { %v1228_v13 = vpop.f32.mrb[30].mxu0 }
 0x9cf   : > { %v2073_v14 = vpop.f32.mrb[31].mxu0 }
 0x9d2   : > { %v1275_v16 = vpop.f32.mrb[20].mxu1 }
 0x9d3   : > { %v2078_v18 = vpop.f32.mrb[21].mxu1  ;;  %v1331_v19 = vsel %vm574_vm2, %v1275_v16, -inf }
 0x9d4   : > { %1332 = vmax.xlane.f32.xlu0 %v1331_v19  ;;  %v1278_v20 = vpop.f32.mrb[22].mxu1  ;;  %v1325_v23 = vpop.f32.mrb[32].mxu0 }
 0x9d5   : > { %v2079_v24 = vpop.f32.mrb[23].mxu1  ;;  %v2084_v25 = vpop.f32.mrb[33].mxu0  ;;  %v1334_v26 = vsel %vm574_vm2, %v1325_v23, -inf }
 0x9d6   : > { %1335 = vmax.xlane.f32.xlu1 %v1334_v26  ;;  %v1328_v27 = vpop.f32.mrb[34].mxu0 }
 0x9d7   : > { %v2085_v29 = vpop.f32.mrb[35].mxu0 }
 0x9e7   : > { %1403 = vrot.lane.b32.xlu1 %v2511_v42, %s2343_s21 }
 0x9eb   : > { %2191 = vrot.lane.b32.xlu1 %v2190_v22, %s2804_s22  ;;  %s432_s22 = sand.u32 1, %s2321_s26  }
 0x9ec   : > { %s2748_s29 = scalar_lea.sflag [#allocation4], %s432_s22 }
 0x9ef   : > { %2196 = vrot.lane.b32.xlu1 %v2195_v11, %s2345_s23 }
 0xa61   : > { %v1333_v30 = vpop.xlane.xlu0 %1332 }
 0xa62   : > { %v1337_v31 = vsub.f32 %v1275_v16, %v1333_v30 }
 0xa63   : > { %v1336_v33 = vpop.xlane.xlu1 %1335 }
 0xa64   : > { %v1339_v34 = vmul.f32 1.442695, %v1337_v31  ;;  %v1338_v35 = vsub.f32 %v1325_v23, %v1336_v33 }
 0xa66   : > { %2247 = vpow2.f32 %v1339_v34  ;;  %v1341_v36 = vmul.f32 1.442695, %v1338_v35 }
 0xa67   : > { %v1404_v37 = vpop.permute.xlu1 %1403 }
 0xa68   : > { %2249 = vpow2.f32 %v1341_v36  ;;  %v1409_v38 = vsel %vm699_vm3, %v1404_v37, 0 }
 0xa69   : > { %2093 = vmatpush3.bf16.msra.mxu0 %v1409_v38 }
 0xa6a   : > { %2106 = vmatprep.subr.bf16.mxu0 %v2331_v15 }
 0xa6b   : > { %v2192_v62 = vpop.permute.xlu1 %2191 }
 0xa6c   : > { %v2194_v47 = vunpack.i.h.bf16 %v2192_v62  ;;  %v2193_v2 = vunpack.i.l.bf16 %v2192_v62  ;;  %v2217_v62 = vld [vmem:[%s2801_s11 + $0x30] sm:$0xff]  }
 0xa6e   : > { %v1476_v6 = vsel %vm574_vm2, %v2563_v32, %v2194_v47  ;;  %v1475_v7 = vsel %vm574_vm2, %v2561_v28, %v2193_v2  ;;  %v1913_v32 = vld [vmem:[%s2796_s6] ss:$0 sm:$0xff] }
 0xa6f   : > { %v2197_v63 = vpop.permute.xlu1 %2196  ;;  %v1492_v28 = vadd.f32 %v1913_v32, %v2471_v0  ;;  %v1493_v18 = vadd.f32 %v1913_v32, %v2473_v1  ;;  %v1920_v47 = vld [vmem:[%s2800_s10] ss:$0 sm:$0xff] }
 0xa70   : > { %v2248_v42 = vpop.eup %2247  ;;  %v2199_v3 = vunpack.i.h.bf16 %v2197_v63  ;;  %v2198_v4 = vunpack.i.l.bf16 %v2197_v63  ;;  %v2218_v63 = vld [vmem:[%s2801_s11 + $0x38] sm:$0xff]  }
 0xa71   : > { %v1343_v17 = vsel %vm574_vm2, %v2248_v42, 0.0 }
 0xa72   : > { %v2250_v21 = vpop.eup %2249  ;;  %1344 = vadd.xlane.f32.xlu0 %v1343_v17  ;;  %v1478_v10 = vsel %vm1477_vm4, %v1475_v7, %v2198_v4  ;;  %v1479_v11 = vsel %vm1477_vm4, %v1476_v6, %v2199_v3  ;;  %v2210_v17 = vld [vmem:[%s2799_s9 + $0x8] sm:$0xff]  }
 0xa73   : > { %v1346_v22 = vsel %vm574_vm2, %v2250_v21, 0.0 }
 0xa76   : > { %1347 = vadd.xlane.f32.xlu0 %v1346_v22 }
 0xa8c   : > { %1355 = vrot.lane.b32.xlu0 %v2509_v39, %s2343_s21  ;;  %s2745_s21 = scalar_lea.hbm %s2803_s13, %s1943_s15 }
 0xaff   : > { %v1345_v40 = vpop.xlane.xlu0 %1344 }
 0xb00   : > { %2251 = vrcp.f32 %v1345_v40 }
 0xb03   : > { %v1348_v41 = vpop.xlane.xlu0 %1347 }
 0xb04   : > { %2253 = vrcp.f32 %v1348_v41 }
 0xb07   : > { %v1356_v43 = vpop.permute.xlu0 %1355 }
 0xb08   : > { %v1361_v44 = vsel %vm699_vm3, %v1356_v43, 0 }
 0xb09   : > { %2087 = vmatpush3.bf16.msra.mxu1 %v1361_v44 }
 0xb0a   : > { %v2252_v45 = vpop.eup %2251  ;;  %2098 = vmatprep.subr.bf16.mxu1 %v2331_v15 }
 0xb0b   : > { %v1351_v46 = vmul.f32 %v2252_v45, %v2248_v42  ;;  %v2209_v42 = vld [vmem:[%s2799_s9] sm:$0xff]  }
 0xb0d   : > { %v1353_v48 = vpack.c.bf16 %v1351_v46, %v1351_v46 }
 0xb0e   : > { %v2254_v49 = vpop.eup %2253 }
 0xb0f   : > { %v1352_v51 = vmul.f32 %v2254_v49, %v2250_v21  ;;  %2089 = vmatmul.mubr.msk.bf16.vlgmr.msra.gmra.mrb[24].mxu1 %vm574_vm2, %v1353_v48  ;;  %v1917_v48 = vld [vmem:[%s2797_s7] ss:$0 sm:$0xff] }
 0xb10   : > { %2102 = vmatprep.mubr.msk.bf16.mxu1 %vm2332_vm1, %v2331_v15  ;;  %2099 = vmatpush3.bf16.msra.mxu1 %v2207_v52  ;;  %v1918_v52 = vld [vmem:[%s2798_s8] ss:$0 sm:$0xff] }
 0xb11   : > { %v1354_v39 = vpack.c.bf16 %v1352_v51, %v1352_v51  ;;  %2100 = vmatprep.subr.bf16.mxu1 %v2331_v15 }
 0xb13   : > { %2095 = vmatmul.mubr.msk.bf16.vlgmr.msra.gmra.mrb[36].mxu0 %vm574_vm2, %v1354_v39 }
 0xb14   : > { %2110 = vmatprep.mubr.msk.bf16.mxu0 %vm2332_vm1, %v2331_v15  ;;  %2101 = vmatpush3.bf16.msra.mxu1 %v2208_v54 }
 0xb15   : > { %2114 = vmatprep.subr.bf16.mxu1 %v2331_v15  ;;  %2107 = vmatpush3.bf16.msra.mxu0 %v2209_v42 }
 0xb16   : > { %2108 = vmatprep.subr.bf16.mxu0 %v2331_v15 }
 0xb19   : > { %2109 = vmatpush3.bf16.msra.mxu0 %v2210_v17 }
 0xbe2   : > { %v1397_v50 = vpop.f32.mrb[24].mxu1 }
 0xbe3   : > { %v2090_v53 = vpop.f32.mrb[25].mxu1 }
 0xbe4   : > { %v1400_v55 = vpop.f32.mrb[26].mxu1 }
 0xbe5   : > { %v2091_v56 = vpop.f32.mrb[27].mxu1 }
 0xbe6   : > { %v1445_v57 = vpop.f32.mrb[36].mxu0  ;;  %v2211_v56 = vld [vmem:[%s2801_s11] sm:$0xff]  }
 0xbe7   : > { %v2200_v58 = vpack.i.bf16 %v1445_v57, %v1397_v50  ;;  %v2096_v59 = vpop.f32.mrb[37].mxu0  ;;  %v2212_v57 = vld [vmem:[%s2801_s11 + $0x8] sm:$0xff]  }
 0xbe8   : > { %v1448_v60 = vpop.f32.mrb[38].mxu0  ;;  %v2214_v59 = vld [vmem:[%s2801_s11 + $0x18] sm:$0xff]  }
 0xbe9   : > { %2201 = vrot.lane.b32.xlu0 %v2200_v58, %s2346_s20  ;;  %v2097_v61 = vpop.f32.mrb[39].mxu0  ;;  %v2213_v58 = vld [vmem:[%s2801_s11 + $0x10] sm:$0xff]   ;;  %v2215_v60 = vld [vmem:[%s2801_s11 + $0x20] sm:$0xff]   ;;  %s1884_s20 = sshll.u32 %s432_s22, 4 }
 0xbea   : > { %v2216_v61 = vld [vmem:[%s2801_s11 + $0x28] sm:$0xff]   ;;  %s434_s24 = scalar_lea.vmem [#allocation3], %s1884_s20 }
 0xbeb   : > { %s1818_s30 = sshll.u32 %s434_s24, 4  ;;  %s2739_s30 = int_to_ptr.vmem [resolvable:$true] %s1818_s30 }
 0xbec   : > { %s2267_s23 = scalar_lea.vmem %s2739_s30, 256  ;;  %p2274_p0 = scmp.lt.s32.totalorder %s2739_s30, %s2272_s1 }
 0xbed   : > { %p2268_p11 = scmp.ne.s32.totalorder %s2739_s30, %s2267_s23  ;;  %p2275_p1 = scmp.lt.s32.totalorder %s2273_s2, %s2267_s23 }
 0xbef   : > { %p2269_p12 = pnand %p2268_p11, %p2457_p5  ;;  %p2276_p2 = por %p2275_p1, %p2274_p0 }
 0xbf1   : > { %p2270_p13 = pneg %p2269_p12 }
 0xbf3   : > { %p2277_p3 = pnand %p2276_p2, %p2270_p13 }
 0xc5b   : > { %v2202_v5 = vpop.permute.xlu0 %2201 }
 0xc5c   : > { %v2204_v8 = vunpack.i.h.bf16 %v2202_v5  ;;  %v2203_v9 = vunpack.i.l.bf16 %v2202_v5 }
 0xc5e   : > { %v1482_v12 = vsel %vm1480_vm5, %v1479_v11, %v2204_v8  ;;  %v1481_v13 = vsel %vm1480_vm5, %v1478_v10, %v2203_v9 }
 0xc5f   : > { %v1483_v14 = vpack.c.bf16 %v1482_v12, %v1481_v13 }
 0xc61   : > { %1484 = vst.msk [vmem:[#allocation2] sm:$0xff] %vm445_vm0, %v1483_v14 }
 0xc68   : > { %v1494_v16 = vld [vmem:[#allocation2] sm:$0xff] }
 0xc69   : > { %2103 = vmatmul.mubr.msk.bf16.vlgmr.msra.gmra.mrb[28].mxu1 %vm445_vm0, %v1494_v16 }
 0xc6a   : > { %2130 = vmatprep.mubr.msk.bf16.mxu1 %vm2332_vm1, %v2331_v15  ;;  %2115 = vmatpush3.bf16.msra.mxu1 %v2211_v56 }
 0xc6b   : > { %2116 = vmatprep.subr.bf16.mxu1 %v2331_v15 }
 0xc6e   : > { %2117 = vmatpush3.bf16.msra.mxu1 %v2212_v57 }
 0xc6f   : > { %2118 = vmatprep.subr.bf16.mxu1 %v2331_v15 }
 0xc72   : > { %2119 = vmatpush3.bf16.msra.mxu1 %v2213_v58 }
 0xc73   : > { %2120 = vmatprep.subr.bf16.mxu1 %v2331_v15 }
 0xc76   : > { %2121 = vmatpush3.bf16.msra.mxu1 %v2214_v59 }
 0xc77   : > { %2122 = vmatprep.subr.bf16.mxu1 %v2331_v15 }
 0xc7a   : > { %2123 = vmatpush3.bf16.msra.mxu1 %v2215_v60 }
 0xc7b   : > { %2124 = vmatprep.subr.bf16.mxu1 %v2331_v15 }
 0xc7e   : > { %2125 = vmatpush3.bf16.msra.mxu1 %v2216_v61 }
 0xc7f   : > { %2126 = vmatprep.subr.bf16.mxu1 %v2331_v15 }
 0xc82   : > { %2127 = vmatpush3.bf16.msra.mxu1 %v2217_v62 }
 0xc83   : > { %2128 = vmatprep.subr.bf16.mxu1 %v2331_v15 }
 0xc86   : > { %2129 = vmatpush3.bf16.msra.mxu1 %v2218_v63 }
 0xd3c   : > { %v1548_v19 = vpop.f32.mrb[28].mxu1 }
 0xd3d   : > { %v2672_v20 = vadd.f32 %v1548_v19, %v1492_v28  ;;  %v2104_v23 = vpop.f32.mrb[29].mxu1 }
 0xd3e   : > { %v1551_v24 = vpop.f32.mrb[30].mxu1  ;;  %v1919_v23 = vld [vmem:[%s2802_s12] ss:$0 sm:$0xff] }
 0xd3f   : > { %v2674_v25 = vadd.f32 %v1551_v24, %v1493_v18  ;;  %v2105_v26 = vpop.f32.mrb[31].mxu1  ;;  %v1557_v27 = vsel %vm445_vm0, %v2672_v20, 0.0  ;;  %v1609_v24 = vadd.f32 %v1919_v23, %v2672_v20 }
 0xd40   : > { %1558 = vadd.xlane.f32.xlu1 %v1557_v27 }
 0xd41   : > { %v1560_v29 = vsel %vm445_vm0, %v2674_v25, 0.0 }
 0xd42   : > { %1561 = vadd.xlane.f32.xlu0 %v1560_v29 }
 0xdcd   : > { %v1559_v30 = vpop.xlane.xlu1 %1558 }
 0xdce   : > { %v1563_v0 = vmul.f32 0.03125, %v1559_v30  ;;  %v1610_v30 = vadd.f32 %v1919_v23, %v2674_v25 }
 0xdcf   : > { %v1562_v31 = vpop.xlane.xlu0 %1561 }
 0xdd0   : > { %v1565_v1 = vsub.f32 %v2672_v20, %v1563_v0  ;;  %v1564_v33 = vmul.f32 0.03125, %v1562_v31 }
 0xdd2   : > { %v1566_v34 = vsub.f32 %v2674_v25, %v1564_v33  ;;  %v1567_v35 = vmul.f32 %v1565_v1, %v1565_v1 }
 0xdd4   : > { %v1569_v36 = vsel %vm445_vm0, %v1567_v35, 0.0  ;;  %v1568_v37 = vmul.f32 %v1566_v34, %v1566_v34 }
 0xdd5   : > { %1570 = vadd.xlane.f32.xlu0 %v1569_v36 }
 0xdd6   : > { %v1572_v38 = vsel %vm445_vm0, %v1568_v37, 0.0 }
 0xdd9   : > { %1573 = vadd.xlane.f32.xlu0 %v1572_v38 }
 0xe62   : > { %v1571_v21 = vpop.xlane.xlu0 %1570 }
 0xe63   : > { %v1575_v22 = vmul.f32 0.03125, %v1571_v21 }
 0xe65   : > { %v1577_v40 = vadd.f32 1e-05, %v1575_v22 }
 0xe66   : > { %v1574_v41 = vpop.xlane.xlu0 %1573 }
 0xe67   : > { %2255 = vrsqrt.f32 %v1577_v40  ;;  %v1576_v43 = vmul.f32 0.03125, %v1574_v41 }
 0xe69   : > { %v1578_v44 = vadd.f32 1e-05, %v1576_v43 }
 0xe6b   : > { %2257 = vrsqrt.f32 %v1578_v44 }
 0xe71   : > { %v2256_v45 = vpop.eup %2255 }
 0xe72   : > { %v1581_v46 = vmul.f32 %v2256_v45, %v1565_v1 }
 0xe74   : > { %v1590_v51 = vmul.f32 %v1917_v48, %v1581_v46 }
 0xe75   : > { %v2258_v49 = vpop.eup %2257 }
 0xe76   : > { %v1582_v39 = vmul.f32 %v2258_v49, %v1566_v34  ;;  %v1599_v53 = vadd.f32 %v1918_v52, %v1590_v51 }
 0xe78   : > { %v1591_v50 = vmul.f32 %v1917_v48, %v1582_v39 }
 0xe7a   : > { %v1600_v54 = vadd.f32 %v1918_v52, %v1591_v50 }
 0xe7c   : > { %v1601_v55 = vpack.c.bf16 %v1600_v54, %v1599_v53 }
 0xe7e   : > { %2111 = vmatmul.mubr.msk.bf16.vlgmr.msra.gmra.mrb[40].mxu0 %vm445_vm0, %v1601_v55 }
 0xf51   : > { %v1671_v2 = vpop.f32.mrb[40].mxu0 }
 0xf52   : > { %v1672_v3 = vadd.f32 %v1920_v47, %v1671_v2  ;;  %v2112_v4 = vpop.f32.mrb[41].mxu0 }
 0xf53   : > { %v1674_v5 = vpop.f32.mrb[42].mxu0 }
 0xf54   : > { %v1924_v6 = vmul.f32 -1.702, %v1672_v3  ;;  %v1675_v7 = vadd.f32 %v1920_v47, %v1674_v5  ;;  %v2113_v8 = vpop.f32.mrb[43].mxu0 }
 0xf56   : > { %v1682_v9 = vmul.f32 1.442695, %v1924_v6  ;;  %v1925_v10 = vmul.f32 -1.702, %v1675_v7 }
 0xf58   : > { %2259 = vpow2.f32 %v1682_v9  ;;  %v1684_v15 = vmul.f32 1.442695, %v1925_v10 }
 0xf5a   : > { %2261 = vpow2.f32 %v1684_v15 }
 0xf62   : > { %v2260_v11 = vpop.eup %2259 }
 0xf63   : > { %v1686_v12 = vadd.f32 1.0, %v2260_v11 }
 0xf64   : > { %v2262_v13 = vpop.eup %2261 }
 0xf65   : > { %2263 = vrcp.f32 %v1686_v12  ;;  %v1687_v14 = vadd.f32 1.0, %v2262_v13 }
 0xf67   : > { %2265 = vrcp.f32 %v1687_v14 }
 0xf6f   : > { %v2264_v16 = vpop.eup %2263 }
 0xf70   : > { %v1692_v28 = vmul.f32 %v2264_v16, %v1672_v3 }
 0xf71   : > { %v2266_v32 = vpop.eup %2265 }
 0xf72   : > { %v1693_v18 = vmul.f32 %v2266_v32, %v1675_v7 }
 0xf74   : > { %v1694_v19 = vpack.c.bf16 %v1693_v18, %v1692_v28 }
 0xf76   : > { %2131 = vmatmul.mubr.bf16.vlgmr.msra.gmra.mrb[32].mxu1 %v1694_v19 }
0x1049   : > { %v1793_v26 = vpop.f32.mrb[32].mxu1 }
0x104a   : > { %v1800_v27 = vadd.f32 %v1793_v26, %v1609_v24  ;;  %v2132_v29 = vpop.f32.mrb[33].mxu1 }
0x104b   : > { %v1796_v0 = vpop.f32.mrb[34].mxu1 }
0x104c   : > { %1802 = vst.msk [vmem:[%s434_s24] sm:$0xff] %vm445_vm0, %v1800_v27  ;;  %v1801_v31 = vadd.f32 %v1796_v0, %v1610_v30  ;;  %v2133_v1 = vpop.f32.mrb[35].mxu1 }
0x104e   : > { %1803 = vst.msk [vmem:[%s434_s24 + $0x8] sm:$0xff] %vm445_vm0, %v1801_v31 }
0x104f   : > { %2280 = shalt.err (!%p2277_p3)
}
0x1050   : > { %s2281_s22 = scalar_lea.hbm %s2745_s21, 256  ;;  %s2285_s0 = scalar_lea.hbm %s2803_s13, 512 }
0x1051   : > { %p2282_p4 = scmp.ne.s32.totalorder %s2745_s21, %s2281_s22  ;;  %p2286_p9 = scmp.lt.u32.totalorder %s2745_s21, %s2803_s13 }
0x1052   : > { %p2287_p10 = scmp.lt.u32.totalorder %s2285_s0, %s2281_s22  ;;  %p2289_p12 = scmp.lt.u32.totalorder %s2281_s22, %s2745_s21 }
0x1053   : > { %p2283_p7 = pnand %p2282_p4, %p2457_p5 }
0x1054   : > { %p2288_p11 = por %p2287_p10, %p2286_p9 }
0x1055   : > { %p2284_p8 = pneg %p2283_p7 }
0x1056   : > { %p2290_p13 = por %p2289_p12, %p2288_p11 }
0x1058   : > { %p2291_p0 = pnand %p2290_p13, %p2284_p8 }
0x105a   : > { %2294 = shalt.err (!%p2291_p0)
}
0x105b   : > { %s2348_s2 = smov 128   ;;  %s2813_s20 = smov 8  }
0x105c   : > { %2134 = dma.vmem_to_hbm [thread:$0]  (%p2457_p5), %s2739_s30, 256, %s2745_s21, %s2748_s29, %s2348_s2, %s2348_s2, %s2813_s20  }
0x105d PF: > { %p2140_p1 = scmp.ge.s32.totalorder %s2329_s28, 2  ;;  %s1833_s23 = sand.u32 1, %s2317_s25  }
0x105e   : > { %s1834_s22 = scalar_lea.sflag [#allocation4], %s1833_s23 }
0x105f   : > { %p2137_p2 = pnand %p2140_p1, %p2461_p6 }
0x1061   : > { %2312 = dma.done.wait (!%p2137_p2), %s1834_s22, 256  }
0x1062   : > { %2314 = vsyncadd (!%p2137_p2), %s1834_s22, 4294967040  ;;  %p23_p3 = scmp.ge.s32.totalorder %s2444_s14, 4   ;;  %s2814_s25 = smov %s2321_s26 }
0x1063   : > { %s2815_s26 = smov %s2325_s27  ;;  %s2816_s27 = smov %s2455_s17 }
0x1064   : > { %s2817_s28 = smov %s2444_s14  ;;  %25 = sbr.rel (!%p23_p3) target bundleno = 7 (0x7), region = 107 }
0x106b   :  { %1839 = vsyncpa [#allocation4], 1 }
0x106c   :  { %1841 = vsyncpa [#allocation4 + $0x1], 1 }

// kernel: tpu_custom_call.1
= control target key start
LH: loop header
LB: loop body
LE: loop exit
PB: predicated region body
PF: predicated region fallthrough
CT: control target
= control target key end

     0   :  { %s2790_s0 = inlined_call_operand.vmem [shape: f32[4,8,32], index: 0, kind: input, shape index: {}]   ;;  %s2791_s1 = inlined_call_operand.vmem [shape: f32[1,32], index: 1, kind: input, shape index: {}]   ;;  %s2792_s2 = inlined_call_operand.vmem [shape: f32[1,32], index: 2, kind: input, shape index: {}]   ;;  %s2793_s3 = inlined_call_operand.vmem [shape: bf16[32,96], index: 3, kind: input, shape index: {}]   ;;  %s2794_s4 = inlined_call_operand.vmem [shape: f32[1,96], index: 4, kind: input, shape index: {}]   ;;  %s2795_s5 = inlined_call_operand.vmem [shape: bf16[32,32], index: 5, kind: input, shape index: {}]   ;;  %s2796_s6 = inlined_call_operand.vmem [shape: f32[1,32], index: 6, kind: input, shape index: {}]   ;;  %s2797_s7 = inlined_call_operand.vmem [shape: f32[1,32], index: 7, kind: input, shape index: {}]   ;;  %s2798_s8 = inlined_call_operand.vmem [shape: f32[1,32], index: 8, kind: input, shape index: {}]   ;;  %s2799_s9 = inlined_call_operand.vmem [shape: bf16[32,128], index: 9, kind: input, shape index: {}]   ;;  %s2800_s10 = inlined_call_operand.vmem [shape: f32[1,128], index: 10, kind: input, shape index: {}]   ;;  %s2801_s11 = inlined_call_operand.vmem [shape: bf16[128,32], index: 11, kind: input, shape index: {}]   ;;  %s2802_s12 = inlined_call_operand.vmem [shape: f32[1,32], index: 12, kind: input, shape index: {}]   ;;  %s2803_s13 = inlined_call_operand.hbm [shape: f32[4,8,32], index: 13, kind: output, shape index: {}]  }
   0x1   :  { %2805 = sst [smem:[#allocation6_spill]] %s2790_s0 }
   0x2   :  { %2806 = sst [smem:[#allocation7_spill]] %s2791_s1 }
   0x3   :  { %2807 = sst [smem:[#allocation8_spill]] %s2792_s2 }
   0x4   :  { %18 = vsyncpa [#allocation4], 0 }
   0x5   :  { %20 = vsyncpa [#allocation4 + $0x1], 0  ;;  %s2419_s25 = smov 0   ;;  %s2421_s26 = smov 0  }
   0x6   :  { %s2423_s27 = smov 0   ;;  %s2425_s28 = smov 0  }
   0x7 LB: > { %s2440_s29 = sadd.s32 4294967295, %s2329_s28   ;;  %s1880_s30 = sadd.s32 4294967294, %s2329_s28   ;;  %s2329_s28 = sphi %s2425_s28, %s2817_s28   ;;  %s2325_s27 = sphi %s2423_s27, %s2816_s27   ;;  %s2321_s26 = sphi %s2421_s26, %s2815_s26   ;;  %s2317_s25 = sphi %s2419_s25, %s2814_s25  }
   0x8   : > { %s2444_s14 = sadd.s32 1, %s2329_s28   ;;  %s311_s15 = sadd.s32 1, %s2325_s27 }
   0x9   : > { %s308_s16 = ssub.s32 %s2329_s28, %s2444_s14  ;;  %p321_p0 = scmp.ne.s32.totalorder %s2325_s27, %s2321_s26 }
   0xa   : > { %p309_p1 = scmp.eq.s32.totalorder %s308_s16, 0  ;;  %p322_p2 = scmp.eq.s32.totalorder %s2440_s29, 1 }
   0xb   : > { %p327_p3 = scmp.ne.s32.totalorder %s2321_s26, %s2317_s25  ;;  %p328_p4 = scmp.eq.s32.totalorder %s1880_s30, 1 }
   0xc   : > { %s2455_s17 = scalar_select %p309_p1, %s2325_s27, %s311_s15  }
   0xd   : > { %p2457_p5 = por %p322_p2, %p321_p0  ;;  %p2461_p6 = por %p328_p4, %p327_p3 }
   0xe   : > { %p1883_p7 = scmp.ge.s32.totalorder %s2329_s28, 1  ;;  %p391_p8 = scmp.lt.s32.totalorder %s2329_s28, 3 }
  0x10   : > { %p392_p9 = pnand %p1883_p7, %p391_p8 }
  0x11   : > { %s1885_s20 = sshll.u32 (!%p392_p9), %s2440_s29, 1  ;;  %vm445_vm0 = vcmask (!%p392_p9), 261120   ;;  %s2810_s0 = sld [smem:[#allocation6_spill]] (!%p392_p9)  ;;  %v2205_v14 = vld [vmem:[%s2793_s3] sm:$0xff] (!%p392_p9)   ;;  %v2331_v15 = vmov (!%p392_p9), 0.0   ;;  %v2206_v16 = vld [vmem:[%s2793_s3 + $0x8] sm:$0xff] (!%p392_p9)  }
  0x12   : > { %395 = sbr.rel (%p392_p9) target bundleno = 4189 (0x105d), region = 72  ;;  %p436_p10 = scmp.lt.s32.totalorder (!%p392_p9), %s1885_s20, 3  ;;  %1994 = vmatprep.subr.bf16.mxu0 (!%p392_p9), %v2331_v15  ;;  %2014 = vmatprep.subr.bf16.mxu1 (!%p392_p9), %v2331_v15  ;;  %vm2332_vm1 = vmmov (!%p392_p9), 0   ;;  %v1889_v34 = vld [vmem:[%s2794_s4] ss:$0 sm:$0xff] (!%p392_p9)  ;;  %vm574_vm2 = vcmask (!%p392_p9), 64512  }
  0x13   : > { %1995 = vmatpush3.bf16.msra.mxu0 (!%p392_p9), %v2205_v14  ;;  %1998 = vmatprep.mubr.msk.bf16.mxu0 (!%p392_p9), %vm2332_vm1, %v2331_v15  ;;  %s2811_s1 = sld [smem:[#allocation7_spill]] (!%p392_p9)  ;;  %s2812_s2 = sld [smem:[#allocation8_spill]] (!%p392_p9)  ;;  %vm699_vm3 = vcmask (!%p392_p9), 1043456   ;;  %vm1477_vm4 = vcmask (!%p392_p9), 130048   ;;  %vm1480_vm5 = vcmask (!%p392_p9), 195584  }
  0x14   : > { %1996 = vmatprep.subr.bf16.mxu0 (!%p392_p9), %v2331_v15  ;;  %2016 = vmatprep.mubr.msk.bf16.mxu1 (!%p392_p9), %vm2332_vm1, %v2331_v15  ;;  %s2333_s16 = smov (!%p392_p9), 96   ;;  %s2336_s22 = smov (!%p392_p9), 120  }
  0x15   : > { %s2337_s23 = smov (!%p392_p9), 56   ;;  %s2339_s30 = smov (!%p392_p9), 112  }
  0x16   : > { %s2340_s15 = smov (!%p392_p9), 48  }
  0x17   : > { %1997 = vmatpush3.bf16.msra.mxu0 (!%p392_p9), %v2206_v16 }
  0x18   : > { %2002 = vmatprep.subr.bf16.mxu0 (!%p392_p9), %v2331_v15 }
  0x19   : > { %s2819_s20 = smov (!%p436_p10, %s1885_s20), 3  ;;  %v1887_v25 = vld [vmem:[%s2811_s1] ss:$0 sm:$0xff] }
  0x1a   : > { %s1886_s21 = sshll.u32 %s2819_s20, 3  ;;  %v1888_v29 = vld [vmem:[%s2812_s2] ss:$0 sm:$0xff]  ;;  %s2334_s20 = smov 64  }
  0x1b   : > { %s439_s24 = scalar_lea.vmem %s2810_s0, %s1886_s21  ;;  %s2335_s21 = smov 88  }
  0x1c   : > { %v2471_v0 = vld [vmem:[%s439_s24] sm:$0xff]  ;;  %v2473_v1 = vld [vmem:[%s439_s24 + $0x8] sm:$0xff]  ;;  %s2338_s24 = smov 80   ;;  %s2347_s0 = smov [#allocation3]  }
  0x1d   : > { %v446_v2 = vsel %vm445_vm0, %v2471_v0, 0.0  ;;  %v449_v3 = vsel %vm445_vm0, %v2473_v1, 0.0  ;;  %s2271_s1 = sshll.u32 %s2347_s0, 4  ;;  %s2272_s1 = int_to_ptr.vmem [resolvable:$false] %s2271_s1 }
  0x1e   : > { %447 = vadd.xlane.f32.xlu0 %v446_v2  ;;  %s2273_s2 = scalar_lea.vmem %s2272_s1, 512 }
  0x22   : > { %450 = vadd.xlane.f32.xlu0 %v449_v3 }
  0xab   : > { %v448_v4 = vpop.xlane.xlu0 %447 }
  0xac   : > { %v453_v5 = vmul.f32 0.03125, %v448_v4 }
  0xae   : > { %v455_v6 = vsub.f32 %v2471_v0, %v453_v5 }
  0xaf   : > { %v451_v7 = vpop.xlane.xlu0 %450 }
  0xb0   : > { %v454_v8 = vmul.f32 0.03125, %v451_v7  ;;  %v457_v9 = vmul.f32 %v455_v6, %v455_v6 }
  0xb2   : > { %v456_v10 = vsub.f32 %v2473_v1, %v454_v8  ;;  %v459_v11 = vsel %vm445_vm0, %v457_v9, 0.0 }
  0xb3   : > { %460 = vadd.xlane.f32.xlu1 %v459_v11 }
  0xb4   : > { %v458_v12 = vmul.f32 %v456_v10, %v456_v10 }
  0xb6   : > { %v462_v13 = vsel %vm445_vm0, %v458_v12, 0.0 }
  0xb7   : > { %463 = vadd.xlane.f32.xlu1 %v462_v13 }
 0x140   : > { %v461_v17 = vpop.xlane.xlu1 %460 }
 0x141   : > { %v465_v18 = vmul.f32 0.03125, %v461_v17 }
 0x143   : > { %v467_v19 = vadd.f32 1e-05, %v465_v18 }
 0x144   : > { %v464_v20 = vpop.xlane.xlu1 %463 }
 0x145   : > { %2219 = vrsqrt.f32 %v467_v19  ;;  %v466_v21 = vmul.f32 0.03125, %v464_v20 }
 0x147   : > { %v468_v22 = vadd.f32 1e-05, %v466_v21 }
 0x149   : > { %2221 = vrsqrt.f32 %v468_v22 }
 0x14f   : > { %v2220_v23 = vpop.eup %2219 }
 0x150   : > { %v471_v24 = vmul.f32 %v2220_v23, %v455_v6 }
 0x152   : > { %v480_v28 = vmul.f32 %v1887_v25, %v471_v24 }
 0x153   : > { %v2222_v26 = vpop.eup %2221 }
 0x154   : > { %v472_v27 = vmul.f32 %v2222_v26, %v456_v10  ;;  %v489_v31 = vadd.f32 %v1888_v29, %v480_v28 }
 0x156   : > { %v481_v30 = vmul.f32 %v1887_v25, %v472_v27 }
 0x158   : > { %v490_v32 = vadd.f32 %v1888_v29, %v481_v30 }
 0x15a   : > { %v491_v33 = vpack.c.bf16 %v490_v32, %v489_v31 }
 0x15c   : > { %1999 = vmatmul.mubr.msk.bf16.vlgmr.msra.gmra.mrb[0].mxu0 %vm445_vm0, %v491_v33 }
 0x15d   : > { %2004 = vmatprep.mubr.msk.bf16.mxu0 %vm2332_vm1, %v2331_v15 }
 0x22f   : > { %v552_v35 = vpop.f32.mrb[0].mxu0 }
 0x230   : > { %v553_v36 = vadd.f32 %v1889_v34, %v552_v35  ;;  %v2000_v37 = vpop.f32.mrb[1].mxu0 }
 0x231   : > { %v555_v38 = vpop.f32.mrb[2].mxu0 }
 0x232   : > { %v2509_v39 = vpack.c.bf16 %v553_v36, %v553_v36  ;;  %v556_v40 = vadd.f32 %v1889_v34, %v555_v38  ;;  %v2001_v41 = vpop.f32.mrb[3].mxu0  ;;  %v559_v45 = vmul.f32 0.35355338, %v553_v36 }
 0x234   : > { %v2511_v42 = vpack.c.bf16 %v556_v40, %v556_v40  ;;  %572 = vrot.lane.b32.xlu0 %v2509_v39, %s2333_s16  ;;  %v2517_v47 = vpack.c.bf16 %v559_v45, %v559_v45  ;;  %v560_v49 = vmul.f32 0.35355338, %v556_v40 }
 0x236   : > { %622 = vrot.lane.b32.xlu1 %v2511_v42, %s2333_s16  ;;  %v2525_v50 = vpack.c.bf16 %v560_v49, %v560_v49  ;;  %s2341_s16 = smov 72  }
 0x2a6   : > { %v573_v43 = vpop.permute.xlu0 %572 }
 0x2a7   : > { %v579_v44 = vsel %vm574_vm2, %v573_v43, 0 }
 0x2a8   : > { %2003 = vmatpush3.bf16.xpose.msra.mxu0 %v579_v44  ;;  %v623_v46 = vpop.permute.xlu1 %622 }
 0x2a9   : > { %2008 = vmatprep.subr.bf16.mxu0 %v2331_v15  ;;  %v628_v48 = vsel %vm574_vm2, %v623_v46, 0 }
 0x2af   : > { %2005 = vmatmul.mubr.msk.bf16.vlgmr.msra.gmra.mrb[4].mxu0 %vm574_vm2, %v2517_v47 }
 0x2b0   : > { %2009 = vmatpush3.bf16.xpose.msra.mxu0 %v628_v48  ;;  %2010 = vmatprep.mubr.msk.bf16.mxu0 %vm2332_vm1, %v2331_v15 }
 0x2b1   : > { %2020 = vmatprep.subr.bf16.mxu0 %v2331_v15 }
 0x2b7   : > { %2011 = vmatmul.mubr.msk.bf16.vlgmr.msra.gmra.mrb[8].mxu0 %vm574_vm2, %v2525_v50 }
 0x2b8   : > { %2022 = vmatprep.mubr.msk.bf16.mxu0 %vm2332_vm1, %v2331_v15 }
 0x382   : > { %v615_v51 = vpop.f32.mrb[4].mxu0 }
 0x383   : > { %v2006_v52 = vpop.f32.mrb[5].mxu0  ;;  %v670_v53 = vsel %vm574_vm2, %v615_v51, -inf }
 0x384   : > { %671 = vmax.xlane.f32.xlu1 %v670_v53  ;;  %v618_v54 = vpop.f32.mrb[6].mxu0 }
 0x385   : > { %v2007_v55 = vpop.f32.mrb[7].mxu0 }
 0x38a   : > { %v664_v56 = vpop.f32.mrb[8].mxu0 }
 0x38b   : > { %v2012_v57 = vpop.f32.mrb[9].mxu0  ;;  %v673_v58 = vsel %vm574_vm2, %v664_v56, -inf }
 0x38c   : > { %674 = vmax.xlane.f32.xlu0 %v673_v58  ;;  %v667_v59 = vpop.f32.mrb[10].mxu0 }
 0x38d   : > { %v2013_v60 = vpop.f32.mrb[11].mxu0 }
 0x395   : > { %743 = vrot.lane.b32.xlu1 %v2511_v42, %s2334_s20 }
 0x399   : > { %793 = vrot.lane.b32.xlu1 %v2509_v39, %s2335_s21 }
 0x411   : > { %v672_v61 = vpop.xlane.xlu1 %671 }
 0x412   : > { %v676_v62 = vsub.f32 %v615_v51, %v672_v61 }
 0x414   : > { %v678_v63 = vmul.f32 1.442695, %v676_v62 }
 0x415   : > { %v744_v2 = vpop.permute.xlu1 %743 }
 0x416   : > { %2223 = vpow2.f32 %v678_v63  ;;  %v749_v3 = vsel %vm699_vm3, %v744_v2, 0 }
 0x417   : > { %2021 = vmatpush3.bf16.msra.mxu0 %v749_v3 }
 0x418   : > { %2032 = vmatprep.subr.bf16.mxu0 %v2331_v15 }
 0x419   : > { %v675_v4 = vpop.xlane.xlu0 %674  ;;  %v794_v12 = vpop.permute.xlu1 %793 }
 0x41a   : > { %v677_v5 = vsub.f32 %v664_v56, %v675_v4  ;;  %v799_v20 = vsel %vm574_vm2, %v794_v12, 0 }
 0x41c   : > { %v680_v6 = vmul.f32 1.442695, %v677_v5 }
 0x41e   : > { %2225 = vpow2.f32 %v680_v6 }
 0x420   : > { %v2224_v7 = vpop.eup %2223 }
 0x421   : > { %v682_v8 = vsel %vm574_vm2, %v2224_v7, 0.0 }
 0x422   : > { %683 = vadd.xlane.f32.xlu0 %v682_v8 }
 0x428   : > { %v2226_v9 = vpop.eup %2225 }
 0x429   : > { %v685_v10 = vsel %vm574_vm2, %v2226_v9, 0.0 }
 0x42a   : > { %686 = vadd.xlane.f32.xlu1 %v685_v10 }
 0x438   : > { %694 = vrot.lane.b32.xlu0 %v2509_v39, %s2334_s20  ;;  %s2342_s20 = smov 104  }
 0x43b   : > { %843 = vrot.lane.b32.xlu1 %v2511_v42, %s2335_s21  ;;  %s2343_s21 = smov 40  }
 0x43c   : > { %791 = vrot.lane.b32.xlu0 %v2517_v47, %s2336_s22 }
 0x43f   : > { %841 = vrot.lane.b32.xlu1 %v2525_v50, %s2336_s22  ;;  %s2804_s22 = smov 8  }
 0x4af   : > { %v684_v11 = vpop.xlane.xlu0 %683 }
 0x4b0   : > { %2227 = vrcp.f32 %v684_v11 }
 0x4b3   : > { %v695_v13 = vpop.permute.xlu0 %694 }
 0x4b4   : > { %v701_v14 = vsel %vm699_vm3, %v695_v13, 0 }
 0x4b5   : > { %2015 = vmatpush3.bf16.msra.mxu1 %v701_v14 }
 0x4b6   : > { %2026 = vmatprep.subr.bf16.mxu1 %v2331_v15 }
 0x4b7   : > { %v687_v16 = vpop.xlane.xlu1 %686  ;;  %v792_v25 = vpop.permute.xlu0 %791 }
 0x4b8   : > { %2229 = vrcp.f32 %v687_v16 }
 0x4ba   : > { %v2228_v17 = vpop.eup %2227 }
 0x4bb   : > { %v690_v18 = vmul.f32 %v2228_v17, %v2224_v7  ;;  %v844_v23 = vpop.permute.xlu1 %843 }
 0x4bc   : > { %v849_v26 = vsel %vm574_vm2, %v844_v23, 0 }
 0x4bd   : > { %v692_v19 = vpack.c.bf16 %v690_v18, %v690_v18 }
 0x4bf   : > { %2017 = vmatmul.mubr.msk.bf16.vlgmr.msra.gmra.mrb[0].mxu1 %vm574_vm2, %v692_v19  ;;  %v842_v27 = vpop.permute.xlu1 %841 }
 0x4c0   : > { %2027 = vmatpush3.bf16.xpose.msra.mxu1 %v799_v20  ;;  %2028 = vmatprep.mubr.msk.bf16.mxu1 %vm2332_vm1, %v2331_v15 }
 0x4c1   : > { %2038 = vmatprep.subr.bf16.mxu1 %v2331_v15 }
 0x4c2   : > { %v2230_v21 = vpop.eup %2229 }
 0x4c3   : > { %v691_v22 = vmul.f32 %v2230_v21, %v2226_v9 }
 0x4c5   : > { %v693_v24 = vpack.c.bf16 %v691_v22, %v691_v22 }
 0x4c7   : > { %2023 = vmatmul.mubr.msk.bf16.vlgmr.msra.gmra.mrb[12].mxu0 %vm574_vm2, %v693_v24  ;;  %2029 = vmatmul.mubr.msk.bf16.vlgmr.msra.gmra.mrb[4].mxu1 %vm574_vm2, %v792_v25 }
 0x4c8   : > { %2033 = vmatpush3.bf16.xpose.msra.mxu0 %v849_v26  ;;  %2034 = vmatprep.mubr.msk.bf16.mxu0 %vm2332_vm1, %v2331_v15 }
 0x4c9   : > { %2044 = vmatprep.subr.bf16.mxu0 %v2331_v15  ;;  %2040 = vmatprep.mubr.msk.bf16.mxu1 %vm2332_vm1, %v2331_v15 }
 0x4cf   : > { %2035 = vmatmul.mubr.msk.bf16.vlgmr.msra.gmra.mrb[16].mxu0 %vm574_vm2, %v842_v27 }
 0x4d0   : > { %2046 = vmatprep.mubr.msk.bf16.mxu0 %vm2332_vm1, %v2331_v15 }
 0x592   : > { %v2561_v28 = vpop.f32.mrb[0].mxu1 }
 0x593   : > { %v2018_v29 = vpop.f32.mrb[1].mxu1 }
 0x594   : > { %v740_v30 = vpop.f32.mrb[2].mxu1 }
 0x595   : > { %v2019_v31 = vpop.f32.mrb[3].mxu1 }
 0x59a   : > { %v2563_v32 = vpop.f32.mrb[12].mxu0  ;;  %v835_v33 = vpop.f32.mrb[4].mxu1 }
 0x59b   : > { %v2024_v34 = vpop.f32.mrb[13].mxu0  ;;  %v2030_v35 = vpop.f32.mrb[5].mxu1  ;;  %v891_v36 = vsel %vm574_vm2, %v835_v33, -inf }
 0x59c   : > { %892 = vmax.xlane.f32.xlu0 %v891_v36  ;;  %v788_v37 = vpop.f32.mrb[14].mxu0  ;;  %v838_v38 = vpop.f32.mrb[6].mxu1 }
 0x59d   : > { %v2025_v40 = vpop.f32.mrb[15].mxu0  ;;  %v2031_v41 = vpop.f32.mrb[7].mxu1 }
 0x5a2   : > { %v885_v43 = vpop.f32.mrb[16].mxu0 }
 0x5a3   : > { %v2036_v44 = vpop.f32.mrb[17].mxu0  ;;  %v894_v45 = vsel %vm574_vm2, %v885_v43, -inf }
 0x5a4   : > { %895 = vmax.xlane.f32.xlu1 %v894_v45  ;;  %v888_v46 = vpop.f32.mrb[18].mxu0 }
 0x5a5   : > { %v2037_v48 = vpop.f32.mrb[19].mxu0 }
 0x5b5   : > { %963 = vrot.lane.b32.xlu1 %v2511_v42, %s2337_s23 }
 0x5b9   : > { %1013 = vrot.lane.b32.xlu1 %v2509_v39, %s2338_s24 }
 0x5bd   : > { %1063 = vrot.lane.b32.xlu1 %v2511_v42, %s2338_s24 }
 0x5c1   : > { %1061 = vrot.lane.b32.xlu1 %v2525_v50, %s2339_s30 }
 0x629   : > { %v893_v49 = vpop.xlane.xlu0 %892 }
 0x62a   : > { %v897_v51 = vsub.f32 %v835_v33, %v893_v49 }
 0x62c   : > { %v899_v52 = vmul.f32 1.442695, %v897_v51 }
 0x62e   : > { %2231 = vpow2.f32 %v899_v52 }
 0x631   : > { %v896_v53 = vpop.xlane.xlu1 %895 }
 0x632   : > { %v898_v54 = vsub.f32 %v885_v43, %v896_v53 }
 0x634   : > { %v901_v55 = vmul.f32 1.442695, %v898_v54 }
 0x635   : > { %v964_v56 = vpop.permute.xlu1 %963 }
 0x636   : > { %2233 = vpow2.f32 %v901_v55  ;;  %v969_v57 = vsel %vm699_vm3, %v964_v56, 0 }
 0x637   : > { %2045 = vmatpush3.bf16.msra.mxu0 %v969_v57 }
 0x638   : > { %v2232_v58 = vpop.eup %2231  ;;  %2056 = vmatprep.subr.bf16.mxu0 %v2331_v15 }
 0x639   : > { %v903_v59 = vsel %vm574_vm2, %v2232_v58, 0.0  ;;  %v1014_v7 = vpop.permute.xlu1 %1013 }
 0x63a   : > { %904 = vadd.xlane.f32.xlu0 %v903_v59  ;;  %v1019_v11 = vsel %vm574_vm2, %v1014_v7, 0 }
 0x63d   : > { %v1064_v10 = vpop.permute.xlu1 %1063 }
 0x63e   : > { %v1069_v13 = vsel %vm574_vm2, %v1064_v10, 0 }
 0x640   : > { %v2234_v60 = vpop.eup %2233 }
 0x641   : > { %v906_v61 = vsel %vm574_vm2, %v2234_v60, 0.0  ;;  %v1062_v16 = vpop.permute.xlu1 %1061 }
 0x642   : > { %907 = vadd.xlane.f32.xlu0 %v906_v61 }
 0x658   : > { %915 = vrot.lane.b32.xlu0 %v2509_v39, %s2337_s23  ;;  %s2345_s23 = smov 16  }
 0x65c   : > { %1011 = vrot.lane.b32.xlu0 %v2517_v47, %s2339_s30 }
 0x6c7   : > { %v905_v62 = vpop.xlane.xlu0 %904 }
 0x6c8   : > { %2235 = vrcp.f32 %v905_v62 }
 0x6cf   : > { %v908_v63 = vpop.xlane.xlu0 %907 }
 0x6d0   : > { %2237 = vrcp.f32 %v908_v63 }
 0x6d2   : > { %v2236_v2 = vpop.eup %2235 }
 0x6d3   : > { %v911_v3 = vmul.f32 %v2236_v2, %v2232_v58  ;;  %v916_v4 = vpop.permute.xlu0 %915 }
 0x6d4   : > { %v921_v5 = vsel %vm699_vm3, %v916_v4, 0 }
 0x6d5   : > { %2039 = vmatpush3.bf16.msra.mxu1 %v921_v5  ;;  %v913_v6 = vpack.c.bf16 %v911_v3, %v911_v3 }
 0x6d6   : > { %2050 = vmatprep.subr.bf16.mxu1 %v2331_v15 }
 0x6d7   : > { %v1012_v14 = vpop.permute.xlu0 %1011 }
 0x6d8   : > { %2041 = vmatmul.mubr.msk.bf16.vlgmr.msra.gmra.mrb[8].mxu1 %vm574_vm2, %v913_v6 }
 0x6d9   : > { %2052 = vmatprep.mubr.msk.bf16.mxu1 %vm2332_vm1, %v2331_v15 }
 0x6da   : > { %v2238_v8 = vpop.eup %2237 }
 0x6db   : > { %v912_v9 = vmul.f32 %v2238_v8, %v2234_v60 }
 0x6dd   : > { %v914_v12 = vpack.c.bf16 %v912_v9, %v912_v9 }
 0x6de   : > { %2051 = vmatpush3.bf16.xpose.msra.mxu1 %v1019_v11 }
 0x6df   : > { %2047 = vmatmul.mubr.msk.bf16.vlgmr.msra.gmra.mrb[20].mxu0 %vm574_vm2, %v914_v12  ;;  %2062 = vmatprep.subr.bf16.mxu1 %v2331_v15 }
 0x6e0   : > { %2057 = vmatpush3.bf16.xpose.msra.mxu0 %v1069_v13  ;;  %2058 = vmatprep.mubr.msk.bf16.mxu0 %vm2332_vm1, %v2331_v15 }
 0x6e1   : > { %2068 = vmatprep.subr.bf16.mxu0 %v2331_v15 }
 0x6e5   : > { %2053 = vmatmul.mubr.msk.bf16.vlgmr.msra.gmra.mrb[12].mxu1 %vm574_vm2, %v1012_v14 }
 0x6e6   : > { %2064 = vmatprep.mubr.msk.bf16.mxu1 %vm2332_vm1, %v2331_v15 }
 0x6e7   : > { %2059 = vmatmul.mubr.msk.bf16.vlgmr.msra.gmra.mrb[24].mxu0 %vm574_vm2, %v1062_v16 }
 0x6e8   : > { %2070 = vmatprep.mubr.msk.bf16.mxu0 %vm2332_vm1, %v2331_v15 }
 0x7ab   : > { %v2595_v17 = vpop.f32.mrb[8].mxu1 }
 0x7ac   : > { %v2042_v18 = vpop.f32.mrb[9].mxu1 }
 0x7ad   : > { %v960_v19 = vpop.f32.mrb[10].mxu1 }
 0x7ae   : > { %v2043_v20 = vpop.f32.mrb[11].mxu1 }
 0x7b2   : > { %v2597_v21 = vpop.f32.mrb[20].mxu0 }
 0x7b3   : > { %v2190_v22 = vpack.i.bf16 %v2597_v21, %v2595_v17  ;;  %v2048_v23 = vpop.f32.mrb[21].mxu0 }
 0x7b4   : > { %v1008_v24 = vpop.f32.mrb[22].mxu0 }
 0x7b5   : > { %v2049_v25 = vpop.f32.mrb[23].mxu0 }
 0x7b8   : > { %v1055_v26 = vpop.f32.mrb[12].mxu1 }
 0x7b9   : > { %v2054_v27 = vpop.f32.mrb[13].mxu1  ;;  %v1111_v29 = vsel %vm574_vm2, %v1055_v26, -inf }
 0x7ba   : > { %1112 = vmax.xlane.f32.xlu0 %v1111_v29  ;;  %v1058_v30 = vpop.f32.mrb[14].mxu1  ;;  %v1105_v31 = vpop.f32.mrb[24].mxu0 }
 0x7bb   : > { %v2055_v33 = vpop.f32.mrb[15].mxu1  ;;  %v2060_v34 = vpop.f32.mrb[25].mxu0  ;;  %v1114_v35 = vsel %vm574_vm2, %v1105_v31, -inf }
 0x7bc   : > { %1115 = vmax.xlane.f32.xlu1 %v1114_v35  ;;  %v1108_v36 = vpop.f32.mrb[26].mxu0 }
 0x7bd   : > { %v2061_v37 = vpop.f32.mrb[27].mxu0 }
 0x7cd   : > { %1183 = vrot.lane.b32.xlu1 %v2511_v42, %s2340_s15 }
 0x7d1   : > { %1233 = vrot.lane.b32.xlu1 %v2509_v39, %s2341_s16 }
 0x7d5   : > { %1283 = vrot.lane.b32.xlu1 %v2511_v42, %s2341_s16 }
 0x7d9   : > { %1281 = vrot.lane.b32.xlu1 %v2525_v50, %s2342_s20 }
 0x847   : > { %v1113_v38 = vpop.xlane.xlu0 %1112 }
 0x848   : > { %v1117_v40 = vsub.f32 %v1055_v26, %v1113_v38 }
 0x849   : > { %v1116_v41 = vpop.xlane.xlu1 %1115 }
 0x84a   : > { %v1119_v43 = vmul.f32 1.442695, %v1117_v40  ;;  %v1118_v44 = vsub.f32 %v1105_v31, %v1116_v41 }
 0x84c   : > { %2239 = vpow2.f32 %v1119_v43  ;;  %v1121_v45 = vmul.f32 1.442695, %v1118_v44 }
 0x84d   : > { %v1184_v46 = vpop.permute.xlu1 %1183 }
 0x84e   : > { %2241 = vpow2.f32 %v1121_v45  ;;  %v1189_v48 = vsel %vm699_vm3, %v1184_v46, 0 }
 0x84f   : > { %2069 = vmatpush3.bf16.msra.mxu0 %v1189_v48 }
 0x850   : > { %2080 = vmatprep.subr.bf16.mxu0 %v2331_v15 }
 0x851   : > { %v1234_v58 = vpop.permute.xlu1 %1233 }
 0x855   : > { %v1284_v63 = vpop.permute.xlu1 %1283 }
 0x856   : > { %v2240_v49 = vpop.eup %2239  ;;  %v1289_v3 = vsel %vm574_vm2, %v1284_v63, 0 }
 0x857   : > { %v1123_v51 = vsel %vm574_vm2, %v2240_v49, 0.0 }
 0x858   : > { %v2242_v52 = vpop.eup %2241  ;;  %1124 = vadd.xlane.f32.xlu0 %v1123_v51 }
 0x859   : > { %v1126_v50 = vsel %vm574_vm2, %v2242_v52, 0.0  ;;  %v1282_v5 = vpop.permute.xlu1 %1281 }
 0x85c   : > { %1127 = vadd.xlane.f32.xlu0 %v1126_v50 }
 0x872   : > { %1135 = vrot.lane.b32.xlu0 %v2509_v39, %s2340_s15  ;;  %s1943_s15 = sshll.u32 %s2440_s29, 8 }
 0x876   : > { %1231 = vrot.lane.b32.xlu0 %v2517_v47, %s2342_s20  ;;  %v1239_v47 = vsel %vm574_vm2, %v1234_v58, 0  ;;  %s2346_s20 = smov 24  }
 0x8e5   : > { %v1125_v53 = vpop.xlane.xlu0 %1124 }
 0x8e6   : > { %2243 = vrcp.f32 %v1125_v53 }
 0x8e9   : > { %v1128_v54 = vpop.xlane.xlu0 %1127 }
 0x8ea   : > { %2245 = vrcp.f32 %v1128_v54  ;;  %v2208_v54 = vld [vmem:[%s2795_s5 + $0x8] sm:$0xff]  }
 0x8ed   : > { %v1136_v55 = vpop.permute.xlu0 %1135 }
 0x8ee   : > { %v1141_v56 = vsel %vm699_vm3, %v1136_v55, 0 }
 0x8ef   : > { %2063 = vmatpush3.bf16.msra.mxu1 %v1141_v56 }
 0x8f0   : > { %v2244_v57 = vpop.eup %2243  ;;  %2074 = vmatprep.subr.bf16.mxu1 %v2331_v15 }
 0x8f1   : > { %v1131_v59 = vmul.f32 %v2244_v57, %v2240_v49  ;;  %v1232_v4 = vpop.permute.xlu0 %1231 }
 0x8f3   : > { %v1133_v60 = vpack.c.bf16 %v1131_v59, %v1131_v59 }
 0x8f4   : > { %v2246_v61 = vpop.eup %2245 }
 0x8f5   : > { %v1132_v62 = vmul.f32 %v2246_v61, %v2242_v52  ;;  %2065 = vmatmul.mubr.msk.bf16.vlgmr.msra.gmra.mrb[16].mxu1 %vm574_vm2, %v1133_v60  ;;  %v2207_v52 = vld [vmem:[%s2795_s5] sm:$0xff]  }
 0x8f6   : > { %2076 = vmatprep.mubr.msk.bf16.mxu1 %vm2332_vm1, %v2331_v15 }
 0x8f7   : > { %v1134_v2 = vpack.c.bf16 %v1132_v62, %v1132_v62 }
 0x8f8   : > { %2075 = vmatpush3.bf16.xpose.msra.mxu1 %v1239_v47 }
 0x8f9   : > { %2071 = vmatmul.mubr.msk.bf16.vlgmr.msra.gmra.mrb[28].mxu0 %vm574_vm2, %v1134_v2  ;;  %2086 = vmatprep.subr.bf16.mxu1 %v2331_v15 }
 0x8fa   : > { %2081 = vmatpush3.bf16.xpose.msra.mxu0 %v1289_v3  ;;  %2082 = vmatprep.mubr.msk.bf16.mxu0 %vm2332_vm1, %v2331_v15 }
 0x8fb   : > { %2092 = vmatprep.subr.bf16.mxu0 %v2331_v15 }
 0x8ff   : > { %2077 = vmatmul.mubr.msk.bf16.vlgmr.msra.gmra.mrb[20].mxu1 %vm574_vm2, %v1232_v4 }
 0x900   : > { %2088 = vmatprep.mubr.msk.bf16.mxu1 %vm2332_vm1, %v2331_v15 }
 0x901   : > { %2083 = vmatmul.mubr.msk.bf16.vlgmr.msra.gmra.mrb[32].mxu0 %vm574_vm2, %v1282_v5 }
 0x902   : > { %2094 = vmatprep.mubr.msk.bf16.mxu0 %vm2332_vm1, %v2331_v15 }
 0x9c8   : > { %v1177_v6 = vpop.f32.mrb[16].mxu1 }
 0x9c9   : > { %v2066_v7 = vpop.f32.mrb[17].mxu1 }
 0x9ca   : > { %v1180_v8 = vpop.f32.mrb[18].mxu1 }
 0x9cb   : > { %v2067_v9 = vpop.f32.mrb[19].mxu1 }
 0x9cc   : > { %v1225_v10 = vpop.f32.mrb[28].mxu0 }
 0x9cd   : > { %v2195_v11 = vpack.i.bf16 %v1225_v10, %v1177_v6  ;;  %v2072_v12 = vpop.f32.mrb[29].mxu0 }
 0x9ce   : > { %v1228_v13 = vpop.f32.mrb[30].mxu0 }
 0x9cf   : > { %v2073_v14 = vpop.f32.mrb[31].mxu0 }
 0x9d2   : > { %v1275_v16 = vpop.f32.mrb[20].mxu1 }
 0x9d3   : > { %v2078_v18 = vpop.f32.mrb[21].mxu1  ;;  %v1331_v19 = vsel %vm574_vm2, %v1275_v16, -inf }
 0x9d4   : > { %1332 = vmax.xlane.f32.xlu0 %v1331_v19  ;;  %v1278_v20 = vpop.f32.mrb[22].mxu1  ;;  %v1325_v23 = vpop.f32.mrb[32].mxu0 }
 0x9d5   : > { %v2079_v24 = vpop.f32.mrb[23].mxu1  ;;  %v2084_v25 = vpop.f32.mrb[33].mxu0  ;;  %v1334_v26 = vsel %vm574_vm2, %v1325_v23, -inf }
 0x9d6   : > { %1335 = vmax.xlane.f32.xlu1 %v1334_v26  ;;  %v1328_v27 = vpop.f32.mrb[34].mxu0 }
 0x9d7   : > { %v2085_v29 = vpop.f32.mrb[35].mxu0 }
 0x9e7   : > { %1403 = vrot.lane.b32.xlu1 %v2511_v42, %s2343_s21 }
 0x9eb   : > { %2191 = vrot.lane.b32.xlu1 %v2190_v22, %s2804_s22  ;;  %s432_s22 = sand.u32 1, %s2321_s26  }
 0x9ec   : > { %s2748_s29 = scalar_lea.sflag [#allocation4], %s432_s22 }
 0x9ef   : > { %2196 = vrot.lane.b32.xlu1 %v2195_v11, %s2345_s23 }
 0xa61   : > { %v1333_v30 = vpop.xlane.xlu0 %1332 }
 0xa62   : > { %v1337_v31 = vsub.f32 %v1275_v16, %v1333_v30 }
 0xa63   : > { %v1336_v33 = vpop.xlane.xlu1 %1335 }
 0xa64   : > { %v1339_v34 = vmul.f32 1.442695, %v1337_v31  ;;  %v1338_v35 = vsub.f32 %v1325_v23, %v1336_v33 }
 0xa66   : > { %2247 = vpow2.f32 %v1339_v34  ;;  %v1341_v36 = vmul.f32 1.442695, %v1338_v35 }
 0xa67   : > { %v1404_v37 = vpop.permute.xlu1 %1403 }
 0xa68   : > { %2249 = vpow2.f32 %v1341_v36  ;;  %v1409_v38 = vsel %vm699_vm3, %v1404_v37, 0 }
 0xa69   : > { %2093 = vmatpush3.bf16.msra.mxu0 %v1409_v38 }
 0xa6a   : > { %2106 = vmatprep.subr.bf16.mxu0 %v2331_v15 }
 0xa6b   : > { %v2192_v62 = vpop.permute.xlu1 %2191 }
 0xa6c   : > { %v2194_v47 = vunpack.i.h.bf16 %v2192_v62  ;;  %v2193_v2 = vunpack.i.l.bf16 %v2192_v62  ;;  %v2217_v62 = vld [vmem:[%s2801_s11 + $0x30] sm:$0xff]  }
 0xa6e   : > { %v1476_v6 = vsel %vm574_vm2, %v2563_v32, %v2194_v47  ;;  %v1475_v7 = vsel %vm574_vm2, %v2561_v28, %v2193_v2  ;;  %v1913_v32 = vld [vmem:[%s2796_s6] ss:$0 sm:$0xff] }
 0xa6f   : > { %v2197_v63 = vpop.permute.xlu1 %2196  ;;  %v1492_v28 = vadd.f32 %v1913_v32, %v2471_v0  ;;  %v1493_v18 = vadd.f32 %v1913_v32, %v2473_v1  ;;  %v1920_v47 = vld [vmem:[%s2800_s10] ss:$0 sm:$0xff] }
 0xa70   : > { %v2248_v42 = vpop.eup %2247  ;;  %v2199_v3 = vunpack.i.h.bf16 %v2197_v63  ;;  %v2198_v4 = vunpack.i.l.bf16 %v2197_v63  ;;  %v2218_v63 = vld [vmem:[%s2801_s11 + $0x38] sm:$0xff]  }
 0xa71   : > { %v1343_v17 = vsel %vm574_vm2, %v2248_v42, 0.0 }
 0xa72   : > { %v2250_v21 = vpop.eup %2249  ;;  %1344 = vadd.xlane.f32.xlu0 %v1343_v17  ;;  %v1478_v10 = vsel %vm1477_vm4, %v1475_v7, %v2198_v4  ;;  %v1479_v11 = vsel %vm1477_vm4, %v1476_v6, %v2199_v3  ;;  %v2210_v17 = vld [vmem:[%s2799_s9 + $0x8] sm:$0xff]  }
 0xa73   : > { %v1346_v22 = vsel %vm574_vm2, %v2250_v21, 0.0 }
 0xa76   : > { %1347 = vadd.xlane.f32.xlu0 %v1346_v22 }
 0xa8c   : > { %1355 = vrot.lane.b32.xlu0 %v2509_v39, %s2343_s21  ;;  %s2745_s21 = scalar_lea.hbm %s2803_s13, %s1943_s15 }
 0xaff   : > { %v1345_v40 = vpop.xlane.xlu0 %1344 }
 0xb00   : > { %2251 = vrcp.f32 %v1345_v40 }
 0xb03   : > { %v1348_v41 = vpop.xlane.xlu0 %1347 }
 0xb04   : > { %2253 = vrcp.f32 %v1348_v41 }
 0xb07   : > { %v1356_v43 = vpop.permute.xlu0 %1355 }
 0xb08   : > { %v1361_v44 = vsel %vm699_vm3, %v1356_v43, 0 }
 0xb09   : > { %2087 = vmatpush3.bf16.msra.mxu1 %v1361_v44 }
 0xb0a   : > { %v2252_v45 = vpop.eup %2251  ;;  %2098 = vmatprep.subr.bf16.mxu1 %v2331_v15 }
 0xb0b   : > { %v1351_v46 = vmul.f32 %v2252_v45, %v2248_v42  ;;  %v2209_v42 = vld [vmem:[%s2799_s9] sm:$0xff]  }
 0xb0d   : > { %v1353_v48 = vpack.c.bf16 %v1351_v46, %v1351_v46 }
 0xb0e   : > { %v2254_v49 = vpop.eup %2253 }
 0xb0f   : > { %v1352_v51 = vmul.f32 %v2254_v49, %v2250_v21  ;;  %2089 = vmatmul.mubr.msk.bf16.vlgmr.msra.gmra.mrb[24].mxu1 %vm574_vm2, %v1353_v48  ;;  %v1917_v48 = vld [vmem:[%s2797_s7] ss:$0 sm:$0xff] }
 0xb10   : > { %2102 = vmatprep.mubr.msk.bf16.mxu1 %vm2332_vm1, %v2331_v15  ;;  %2099 = vmatpush3.bf16.msra.mxu1 %v2207_v52  ;;  %v1918_v52 = vld [vmem:[%s2798_s8] ss:$0 sm:$0xff] }
 0xb11   : > { %v1354_v39 = vpack.c.bf16 %v1352_v51, %v1352_v51  ;;  %2100 = vmatprep.subr.bf16.mxu1 %v2331_v15 }
 0xb13   : > { %2095 = vmatmul.mubr.msk.bf16.vlgmr.msra.gmra.mrb[36].mxu0 %vm574_vm2, %v1354_v39 }
 0xb14   : > { %2110 = vmatprep.mubr.msk.bf16.mxu0 %vm2332_vm1, %v2331_v15  ;;  %2101 = vmatpush3.bf16.msra.mxu1 %v2208_v54 }
 0xb15   : > { %2114 = vmatprep.subr.bf16.mxu1 %v2331_v15  ;;  %2107 = vmatpush3.bf16.msra.mxu0 %v2209_v42 }
 0xb16   : > { %2108 = vmatprep.subr.bf16.mxu0 %v2331_v15 }
 0xb19   : > { %2109 = vmatpush3.bf16.msra.mxu0 %v2210_v17 }
 0xbe2   : > { %v1397_v50 = vpop.f32.mrb[24].mxu1 }
 0xbe3   : > { %v2090_v53 = vpop.f32.mrb[25].mxu1 }
 0xbe4   : > { %v1400_v55 = vpop.f32.mrb[26].mxu1 }
 0xbe5   : > { %v2091_v56 = vpop.f32.mrb[27].mxu1 }
 0xbe6   : > { %v1445_v57 = vpop.f32.mrb[36].mxu0  ;;  %v2211_v56 = vld [vmem:[%s2801_s11] sm:$0xff]  }
 0xbe7   : > { %v2200_v58 = vpack.i.bf16 %v1445_v57, %v1397_v50  ;;  %v2096_v59 = vpop.f32.mrb[37].mxu0  ;;  %v2212_v57 = vld [vmem:[%s2801_s11 + $0x8] sm:$0xff]  }
 0xbe8   : > { %v1448_v60 = vpop.f32.mrb[38].mxu0  ;;  %v2214_v59 = vld [vmem:[%s2801_s11 + $0x18] sm:$0xff]  }
 0xbe9   : > { %2201 = vrot.lane.b32.xlu0 %v2200_v58, %s2346_s20  ;;  %v2097_v61 = vpop.f32.mrb[39].mxu0  ;;  %v2213_v58 = vld [vmem:[%s2801_s11 + $0x10] sm:$0xff]   ;;  %v2215_v60 = vld [vmem:[%s2801_s11 + $0x20] sm:$0xff]   ;;  %s1884_s20 = sshll.u32 %s432_s22, 4 }
 0xbea   : > { %v2216_v61 = vld [vmem:[%s2801_s11 + $0x28] sm:$0xff]   ;;  %s434_s24 = scalar_lea.vmem [#allocation3], %s1884_s20 }
 0xbeb   : > { %s1818_s30 = sshll.u32 %s434_s24, 4  ;;  %s2739_s30 = int_to_ptr.vmem [resolvable:$true] %s1818_s30 }
 0xbec   : > { %s2267_s23 = scalar_lea.vmem %s2739_s30, 256  ;;  %p2274_p0 = scmp.lt.s32.totalorder %s2739_s30, %s2272_s1 }
 0xbed   : > { %p2268_p11 = scmp.ne.s32.totalorder %s2739_s30, %s2267_s23  ;;  %p2275_p1 = scmp.lt.s32.totalorder %s2273_s2, %s2267_s23 }
 0xbef   : > { %p2269_p12 = pnand %p2268_p11, %p2457_p5  ;;  %p2276_p2 = por %p2275_p1, %p2274_p0 }
 0xbf1   : > { %p2270_p13 = pneg %p2269_p12 }
 0xbf3   : > { %p2277_p3 = pnand %p2276_p2, %p2270_p13 }
 0xc5b   : > { %v2202_v5 = vpop.permute.xlu0 %2201 }
 0xc5c   : > { %v2204_v8 = vunpack.i.h.bf16 %v2202_v5  ;;  %v2203_v9 = vunpack.i.l.bf16 %v2202_v5 }
 0xc5e   : > { %v1482_v12 = vsel %vm1480_vm5, %v1479_v11, %v2204_v8  ;;  %v1481_v13 = vsel %vm1480_vm5, %v1478_v10, %v2203_v9 }
 0xc5f   : > { %v1483_v14 = vpack.c.bf16 %v1482_v12, %v1481_v13 }
 0xc61   : > { %1484 = vst.msk [vmem:[#allocation2] sm:$0xff] %vm445_vm0, %v1483_v14 }
 0xc68   : > { %v1494_v16 = vld [vmem:[#allocation2] sm:$0xff] }
 0xc69   : > { %2103 = vmatmul.mubr.msk.bf16.vlgmr.msra.gmra.mrb[28].mxu1 %vm445_vm0, %v1494_v16 }
 0xc6a   : > { %2130 = vmatprep.mubr.msk.bf16.mxu1 %vm2332_vm1, %v2331_v15  ;;  %2115 = vmatpush3.bf16.msra.mxu1 %v2211_v56 }
 0xc6b   : > { %2116 = vmatprep.subr.bf16.mxu1 %v2331_v15 }
 0xc6e   : > { %2117 = vmatpush3.bf16.msra.mxu1 %v2212_v57 }
 0xc6f   : > { %2118 = vmatprep.subr.bf16.mxu1 %v2331_v15 }
 0xc72   : > { %2119 = vmatpush3.bf16.msra.mxu1 %v2213_v58 }
 0xc73   : > { %2120 = vmatprep.subr.bf16.mxu1 %v2331_v15 }
 0xc76   : > { %2121 = vmatpush3.bf16.msra.mxu1 %v2214_v59 }
 0xc77   : > { %2122 = vmatprep.subr.bf16.mxu1 %v2331_v15 }
 0xc7a   : > { %2123 = vmatpush3.bf16.msra.mxu1 %v2215_v60 }
 0xc7b   : > { %2124 = vmatprep.subr.bf16.mxu1 %v2331_v15 }
 0xc7e   : > { %2125 = vmatpush3.bf16.msra.mxu1 %v2216_v61 }
 0xc7f   : > { %2126 = vmatprep.subr.bf16.mxu1 %v2331_v15 }
 0xc82   : > { %2127 = vmatpush3.bf16.msra.mxu1 %v2217_v62 }
 0xc83   : > { %2128 = vmatprep.subr.bf16.mxu1 %v2331_v15 }
 0xc86   : > { %2129 = vmatpush3.bf16.msra.mxu1 %v2218_v63 }
 0xd3c   : > { %v1548_v19 = vpop.f32.mrb[28].mxu1 }
 0xd3d   : > { %v2672_v20 = vadd.f32 %v1548_v19, %v1492_v28  ;;  %v2104_v23 = vpop.f32.mrb[29].mxu1 }
 0xd3e   : > { %v1551_v24 = vpop.f32.mrb[30].mxu1  ;;  %v1919_v23 = vld [vmem:[%s2802_s12] ss:$0 sm:$0xff] }
 0xd3f   : > { %v2674_v25 = vadd.f32 %v1551_v24, %v1493_v18  ;;  %v2105_v26 = vpop.f32.mrb[31].mxu1  ;;  %v1557_v27 = vsel %vm445_vm0, %v2672_v20, 0.0  ;;  %v1609_v24 = vadd.f32 %v1919_v23, %v2672_v20 }
 0xd40   : > { %1558 = vadd.xlane.f32.xlu1 %v1557_v27 }
 0xd41   : > { %v1560_v29 = vsel %vm445_vm0, %v2674_v25, 0.0 }
 0xd42   : > { %1561 = vadd.xlane.f32.xlu0 %v1560_v29 }
 0xdcd   : > { %v1559_v30 = vpop.xlane.xlu1 %1558 }
 0xdce   : > { %v1563_v0 = vmul.f32 0.03125, %v1559_v30  ;;  %v1610_v30 = vadd.f32 %v1919_v23, %v2674_v25 }
 0xdcf   : > { %v1562_v31 = vpop.xlane.xlu0 %1561 }
 0xdd0   : > { %v1565_v1 = vsub.f32 %v2672_v20, %v1563_v0  ;;  %v1564_v33 = vmul.f32 0.03125, %v1562_v31 }
 0xdd2   : > { %v1566_v34 = vsub.f32 %v2674_v25, %v1564_v33  ;;  %v1567_v35 = vmul.f32 %v1565_v1, %v1565_v1 }
 0xdd4   : > { %v1569_v36 = vsel %vm445_vm0, %v1567_v35, 0.0  ;;  %v1568_v37 = vmul.f32 %v1566_v34, %v1566_v34 }
 0xdd5   : > { %1570 = vadd.xlane.f32.xlu0 %v1569_v36 }
 0xdd6   : > { %v1572_v38 = vsel %vm445_vm0, %v1568_v37, 0.0 }
 0xdd9   : > { %1573 = vadd.xlane.f32.xlu0 %v1572_v38 }
 0xe62   : > { %v1571_v21 = vpop.xlane.xlu0 %1570 }
 0xe63   : > { %v1575_v22 = vmul.f32 0.03125, %v1571_v21 }
 0xe65   : > { %v1577_v40 = vadd.f32 1e-05, %v1575_v22 }
 0xe66   : > { %v1574_v41 = vpop.xlane.xlu0 %1573 }
 0xe67   : > { %2255 = vrsqrt.f32 %v1577_v40  ;;  %v1576_v43 = vmul.f32 0.03125, %v1574_v41 }
 0xe69   : > { %v1578_v44 = vadd.f32 1e-05, %v1576_v43 }
 0xe6b   : > { %2257 = vrsqrt.f32 %v1578_v44 }
 0xe71   : > { %v2256_v45 = vpop.eup %2255 }
 0xe72   : > { %v1581_v46 = vmul.f32 %v2256_v45, %v1565_v1 }
 0xe74   : > { %v1590_v51 = vmul.f32 %v1917_v48, %v1581_v46 }
 0xe75   : > { %v2258_v49 = vpop.eup %2257 }
 0xe76   : > { %v1582_v39 = vmul.f32 %v2258_v49, %v1566_v34  ;;  %v1599_v53 = vadd.f32 %v1918_v52, %v1590_v51 }
 0xe78   : > { %v1591_v50 = vmul.f32 %v1917_v48, %v1582_v39 }
 0xe7a   : > { %v1600_v54 = vadd.f32 %v1918_v52, %v1591_v50 }
 0xe7c   : > { %v1601_v55 = vpack.c.bf16 %v1600_v54, %v1599_v53 }
 0xe7e   : > { %2111 = vmatmul.mubr.msk.bf16.vlgmr.msra.gmra.mrb[40].mxu0 %vm445_vm0, %v1601_v55 }
 0xf51   : > { %v1671_v2 = vpop.f32.mrb[40].mxu0 }
 0xf52   : > { %v1672_v3 = vadd.f32 %v1920_v47, %v1671_v2  ;;  %v2112_v4 = vpop.f32.mrb[41].mxu0 }
 0xf53   : > { %v1674_v5 = vpop.f32.mrb[42].mxu0 }
 0xf54   : > { %v1924_v6 = vmul.f32 -1.702, %v1672_v3  ;;  %v1675_v7 = vadd.f32 %v1920_v47, %v1674_v5  ;;  %v2113_v8 = vpop.f32.mrb[43].mxu0 }
 0xf56   : > { %v1682_v9 = vmul.f32 1.442695, %v1924_v6  ;;  %v1925_v10 = vmul.f32 -1.702, %v1675_v7 }
 0xf58   : > { %2259 = vpow2.f32 %v1682_v9  ;;  %v1684_v15 = vmul.f32 1.442695, %v1925_v10 }
 0xf5a   : > { %2261 = vpow2.f32 %v1684_v15 }
 0xf62   : > { %v2260_v11 = vpop.eup %2259 }
 0xf63   : > { %v1686_v12 = vadd.f32 1.0, %v2260_v11 }
 0xf64   : > { %v2262_v13 = vpop.eup %2261 }
 0xf65   : > { %2263 = vrcp.f32 %v1686_v12  ;;  %v1687_v14 = vadd.f32 1.0, %v2262_v13 }
 0xf67   : > { %2265 = vrcp.f32 %v1687_v14 }
 0xf6f   : > { %v2264_v16 = vpop.eup %2263 }
 0xf70   : > { %v1692_v28 = vmul.f32 %v2264_v16, %v1672_v3 }
 0xf71   : > { %v2266_v32 = vpop.eup %2265 }
 0xf72   : > { %v1693_v18 = vmul.f32 %v2266_v32, %v1675_v7 }
 0xf74   : > { %v1694_v19 = vpack.c.bf16 %v1693_v18, %v1692_v28 }
 0xf76   : > { %2131 = vmatmul.mubr.bf16.vlgmr.msra.gmra.mrb[32].mxu1 %v1694_v19 }
0x1049   : > { %v1793_v26 = vpop.f32.mrb[32].mxu1 }
0x104a   : > { %v1800_v27 = vadd.f32 %v1793_v26, %v1609_v24  ;;  %v2132_v29 = vpop.f32.mrb[33].mxu1 }
0x104b   : > { %v1796_v0 = vpop.f32.mrb[34].mxu1 }
0x104c   : > { %1802 = vst.msk [vmem:[%s434_s24] sm:$0xff] %vm445_vm0, %v1800_v27  ;;  %v1801_v31 = vadd.f32 %v1796_v0, %v1610_v30  ;;  %v2133_v1 = vpop.f32.mrb[35].mxu1 }
0x104e   : > { %1803 = vst.msk [vmem:[%s434_s24 + $0x8] sm:$0xff] %vm445_vm0, %v1801_v31 }
0x104f   : > { %2280 = shalt.err (!%p2277_p3)
}
0x1050   : > { %s2281_s22 = scalar_lea.hbm %s2745_s21, 256  ;;  %s2285_s0 = scalar_lea.hbm %s2803_s13, 512 }
0x1051   : > { %p2282_p4 = scmp.ne.s32.totalorder %s2745_s21, %s2281_s22  ;;  %p2286_p9 = scmp.lt.u32.totalorder %s2745_s21, %s2803_s13 }
0x1052   : > { %p2287_p10 = scmp.lt.u32.totalorder %s2285_s0, %s2281_s22  ;;  %p2289_p12 = scmp.lt.u32.totalorder %s2281_s22, %s2745_s21 }
0x1053   : > { %p2283_p7 = pnand %p2282_p4, %p2457_p5 }
0x1054   : > { %p2288_p11 = por %p2287_p10, %p2286_p9 }
0x1055   : > { %p2284_p8 = pneg %p2283_p7 }
0x1056   : > { %p2290_p13 = por %p2289_p12, %p2288_p11 }
0x1058   : > { %p2291_p0 = pnand %p2290_p13, %p2284_p8 }
0x105a   : > { %2294 = shalt.err (!%p2291_p0)
}
0x105b   : > { %s2348_s2 = smov 128   ;;  %s2813_s20 = smov 8  }
0x105c   : > { %2134 = dma.vmem_to_hbm [thread:$0]  (%p2457_p5), %s2739_s30, 256, %s2745_s21, %s2748_s29, %s2348_s2, %s2348_s2, %s2813_s20  }
0x105d PF: > { %p2140_p1 = scmp.ge.s32.totalorder %s2329_s28, 2  ;;  %s1833_s23 = sand.u32 1, %s2317_s25  }
0x105e   : > { %s1834_s22 = scalar_lea.sflag [#allocation4], %s1833_s23 }
0x105f   : > { %p2137_p2 = pnand %p2140_p1, %p2461_p6 }
0x1061   : > { %2312 = dma.done.wait (!%p2137_p2), %s1834_s22, 256  }
0x1062   : > { %2314 = vsyncadd (!%p2137_p2), %s1834_s22, 4294967040  ;;  %p23_p3 = scmp.ge.s32.totalorder %s2444_s14, 4   ;;  %s2814_s25 = smov %s2321_s26 }
0x1063   : > { %s2815_s26 = smov %s2325_s27  ;;  %s2816_s27 = smov %s2455_s17 }
0x1064   : > { %s2817_s28 = smov %s2444_s14  ;;  %25 = sbr.rel (!%p23_p3) target bundleno = 7 (0x7), region = 107 }
0x106b   :  { %1839 = vsyncpa [#allocation4], 1 }
0x106c   :  { %1841 = vsyncpa [#allocation4 + $0x1], 1 }

</bundles_post_ra>
